<compile_context>
chip_gen: v6e
topology: v6e:2x2x1
jax: 0.10.0
libtpu: 0.0.40
codegen_flags: <defaults>
</compile_context>

<pallas_src>
import jax
import jax.numpy as jnp
from jax.experimental import pallas as pl
from jax.experimental.pallas import tpu as pltpu


# --------------------------------------------------------------------------
# Pallas kernels
# --------------------------------------------------------------------------
def _matmul_lrelu_kernel(p_ref, w_ref, o_ref):
    """One M-tile of P @ W (bf16 in, f32 accumulate) + fused LeakyReLU(0.2)."""
    acc = jnp.dot(p_ref[...], w_ref[...], preferred_element_type=jnp.float32)
    y = jnp.where(acc > 0, acc, 0.2 * acc)
    o_ref[...] = y.astype(o_ref.dtype)


def _matmul_bn_lrelu_kernel(p_ref, w_ref, o_ref):
    """Full-M block of P @ W with fused training-mode BatchNorm2d
    (batch statistics, gamma=1, beta=0, eps=1e-5) + LeakyReLU(0.2).

    The activation stays resident in VMEM, so stats (two-pass, centered
    variance) and the normalize-apply happen in one pallas_call - no second
    kernel launch and no HBM write+read round trip of the pre-BN activation.
    Zero-padded Cout columns stay exactly zero through the epilogue."""
    acc = jnp.dot(p_ref[...], w_ref[...], preferred_element_type=jnp.float32)
    mean = jnp.mean(acc, axis=0, keepdims=True)
    centered = acc - mean
    var = jnp.mean(centered * centered, axis=0, keepdims=True)
    y = centered * jax.lax.rsqrt(var + 1e-5)          # gamma = 1, beta = 0
    y = jnp.where(y > 0, y, 0.2 * y)
    o_ref[...] = y.astype(o_ref.dtype)


# --------------------------------------------------------------------------
# Pallas wrappers
# --------------------------------------------------------------------------
def pallas_conv_lrelu(p, wk, max_tm=1024):
    """Tiled-over-M bf16 matmul + LeakyReLU. Output bf16, lane-dense (N=128k).

    Large M tiles (<= 2-4 grid steps) keep per-step pipeline overhead small;
    grid stays >= 2 for layer 1 so both v7x TensorCores are used. Trailing
    rows are zero-padded (and sliced off) when max_tm does not divide M."""
    M, K = p.shape
    N = wk.shape[1]
    if M <= max_tm:
        tm, Mp = M, M
    else:
        tm = max_tm
        Mp = pl.cdiv(M, tm) * tm
        if Mp != M:
            p = jnp.pad(p, ((0, Mp - M), (0, 0)))
    out = pl.pallas_call(
        _matmul_lrelu_kernel,
        out_shape=jax.ShapeDtypeStruct((Mp, N), jnp.bfloat16),
        grid_spec=pltpu.PrefetchScalarGridSpec(
            num_scalar_prefetch=0,
            grid=(Mp // tm,),
            in_specs=[
                pl.BlockSpec((tm, K), lambda i: (i, 0)),
                pl.BlockSpec((K, N), lambda i: (0, 0)),
            ],
            out_specs=pl.BlockSpec((tm, N), lambda i: (i, 0)),
        ),
        compiler_params=pltpu.CompilerParams(
            dimension_semantics=("parallel",)),
    )(p, wk)
    return out[:M] if Mp != M else out


def pallas_conv_bn_lrelu(p, wk):
    """Single-block bf16 matmul with fully fused BatchNorm + LeakyReLU.

    BN needs the whole M extent for its statistics; at these sizes the full
    (M,K)+(K,N)+(M,N) footprint is < 1 MiB, far under even v7x's 64 MiB VMEM,
    so one grid step with everything resident is the cheapest structure."""
    M, K = p.shape
    N = wk.shape[1]
    return pl.pallas_call(
        _matmul_bn_lrelu_kernel,
        out_shape=jax.ShapeDtypeStruct((M, N), jnp.bfloat16),
        grid_spec=pltpu.PrefetchScalarGridSpec(
            num_scalar_prefetch=0,
            grid=(1,),
            in_specs=[
                pl.BlockSpec((M, K), lambda i: (0, 0)),
                pl.BlockSpec((K, N), lambda i: (0, 0)),
            ],
            out_specs=pl.BlockSpec((M, N), lambda i: (0, 0)),
        ),
        compiler_params=pltpu.CompilerParams(
            dimension_semantics=("arbitrary",)),
    )(p, wk)


# --------------------------------------------------------------------------
# im2col (NHWC, XLA glue) and layer composition
# --------------------------------------------------------------------------
def _round_up(v, m):
    return ((v + m - 1) // m) * m


def im2col_nhwc(x, kh, kw, stride, pad):
    """x: [B, H, W, C] -> (P[B*OH*OW, kh*kw*C], OH, OW); K ordered (kh, kw, C)."""
    B, H, W, C = x.shape
    xp = jnp.pad(x, ((0, 0), (pad, pad), (pad, pad), (0, 0)))
    OH = (H + 2 * pad - kh) // stride + 1
    OW = (W + 2 * pad - kw) // stride + 1
    cols = []
    for i in range(kh):
        for j in range(kw):
            cols.append(xp[:, i:i + stride * OH:stride,
                              j:j + stride * OW:stride, :])   # [B, OH, OW, C]
    p = jnp.stack(cols, axis=3)                                # [B,OH,OW,kh*kw,C]
    return p.reshape(B * OH * OW, kh * kw * C), OH, OW


def _prep_weight(w, cin_pad, cout_pad):
    """PyTorch [Cout, Cin, KH, KW] -> bf16 [KH*KW*cin_pad, cout_pad] matching
    the (kh, kw, C) im2col ordering; Cin/Cout zero-padded."""
    cout, cin, kh, kw = w.shape
    if cin_pad > cin:
        w = jnp.pad(w, ((0, 0), (0, cin_pad - cin), (0, 0), (0, 0)))
    wk = jnp.transpose(w, (2, 3, 1, 0)).reshape(kh * kw * cin_pad, cout)
    if cout_pad > cout:
        wk = jnp.pad(wk, ((0, 0), (0, cout_pad - cout)))
    return wk.astype(jnp.bfloat16)


def conv_block(x, w, stride, pad, mode):
    """x: NHWC bf16 (channels possibly zero-padded), w: PyTorch-layout conv
    weight. mode in {'lrelu', 'bn_lrelu'}. Returns NHWC bf16 with exact Cout."""
    B = x.shape[0]
    cout = w.shape[0]
    cout_p = _round_up(cout, 128)                 # lane-dense output stores
    wk = _prep_weight(w, cin_pad=x.shape[-1], cout_pad=cout_p)
    p, OH, OW = im2col_nhwc(x, 4, 4, stride, pad)
    if mode == "lrelu":
        y = pallas_conv_lrelu(p, wk)
    else:
        y = pallas_conv_bn_lrelu(p, wk)
    if cout_p != cout:
        y = y[:, :cout]
    return y.reshape(B, OH, OW, cout)


def final_conv_sigmoid(x, w):
    """Last conv: 4x4, stride 1, pad 0 over a 4x4 map -> one dot per batch.
    Kept as plain JAX (M=B, K=2048, N=1 is far below pallas_call overhead)."""
    B = x.shape[0]
    kh, kw = w.shape[2], w.shape[3]
    wk = jnp.transpose(w, (2, 3, 1, 0)).reshape(kh * kw * w.shape[1])
    logits = jnp.dot(x.reshape(B, -1).astype(jnp.float32),
                     wk.astype(jnp.float32))
    return jax.nn.sigmoid(logits).reshape(B, 1, 1, 1)


def discriminator_forward(x_nchw, params):
    w1, w2, w3, w4, w5 = params
    # NCHW -> NHWC once; pad input channels 3 -> 8 so layer-1 K = 16*8 = 128.
    x = jnp.transpose(x_nchw, (0, 2, 3, 1)).astype(jnp.bfloat16)
    cin_p = _round_up(x.shape[-1], 8)
    if cin_p != x.shape[-1]:
        x = jnp.pad(x, ((0, 0), (0, 0), (0, 0), (0, cin_p - x.shape[-1])))
    h = conv_block(x, w1, stride=2, pad=1, mode="lrelu")      # [B, 32, 32, ndf]
    h = conv_block(h, w2, stride=2, pad=1, mode="bn_lrelu")   # [B, 16, 16, ndf*2]
    h = conv_block(h, w3, stride=2, pad=1, mode="bn_lrelu")   # [B,  8,  8, ndf*4]
    h = conv_block(h, w4, stride=2, pad=1, mode="bn_lrelu")   # [B,  4,  4, ndf*8]
    return final_conv_sigmoid(h, w5)                          # [B, 1, 1, 1]


# --------------------------------------------------------------------------
# Pure-JAX f32 reference (for validation only)
# --------------------------------------------------------------------------
def _reference_forward(x, params):
    def conv(x, w, stride, pad):
        return jax.lax.conv_general_dilated(
            x, w, window_strides=(stride, stride),
            padding=((pad, pad), (pad, pad)),
            dimension_numbers=("NCHW", "OIHW", "NCHW"))

    def bn_lrelu(x):
        mean = jnp.mean(x, axis=(0, 2, 3), keepdims=True)
        var = jnp.mean((x - mean) ** 2, axis=(0, 2, 3), keepdims=True)
        y = (x - mean) * jax.lax.rsqrt(var + 1e-5)
        return jnp.where(y > 0, y, 0.2 * y)

    def lrelu(x):
        return jnp.where(x > 0, x, 0.2 * x)

    w1, w2, w3, w4, w5 = params
    h = lrelu(conv(x, w1, 2, 1))
    h = bn_lrelu(conv(h, w2, 2, 1))
    h = bn_lrelu(conv(h, w3, 2, 1))
    h = bn_lrelu(conv(h, w4, 2, 1))
    return jax.nn.sigmoid(conv(h, w5, 1, 0))


def init_params(key, nc=3, ndf=16):
    """Deterministic DCGAN-style init: N(0, 0.02) conv weights, no bias."""
    ks = jax.random.split(key, 5)
    shapes = [
        (ndf, nc, 4, 4),
        (ndf * 2, ndf, 4, 4),
        (ndf * 4, ndf * 2, 4, 4),
        (ndf * 8, ndf * 4, 4, 4),
        (1, ndf * 8, 4, 4),
    ]
    return tuple(
        0.02 * jax.random.normal(k, s, dtype=jnp.float32)
        for k, s in zip(ks, shapes)
    )


if __name__ == "__main__":
    key = jax.random.PRNGKey(0)
    k_x, k_p = jax.random.split(key)

    B, nc, ndf, HW = 2, 3, 16, 64   # small ndf; 64x64 spatial required by the net
    x = jax.random.normal(k_x, (B, nc, HW, HW), dtype=jnp.float32)
    params = init_params(k_p, nc=nc, ndf=ndf)

    fwd = jax.jit(discriminator_forward)
    out = jax.block_until_ready(fwd(x, params))

    assert out.shape == (B, 1, 1, 1), out.shape
    assert bool(jnp.all((out >= 0.0) & (out <= 1.0)))

    ref = jax.block_until_ready(_reference_forward(x, params))
    max_err = float(jnp.max(jnp.abs(out.astype(jnp.float32) - ref)))
    assert max_err < 3e-2, max_err   # bf16 matmul inputs vs f32 reference

    print("KERNEL_OK")
</pallas_src>

<mosaic_0001>
module attributes {stable_mosaic.version = 11 : i64} {
  func.func @_matmul_lrelu_kernel(%arg0: i32, %arg1: memref<1024x128xbf16, #tpu.memory_space<vmem>>, %arg2: memref<128x128xbf16, #tpu.memory_space<vmem>>, %arg3: memref<1024x128xbf16, #tpu.memory_space<vmem>>) attributes {dimension_semantics = [#tpu.dimension_semantics<parallel>], iteration_bounds = array<i64: 2>, scalar_prefetch = 0 : i64, scratch_operands = 0 : i64, tpu.core_type = #tpu.core_type<tc>, window_params = [{transform_indices = @transform_0, window_bounds = array<i64: 1024, 128>}, {pipeline_mode = #tpu.pipeline_mode<synchronous>, transform_indices = @transform_1, window_bounds = array<i64: 128, 128>}, {transform_indices = @transform_2, window_bounds = array<i64: 1024, 128>}]} {
    %c0 = arith.constant 0 : index
    %c0_0 = arith.constant 0 : index
    %0 = vector.load %arg1[%c0, %c0_0] : memref<1024x128xbf16, #tpu.memory_space<vmem>>, vector<1024x128xbf16>
    %c0_1 = arith.constant 0 : index
    %c0_2 = arith.constant 0 : index
    %1 = vector.load %arg2[%c0_1, %c0_2] : memref<128x128xbf16, #tpu.memory_space<vmem>>, vector<128x128xbf16>
    %cst = arith.constant dense<0.000000e+00> : vector<1024x128xf32>
    %2 = tpu.matmul %0, %1, %cst {dimension_numbers = #tpu.dot_dimension_numbers<[1], [0], [0], [1], [0, 0, 1, 1], [], []>} : vector<1024x128xbf16>, vector<128x128xbf16>, vector<1024x128xf32> -> vector<1024x128xf32>
    %cst_3 = arith.constant 0.000000e+00 : f32
    %3 = vector.broadcast %cst_3 : f32 to vector<1024x128xf32>
    %4 = arith.cmpf ogt, %2, %3 : vector<1024x128xf32>
    %cst_4 = arith.constant 2.000000e-01 : f32
    %5 = vector.broadcast %cst_4 : f32 to vector<1024x128xf32>
    %6 = arith.mulf %5, %2 : vector<1024x128xf32>
    %7 = arith.select %4, %2, %6 : vector<1024x128xi1>, vector<1024x128xf32>
    %8 = arith.truncf %7 : vector<1024x128xf32> to vector<1024x128xbf16>
    %c0_5 = arith.constant 0 : index
    %c0_6 = arith.constant 0 : index
    %9 = vector.load %arg3[%c0_5, %c0_6] : memref<1024x128xbf16, #tpu.memory_space<vmem>>, vector<1024x128xbf16>
    tpu.vector_store %arg3[%c0_5, %c0_6], %8 {strides = array<i32>} : memref<1024x128xbf16, #tpu.memory_space<vmem>>, vector<1024x128xbf16>,
    return
  }
  func.func @transform_0(%arg0: i32) -> (i32, i32) {
    %c0_i32 = arith.constant 0 : i32
    %c0_i32_0 = arith.constant 0 : i32
    return %arg0, %c0_i32 : i32, i32
  }
  func.func @transform_1(%arg0: i32) -> (i32, i32) {
    %c0_i32 = arith.constant 0 : i32
    %c0_i32_0 = arith.constant 0 : i32
    %c0_i32_1 = arith.constant 0 : i32
    return %c0_i32, %c0_i32_0 : i32, i32
  }
  func.func @transform_2(%arg0: i32) -> (i32, i32) {
    %c0_i32 = arith.constant 0 : i32
    %c0_i32_0 = arith.constant 0 : i32
    return %arg0, %c0_i32 : i32, i32
  }
}

module attributes {stable_mosaic.version = 11 : i64} {
  func.func @_matmul_bn_lrelu_kernel(%arg0: i32, %arg1: memref<512x256xbf16, #tpu.memory_space<vmem>>, %arg2: memref<256x128xbf16, #tpu.memory_space<vmem>>, %arg3: memref<512x128xbf16, #tpu.memory_space<vmem>>) attributes {dimension_semantics = [#tpu.dimension_semantics<arbitrary>], iteration_bounds = array<i64: 1>, scalar_prefetch = 0 : i64, scratch_operands = 0 : i64, tpu.core_type = #tpu.core_type<tc>, window_params = [{pipeline_mode = #tpu.pipeline_mode<synchronous>, transform_indices = @transform_0, window_bounds = array<i64: 512, 256>}, {pipeline_mode = #tpu.pipeline_mode<synchronous>, transform_indices = @transform_1, window_bounds = array<i64: 256, 128>}, {pipeline_mode = #tpu.pipeline_mode<synchronous>, transform_indices = @transform_2, window_bounds = array<i64: 512, 128>}]} {
    %c0 = arith.constant 0 : index
    %c0_0 = arith.constant 0 : index
    %0 = vector.load %arg1[%c0, %c0_0] : memref<512x256xbf16, #tpu.memory_space<vmem>>, vector<512x256xbf16>
    %c0_1 = arith.constant 0 : index
    %c0_2 = arith.constant 0 : index
    %1 = vector.load %arg2[%c0_1, %c0_2] : memref<256x128xbf16, #tpu.memory_space<vmem>>, vector<256x128xbf16>
    %cst = arith.constant dense<0.000000e+00> : vector<512x128xf32>
    %2 = tpu.matmul %0, %1, %cst {dimension_numbers = #tpu.dot_dimension_numbers<[1], [0], [0], [1], [0, 0, 1, 1], [], []>} : vector<512x256xbf16>, vector<256x128xbf16>, vector<512x128xf32> -> vector<512x128xf32>
    %cst_3 = arith.constant dense<0.000000e+00> : vector<128xf32>
    %3 = vector.multi_reduction <add>, %2, %cst_3 [0] : vector<512x128xf32> to vector<128xf32>
    %4 = vector.shape_cast %3 : vector<128xf32> to vector<1x128xf32>
    %cst_4 = arith.constant 5.120000e+02 : f32
    %5 = vector.broadcast %cst_4 : f32 to vector<1x128xf32>
    %6 = arith.divf %4, %5 : vector<1x128xf32>
    %7 = vector.broadcast %6 : vector<1x128xf32> to vector<512x128xf32>
    %8 = arith.subf %2, %7 : vector<512x128xf32>
    %9 = arith.mulf %8, %8 : vector<512x128xf32>
    %cst_5 = arith.constant dense<0.000000e+00> : vector<128xf32>
    %10 = vector.multi_reduction <add>, %9, %cst_5 [0] : vector<512x128xf32> to vector<128xf32>
    %11 = vector.shape_cast %10 : vector<128xf32> to vector<1x128xf32>
    %cst_6 = arith.constant 5.120000e+02 : f32
    %12 = vector.broadcast %cst_6 : f32 to vector<1x128xf32>
    %13 = arith.divf %11, %12 : vector<1x128xf32>
    %cst_7 = arith.constant 9.99999974E-6 : f32
    %14 = vector.broadcast %cst_7 : f32 to vector<1x128xf32>
    %15 = arith.addf %13, %14 : vector<1x128xf32>
    %16 = math.rsqrt %15 : vector<1x128xf32>
    %17 = vector.broadcast %16 : vector<1x128xf32> to vector<512x128xf32>
    %18 = arith.mulf %8, %17 : vector<512x128xf32>
    %cst_8 = arith.constant 0.000000e+00 : f32
    %19 = vector.broadcast %cst_8 : f32 to vector<512x128xf32>
    %20 = arith.cmpf ogt, %18, %19 : vector<512x128xf32>
    %cst_9 = arith.constant 2.000000e-01 : f32
    %21 = vector.broadcast %cst_9 : f32 to vector<512x128xf32>
    %22 = arith.mulf %21, %18 : vector<512x128xf32>
    %23 = arith.select %20, %18, %22 : vector<512x128xi1>, vector<512x128xf32>
    %24 = arith.truncf %23 : vector<512x128xf32> to vector<512x128xbf16>
    %c0_10 = arith.constant 0 : index
    %c0_11 = arith.constant 0 : index
    %25 = vector.load %arg3[%c0_10, %c0_11] : memref<512x128xbf16, #tpu.memory_space<vmem>>, vector<512x128xbf16>
    tpu.vector_store %arg3[%c0_10, %c0_11], %24 {strides = array<i32>} : memref<512x128xbf16, #tpu.memory_space<vmem>>, vector<512x128xbf16>,
    return
  }
  func.func @transform_0(%arg0: i32) -> (i32, i32) {
    %c0_i32 = arith.constant 0 : i32
    %c0_i32_0 = arith.constant 0 : i32
    %c0_i32_1 = arith.constant 0 : i32
    return %c0_i32, %c0_i32_0 : i32, i32
  }
  func.func @transform_1(%arg0: i32) -> (i32, i32) {
    %c0_i32 = arith.constant 0 : i32
    %c0_i32_0 = arith.constant 0 : i32
    %c0_i32_1 = arith.constant 0 : i32
    return %c0_i32, %c0_i32_0 : i32, i32
  }
  func.func @transform_2(%arg0: i32) -> (i32, i32) {
    %c0_i32 = arith.constant 0 : i32
    %c0_i32_0 = arith.constant 0 : i32
    %c0_i32_1 = arith.constant 0 : i32
    return %c0_i32, %c0_i32_0 : i32, i32
  }
}

module attributes {stable_mosaic.version = 11 : i64} {
  func.func @_matmul_bn_lrelu_kernel(%arg0: i32, %arg1: memref<128x512xbf16, #tpu.memory_space<vmem>>, %arg2: memref<512x128xbf16, #tpu.memory_space<vmem>>, %arg3: memref<128x128xbf16, #tpu.memory_space<vmem>>) attributes {dimension_semantics = [#tpu.dimension_semantics<arbitrary>], iteration_bounds = array<i64: 1>, scalar_prefetch = 0 : i64, scratch_operands = 0 : i64, tpu.core_type = #tpu.core_type<tc>, window_params = [{pipeline_mode = #tpu.pipeline_mode<synchronous>, transform_indices = @transform_0, window_bounds = array<i64: 128, 512>}, {pipeline_mode = #tpu.pipeline_mode<synchronous>, transform_indices = @transform_1, window_bounds = array<i64: 512, 128>}, {pipeline_mode = #tpu.pipeline_mode<synchronous>, transform_indices = @transform_2, window_bounds = array<i64: 128, 128>}]} {
    %c0 = arith.constant 0 : index
    %c0_0 = arith.constant 0 : index
    %0 = vector.load %arg1[%c0, %c0_0] : memref<128x512xbf16, #tpu.memory_space<vmem>>, vector<128x512xbf16>
    %c0_1 = arith.constant 0 : index
    %c0_2 = arith.constant 0 : index
    %1 = vector.load %arg2[%c0_1, %c0_2] : memref<512x128xbf16, #tpu.memory_space<vmem>>, vector<512x128xbf16>
    %cst = arith.constant dense<0.000000e+00> : vector<128x128xf32>
    %2 = tpu.matmul %0, %1, %cst {dimension_numbers = #tpu.dot_dimension_numbers<[1], [0], [0], [1], [0, 0, 1, 1], [], []>} : vector<128x512xbf16>, vector<512x128xbf16>, vector<128x128xf32> -> vector<128x128xf32>
    %cst_3 = arith.constant dense<0.000000e+00> : vector<128xf32>
    %3 = vector.multi_reduction <add>, %2, %cst_3 [0] : vector<128x128xf32> to vector<128xf32>
    %4 = vector.shape_cast %3 : vector<128xf32> to vector<1x128xf32>
    %cst_4 = arith.constant 1.280000e+02 : f32
    %5 = vector.broadcast %cst_4 : f32 to vector<1x128xf32>
    %6 = arith.divf %4, %5 : vector<1x128xf32>
    %7 = vector.broadcast %6 : vector<1x128xf32> to vector<128x128xf32>
    %8 = arith.subf %2, %7 : vector<128x128xf32>
    %9 = arith.mulf %8, %8 : vector<128x128xf32>
    %cst_5 = arith.constant dense<0.000000e+00> : vector<128xf32>
    %10 = vector.multi_reduction <add>, %9, %cst_5 [0] : vector<128x128xf32> to vector<128xf32>
    %11 = vector.shape_cast %10 : vector<128xf32> to vector<1x128xf32>
    %cst_6 = arith.constant 1.280000e+02 : f32
    %12 = vector.broadcast %cst_6 : f32 to vector<1x128xf32>
    %13 = arith.divf %11, %12 : vector<1x128xf32>
    %cst_7 = arith.constant 9.99999974E-6 : f32
    %14 = vector.broadcast %cst_7 : f32 to vector<1x128xf32>
    %15 = arith.addf %13, %14 : vector<1x128xf32>
    %16 = math.rsqrt %15 : vector<1x128xf32>
    %17 = vector.broadcast %16 : vector<1x128xf32> to vector<128x128xf32>
    %18 = arith.mulf %8, %17 : vector<128x128xf32>
    %cst_8 = arith.constant 0.000000e+00 : f32
    %19 = vector.broadcast %cst_8 : f32 to vector<128x128xf32>
    %20 = arith.cmpf ogt, %18, %19 : vector<128x128xf32>
    %cst_9 = arith.constant 2.000000e-01 : f32
    %21 = vector.broadcast %cst_9 : f32 to vector<128x128xf32>
    %22 = arith.mulf %21, %18 : vector<128x128xf32>
    %23 = arith.select %20, %18, %22 : vector<128x128xi1>, vector<128x128xf32>
    %24 = arith.truncf %23 : vector<128x128xf32> to vector<128x128xbf16>
    %c0_10 = arith.constant 0 : index
    %c0_11 = arith.constant 0 : index
    %25 = vector.load %arg3[%c0_10, %c0_11] : memref<128x128xbf16, #tpu.memory_space<vmem>>, vector<128x128xbf16>
    tpu.vector_store %arg3[%c0_10, %c0_11], %24 {strides = array<i32>} : memref<128x128xbf16, #tpu.memory_space<vmem>>, vector<128x128xbf16>,
    return
  }
  func.func @transform_0(%arg0: i32) -> (i32, i32) {
    %c0_i32 = arith.constant 0 : i32
    %c0_i32_0 = arith.constant 0 : i32
    %c0_i32_1 = arith.constant 0 : i32
    return %c0_i32, %c0_i32_0 : i32, i32
  }
  func.func @transform_1(%arg0: i32) -> (i32, i32) {
    %c0_i32 = arith.constant 0 : i32
    %c0_i32_0 = arith.constant 0 : i32
    %c0_i32_1 = arith.constant 0 : i32
    return %c0_i32, %c0_i32_0 : i32, i32
  }
  func.func @transform_2(%arg0: i32) -> (i32, i32) {
    %c0_i32 = arith.constant 0 : i32
    %c0_i32_0 = arith.constant 0 : i32
    %c0_i32_1 = arith.constant 0 : i32
    return %c0_i32, %c0_i32_0 : i32, i32
  }
}

module attributes {stable_mosaic.version = 11 : i64} {
  func.func @_matmul_bn_lrelu_kernel(%arg0: i32, %arg1: memref<32x1024xbf16, #tpu.memory_space<vmem>>, %arg2: memref<1024x128xbf16, #tpu.memory_space<vmem>>, %arg3: memref<32x128xbf16, #tpu.memory_space<vmem>>) attributes {dimension_semantics = [#tpu.dimension_semantics<arbitrary>], iteration_bounds = array<i64: 1>, scalar_prefetch = 0 : i64, scratch_operands = 0 : i64, tpu.core_type = #tpu.core_type<tc>, window_params = [{pipeline_mode = #tpu.pipeline_mode<synchronous>, transform_indices = @transform_0, window_bounds = array<i64: 32, 1024>}, {pipeline_mode = #tpu.pipeline_mode<synchronous>, transform_indices = @transform_1, window_bounds = array<i64: 1024, 128>}, {pipeline_mode = #tpu.pipeline_mode<synchronous>, transform_indices = @transform_2, window_bounds = array<i64: 32, 128>}]} {
    %c0 = arith.constant 0 : index
    %c0_0 = arith.constant 0 : index
    %0 = vector.load %arg1[%c0, %c0_0] : memref<32x1024xbf16, #tpu.memory_space<vmem>>, vector<32x1024xbf16>
    %c0_1 = arith.constant 0 : index
    %c0_2 = arith.constant 0 : index
    %1 = vector.load %arg2[%c0_1, %c0_2] : memref<1024x128xbf16, #tpu.memory_space<vmem>>, vector<1024x128xbf16>
    %cst = arith.constant dense<0.000000e+00> : vector<32x128xf32>
    %2 = tpu.matmul %0, %1, %cst {dimension_numbers = #tpu.dot_dimension_numbers<[1], [0], [0], [1], [0, 0, 1, 1], [], []>} : vector<32x1024xbf16>, vector<1024x128xbf16>, vector<32x128xf32> -> vector<32x128xf32>
    %cst_3 = arith.constant dense<0.000000e+00> : vector<128xf32>
    %3 = vector.multi_reduction <add>, %2, %cst_3 [0] : vector<32x128xf32> to vector<128xf32>
    %4 = vector.shape_cast %3 : vector<128xf32> to vector<1x128xf32>
    %cst_4 = arith.constant 3.200000e+01 : f32
    %5 = vector.broadcast %cst_4 : f32 to vector<1x128xf32>
    %6 = arith.divf %4, %5 : vector<1x128xf32>
    %7 = vector.broadcast %6 : vector<1x128xf32> to vector<32x128xf32>
    %8 = arith.subf %2, %7 : vector<32x128xf32>
    %9 = arith.mulf %8, %8 : vector<32x128xf32>
    %cst_5 = arith.constant dense<0.000000e+00> : vector<128xf32>
    %10 = vector.multi_reduction <add>, %9, %cst_5 [0] : vector<32x128xf32> to vector<128xf32>
    %11 = vector.shape_cast %10 : vector<128xf32> to vector<1x128xf32>
    %cst_6 = arith.constant 3.200000e+01 : f32
    %12 = vector.broadcast %cst_6 : f32 to vector<1x128xf32>
    %13 = arith.divf %11, %12 : vector<1x128xf32>
    %cst_7 = arith.constant 9.99999974E-6 : f32
    %14 = vector.broadcast %cst_7 : f32 to vector<1x128xf32>
    %15 = arith.addf %13, %14 : vector<1x128xf32>
    %16 = math.rsqrt %15 : vector<1x128xf32>
    %17 = vector.broadcast %16 : vector<1x128xf32> to vector<32x128xf32>
    %18 = arith.mulf %8, %17 : vector<32x128xf32>
    %cst_8 = arith.constant 0.000000e+00 : f32
    %19 = vector.broadcast %cst_8 : f32 to vector<32x128xf32>
    %20 = arith.cmpf ogt, %18, %19 : vector<32x128xf32>
    %cst_9 = arith.constant 2.000000e-01 : f32
    %21 = vector.broadcast %cst_9 : f32 to vector<32x128xf32>
    %22 = arith.mulf %21, %18 : vector<32x128xf32>
    %23 = arith.select %20, %18, %22 : vector<32x128xi1>, vector<32x128xf32>
    %24 = arith.truncf %23 : vector<32x128xf32> to vector<32x128xbf16>
    %c0_10 = arith.constant 0 : index
    %c0_11 = arith.constant 0 : index
    %25 = vector.load %arg3[%c0_10, %c0_11] : memref<32x128xbf16, #tpu.memory_space<vmem>>, vector<32x128xbf16>
    tpu.vector_store %arg3[%c0_10, %c0_11], %24 {strides = array<i32>} : memref<32x128xbf16, #tpu.memory_space<vmem>>, vector<32x128xbf16>,
    return
  }
  func.func @transform_0(%arg0: i32) -> (i32, i32) {
    %c0_i32 = arith.constant 0 : i32
    %c0_i32_0 = arith.constant 0 : i32
    %c0_i32_1 = arith.constant 0 : i32
    return %c0_i32, %c0_i32_0 : i32, i32
  }
  func.func @transform_1(%arg0: i32) -> (i32, i32) {
    %c0_i32 = arith.constant 0 : i32
    %c0_i32_0 = arith.constant 0 : i32
    %c0_i32_1 = arith.constant 0 : i32
    return %c0_i32, %c0_i32_0 : i32, i32
  }
  func.func @transform_2(%arg0: i32) -> (i32, i32) {
    %c0_i32 = arith.constant 0 : i32
    %c0_i32_0 = arith.constant 0 : i32
    %c0_i32_1 = arith.constant 0 : i32
    return %c0_i32, %c0_i32_0 : i32, i32
  }
}

</mosaic_0001>

<bundles_post_ra>
// kernel: discriminator_forward.4
= control target key start
LH: loop header
LB: loop body
LE: loop exit
PB: predicated region body
PF: predicated region fallthrough
CT: control target
= control target key end

     0   :  { %s3406_s9 = smov 0   ;;  %s3603_s0 = inlined_call_operand.vmem [shape: bf16[2048,128], index: 0, kind: input, shape index: {}]   ;;  %s3604_s1 = inlined_call_operand.vmem [shape: bf16[128,128], index: 1, kind: input, shape index: {}]   ;;  %s3605_s2 = inlined_call_operand.vmem [shape: bf16[2048,128], index: 2, kind: output, shape index: {}]  }
   0x1 LB: > { %s2349_s10 = sadd.s32 4294967295, %s3389_s9   ;;  %p2353_p0 = scmp.ge.s32.totalorder %s3389_s9, 1  ;;  %s3389_s9 = sphi %s3406_s9, %s12_s9  }
   0x2   : > { %p113_p1 = scmp.lt.s32.totalorder %s3389_s9, 3 }
   0x4   : > { %p114_p2 = pnand %p2353_p0, %p113_p1 }
   0x5   : > { %s2354_s13 = sshll.u32 (!%p114_p2), %s2349_s10, 7 }
   0x6   : > { %117 = sbr.rel (%p114_p2) target bundleno = 370 (0x172), region = 28  ;;  %p136_p3 = scmp.lt.s32.totalorder (!%p114_p2), %s2354_s13, 255 }
   0xb   : > { %v3311_v0 = vld [vmem:[%s3604_s1 + $0x38] sm:$0xff]   ;;  %v3312_v1 = vld [vmem:[%s3604_s1 + $0x30] sm:$0xff]   ;;  %s3607_s13 = smov (!%p136_p3, %s2354_s13), 255  ;;  %v3313_v2 = vld [vmem:[%s3604_s1 + $0x28] sm:$0xff]  }
   0xc   : > { %3143 = vmatprep.subr.bf16.mxu0 %v3311_v0  ;;  %3287 = vmatprep.subr.bf16.mxu1 %v3311_v0  ;;  %s2355_s18 = sshll.u32 %s3607_s13, 2  ;;  %v3314_v3 = vld [vmem:[%s3604_s1 + $0x20] sm:$0xff]   ;;  %v3315_v6 = vld [vmem:[%s3604_s1 + $0x18] sm:$0xff]   ;;  %v3316_v7 = vld [vmem:[%s3604_s1 + $0x10] sm:$0xff]  }
   0xd   : > { %3144 = vmatpush3.bf16.msra.mxu0 %v3311_v0  ;;  %3295 = vmatpush3.bf16.msra.mxu1 %v3311_v0  ;;  %s3431_s21 = scalar_lea.vmem %s3603_s0, %s2355_s18  ;;  %v3317_v8 = vld [vmem:[%s3604_s1 + $0x8] sm:$0xff]   ;;  %v3318_v9 = vld [vmem:[%s3604_s1] sm:$0xff]   ;;  %s3517_s6 = scalar_lea.vmem %s3605_s2, %s2355_s18 }
   0xe   : > { %3145 = vmatprep.subr.bf16.mxu0 %v3312_v1  ;;  %3288 = vmatprep.subr.bf16.mxu1 %v3312_v1  ;;  %v3319_v4 = vld [vmem:[%s3431_s21] sm:$0xff]   ;;  %v3321_v10 = vld [vmem:[%s3431_s21 + $0x8] sm:$0xff]   ;;  %v3323_v12 = vld [vmem:[%s3431_s21 + $0x10] sm:$0xff]  }
   0xf   : > { %v3320_v5 = vld [vmem:[%s3431_s21 + $0x100] sm:$0xff]   ;;  %3159 = vmatprep.mubr.bf16.mxu0 %v3319_v4  ;;  %v3322_v11 = vld [vmem:[%s3431_s21 + $0x108] sm:$0xff]   ;;  %v3324_v13 = vld [vmem:[%s3431_s21 + $0x110] sm:$0xff]  }
  0x10   : > { %3223 = vmatprep.mubr.bf16.mxu1 %v3320_v5  ;;  %v3325_v14 = vld [vmem:[%s3431_s21 + $0x18] sm:$0xff]   ;;  %v3327_v16 = vld [vmem:[%s3431_s21 + $0x20] sm:$0xff]   ;;  %v3329_v18 = vld [vmem:[%s3431_s21 + $0x28] sm:$0xff]  }
  0x11   : > { %3146 = vmatpush3.bf16.msra.mxu0 %v3312_v1  ;;  %3296 = vmatpush3.bf16.msra.mxu1 %v3312_v1  ;;  %v3326_v15 = vld [vmem:[%s3431_s21 + $0x118] sm:$0xff]   ;;  %v3328_v17 = vld [vmem:[%s3431_s21 + $0x120] sm:$0xff]   ;;  %v3330_v19 = vld [vmem:[%s3431_s21 + $0x128] sm:$0xff]  }
  0x12   : > { %3147 = vmatprep.subr.bf16.mxu0 %v3313_v2  ;;  %3289 = vmatprep.subr.bf16.mxu1 %v3313_v2  ;;  %v3331_v20 = vld [vmem:[%s3431_s21 + $0x30] sm:$0xff]   ;;  %v3333_v22 = vld [vmem:[%s3431_s21 + $0x38] sm:$0xff]   ;;  %v3335_v24 = vld [vmem:[%s3431_s21 + $0x40] sm:$0xff]  }
  0x13   : > { %v3332_v21 = vld [vmem:[%s3431_s21 + $0x130] sm:$0xff]   ;;  %v3334_v23 = vld [vmem:[%s3431_s21 + $0x138] sm:$0xff]   ;;  %v3336_v25 = vld [vmem:[%s3431_s21 + $0x140] sm:$0xff]  }
  0x14   : > { %v3337_v26 = vld [vmem:[%s3431_s21 + $0x48] sm:$0xff]   ;;  %v3339_v28 = vld [vmem:[%s3431_s21 + $0x50] sm:$0xff]   ;;  %v3341_v30 = vld [vmem:[%s3431_s21 + $0x58] sm:$0xff]  }
  0x15   : > { %3148 = vmatpush3.bf16.msra.mxu0 %v3313_v2  ;;  %3297 = vmatpush3.bf16.msra.mxu1 %v3313_v2  ;;  %v3338_v27 = vld [vmem:[%s3431_s21 + $0x148] sm:$0xff]   ;;  %v3340_v29 = vld [vmem:[%s3431_s21 + $0x150] sm:$0xff]   ;;  %v3342_v31 = vld [vmem:[%s3431_s21 + $0x158] sm:$0xff]  }
  0x16   : > { %3149 = vmatprep.subr.bf16.mxu0 %v3314_v3  ;;  %3290 = vmatprep.subr.bf16.mxu1 %v3314_v3  ;;  %v3343_v32 = vld [vmem:[%s3431_s21 + $0x60] sm:$0xff]   ;;  %v3345_v34 = vld [vmem:[%s3431_s21 + $0x68] sm:$0xff]   ;;  %v3347_v36 = vld [vmem:[%s3431_s21 + $0x70] sm:$0xff]  }
  0x17   : > { %v3344_v33 = vld [vmem:[%s3431_s21 + $0x160] sm:$0xff]   ;;  %v3346_v35 = vld [vmem:[%s3431_s21 + $0x168] sm:$0xff]   ;;  %v3348_v37 = vld [vmem:[%s3431_s21 + $0x170] sm:$0xff]  }
  0x18   : > { %v3349_v38 = vld [vmem:[%s3431_s21 + $0x78] sm:$0xff]   ;;  %v3351_v40 = vld [vmem:[%s3431_s21 + $0x80] sm:$0xff]   ;;  %v3353_v42 = vld [vmem:[%s3431_s21 + $0x88] sm:$0xff]  }
  0x19   : > { %3150 = vmatpush3.bf16.msra.mxu0 %v3314_v3  ;;  %3298 = vmatpush3.bf16.msra.mxu1 %v3314_v3  ;;  %v3350_v39 = vld [vmem:[%s3431_s21 + $0x178] sm:$0xff]   ;;  %v3352_v41 = vld [vmem:[%s3431_s21 + $0x180] sm:$0xff]   ;;  %v3354_v43 = vld [vmem:[%s3431_s21 + $0x188] sm:$0xff]  }
  0x1a   : > { %3151 = vmatprep.subr.bf16.mxu0 %v3315_v6  ;;  %3291 = vmatprep.subr.bf16.mxu1 %v3315_v6  ;;  %v3355_v44 = vld [vmem:[%s3431_s21 + $0x90] sm:$0xff]   ;;  %v3357_v46 = vld [vmem:[%s3431_s21 + $0x98] sm:$0xff]   ;;  %v3359_v48 = vld [vmem:[%s3431_s21 + $0xa0] sm:$0xff]  }
  0x1b   : > { %v3356_v45 = vld [vmem:[%s3431_s21 + $0x190] sm:$0xff]   ;;  %v3358_v47 = vld [vmem:[%s3431_s21 + $0x198] sm:$0xff]   ;;  %v3360_v49 = vld [vmem:[%s3431_s21 + $0x1a0] sm:$0xff]  }
  0x1c   : > { %v3361_v50 = vld [vmem:[%s3431_s21 + $0xa8] sm:$0xff]   ;;  %v3363_v52 = vld [vmem:[%s3431_s21 + $0xb0] sm:$0xff]   ;;  %v3365_v54 = vld [vmem:[%s3431_s21 + $0xb8] sm:$0xff]  }
  0x1d   : > { %3152 = vmatpush3.bf16.msra.mxu0 %v3315_v6  ;;  %3299 = vmatpush3.bf16.msra.mxu1 %v3315_v6  ;;  %v3362_v51 = vld [vmem:[%s3431_s21 + $0x1a8] sm:$0xff]   ;;  %v3364_v53 = vld [vmem:[%s3431_s21 + $0x1b0] sm:$0xff]   ;;  %v3366_v55 = vld [vmem:[%s3431_s21 + $0x1b8] sm:$0xff]  }
  0x1e   : > { %3153 = vmatprep.subr.bf16.mxu0 %v3316_v7  ;;  %3292 = vmatprep.subr.bf16.mxu1 %v3316_v7  ;;  %v3367_v56 = vld [vmem:[%s3431_s21 + $0xc0] sm:$0xff]   ;;  %v3369_v58 = vld [vmem:[%s3431_s21 + $0xc8] sm:$0xff]   ;;  %v3371_v60 = vld [vmem:[%s3431_s21 + $0xd0] sm:$0xff]  }
  0x1f   : > { %v3368_v57 = vld [vmem:[%s3431_s21 + $0x1c0] sm:$0xff]   ;;  %v3370_v59 = vld [vmem:[%s3431_s21 + $0x1c8] sm:$0xff]   ;;  %v3372_v61 = vld [vmem:[%s3431_s21 + $0x1d0] sm:$0xff]  }
  0x20   : > { %v3373_v62 = vld [vmem:[%s3431_s21 + $0xd8] sm:$0xff]   ;;  %v3375_v0 = vld [vmem:[%s3431_s21 + $0xe0] sm:$0xff]   ;;  %v3377_v2 = vld [vmem:[%s3431_s21 + $0xe8] sm:$0xff]  }
  0x21   : > { %3154 = vmatpush3.bf16.msra.mxu0 %v3316_v7  ;;  %3300 = vmatpush3.bf16.msra.mxu1 %v3316_v7  ;;  %v3374_v63 = vld [vmem:[%s3431_s21 + $0x1d8] sm:$0xff]   ;;  %v3376_v1 = vld [vmem:[%s3431_s21 + $0x1e0] sm:$0xff]   ;;  %v3378_v3 = vld [vmem:[%s3431_s21 + $0x1e8] sm:$0xff]  }
  0x22   : > { %3155 = vmatprep.subr.bf16.mxu0 %v3317_v8  ;;  %3293 = vmatprep.subr.bf16.mxu1 %v3317_v8  ;;  %v3379_v4 = vld [vmem:[%s3431_s21 + $0xf0] sm:$0xff]   ;;  %v3381_v6 = vld [vmem:[%s3431_s21 + $0xf8] sm:$0xff]  }
  0x23   : > { %v3380_v5 = vld [vmem:[%s3431_s21 + $0x1f0] sm:$0xff]   ;;  %v3382_v7 = vld [vmem:[%s3431_s21 + $0x1f8] sm:$0xff]  }
  0x25   : > { %3156 = vmatpush3.bf16.msra.mxu0 %v3317_v8  ;;  %3301 = vmatpush3.bf16.msra.mxu1 %v3317_v8 }
  0x26   : > { %3157 = vmatprep.subr.bf16.mxu0 %v3318_v9  ;;  %3294 = vmatprep.subr.bf16.mxu1 %v3318_v9 }
  0x29   : > { %3158 = vmatpush3.bf16.msra.mxu0 %v3318_v9  ;;  %3302 = vmatpush3.bf16.msra.mxu1 %v3318_v9 }
  0x2c   : > { %3160 = vmatmul.mubr.bf16.vlgmr.msra.gmra.mxu0 %v3321_v10  ;;  %3224 = vmatmul.mubr.bf16.vlgmr.msra.gmra.mxu1 %v3322_v11 }
  0x2d   : > { %3163 = vmatprep.mubr.bf16.mxu0 %v3323_v12  ;;  %3227 = vmatprep.mubr.bf16.mxu1 %v3324_v13 }
  0x34   : > { %3164 = vmatmul.mubr.bf16.gmra.mxu0 %v3325_v14  ;;  %3228 = vmatmul.mubr.bf16.gmra.mxu1 %v3326_v15 }
  0x35   : > { %3167 = vmatprep.mubr.bf16.mxu0 %v3327_v16  ;;  %3231 = vmatprep.mubr.bf16.mxu1 %v3328_v17 }
  0x3c   : > { %3168 = vmatmul.mubr.bf16.gmra.mxu0 %v3329_v18  ;;  %3232 = vmatmul.mubr.bf16.gmra.mxu1 %v3330_v19 }
  0x3d   : > { %3171 = vmatprep.mubr.bf16.mxu0 %v3331_v20  ;;  %3235 = vmatprep.mubr.bf16.mxu1 %v3332_v21 }
  0x44   : > { %3172 = vmatmul.mubr.bf16.gmra.mxu0 %v3333_v22  ;;  %3236 = vmatmul.mubr.bf16.gmra.mxu1 %v3334_v23 }
  0x45   : > { %3175 = vmatprep.mubr.bf16.mxu0 %v3335_v24  ;;  %3239 = vmatprep.mubr.bf16.mxu1 %v3336_v25 }
  0x4c   : > { %3176 = vmatmul.mubr.bf16.gmra.mxu0 %v3337_v26  ;;  %3240 = vmatmul.mubr.bf16.gmra.mxu1 %v3338_v27 }
  0x4d   : > { %3179 = vmatprep.mubr.bf16.mxu0 %v3339_v28  ;;  %3243 = vmatprep.mubr.bf16.mxu1 %v3340_v29 }
  0x54   : > { %3180 = vmatmul.mubr.bf16.gmra.mxu0 %v3341_v30  ;;  %3244 = vmatmul.mubr.bf16.gmra.mxu1 %v3342_v31 }
  0x55   : > { %3183 = vmatprep.mubr.bf16.mxu0 %v3343_v32  ;;  %3247 = vmatprep.mubr.bf16.mxu1 %v3344_v33 }
  0x5c   : > { %3184 = vmatmul.mubr.bf16.gmra.mxu0 %v3345_v34  ;;  %3248 = vmatmul.mubr.bf16.gmra.mxu1 %v3346_v35 }
  0x5d   : > { %3187 = vmatprep.mubr.bf16.mxu0 %v3347_v36  ;;  %3251 = vmatprep.mubr.bf16.mxu1 %v3348_v37 }
  0x64   : > { %3188 = vmatmul.mubr.bf16.gmra.mxu0 %v3349_v38  ;;  %3252 = vmatmul.mubr.bf16.gmra.mxu1 %v3350_v39 }
  0x65   : > { %3191 = vmatprep.mubr.bf16.mxu0 %v3351_v40  ;;  %3255 = vmatprep.mubr.bf16.mxu1 %v3352_v41 }
  0x6c   : > { %3192 = vmatmul.mubr.bf16.gmra.mxu0 %v3353_v42  ;;  %3256 = vmatmul.mubr.bf16.gmra.mxu1 %v3354_v43 }
  0x6d   : > { %3195 = vmatprep.mubr.bf16.mxu0 %v3355_v44  ;;  %3259 = vmatprep.mubr.bf16.mxu1 %v3356_v45 }
  0x74   : > { %3196 = vmatmul.mubr.bf16.gmra.mxu0 %v3357_v46  ;;  %3260 = vmatmul.mubr.bf16.gmra.mxu1 %v3358_v47 }
  0x75   : > { %3199 = vmatprep.mubr.bf16.mxu0 %v3359_v48  ;;  %3263 = vmatprep.mubr.bf16.mxu1 %v3360_v49 }
  0x7c   : > { %3200 = vmatmul.mubr.bf16.gmra.mxu0 %v3361_v50  ;;  %3264 = vmatmul.mubr.bf16.gmra.mxu1 %v3362_v51 }
  0x7d   : > { %3203 = vmatprep.mubr.bf16.mxu0 %v3363_v52  ;;  %3267 = vmatprep.mubr.bf16.mxu1 %v3364_v53 }
  0x84   : > { %3204 = vmatmul.mubr.bf16.gmra.mxu0 %v3365_v54  ;;  %3268 = vmatmul.mubr.bf16.gmra.mxu1 %v3366_v55 }
  0x85   : > { %3207 = vmatprep.mubr.bf16.mxu0 %v3367_v56  ;;  %3271 = vmatprep.mubr.bf16.mxu1 %v3368_v57 }
  0x8c   : > { %3208 = vmatmul.mubr.bf16.gmra.mxu0 %v3369_v58  ;;  %3272 = vmatmul.mubr.bf16.gmra.mxu1 %v3370_v59 }
  0x8d   : > { %3211 = vmatprep.mubr.bf16.mxu0 %v3371_v60  ;;  %3275 = vmatprep.mubr.bf16.mxu1 %v3372_v61 }
  0x94   : > { %3212 = vmatmul.mubr.bf16.gmra.mxu0 %v3373_v62  ;;  %3276 = vmatmul.mubr.bf16.gmra.mxu1 %v3374_v63 }
  0x95   : > { %3215 = vmatprep.mubr.bf16.mxu0 %v3375_v0  ;;  %3279 = vmatprep.mubr.bf16.mxu1 %v3376_v1 }
  0x9c   : > { %3216 = vmatmul.mubr.bf16.gmra.mxu0 %v3377_v2  ;;  %3280 = vmatmul.mubr.bf16.gmra.mxu1 %v3378_v3 }
  0x9d   : > { %3219 = vmatprep.mubr.bf16.mxu0 %v3379_v4  ;;  %3283 = vmatprep.mubr.bf16.mxu1 %v3380_v5 }
  0xa4   : > { %3220 = vmatmul.mubr.bf16.gmra.mxu0 %v3381_v6  ;;  %3284 = vmatmul.mubr.bf16.gmra.mxu1 %v3382_v7 }
  0xec   : > { %v3161_v8 = vpop.f32.mrf.mxu0  ;;  %v3225_v9 = vpop.f32.mrf.mxu1 }
  0xed   : > { %vm1271_vm0 = vcmp.gt.f32.partialorder %v3161_v8, 0.0  ;;  %v1399_v10 = vmul.f32 0.2, %v3161_v8  ;;  %v1463_v11 = vmul.f32 0.2, %v3225_v9  ;;  %vm1335_vm1 = vcmp.gt.f32.partialorder %v3225_v9, 0.0 }
  0xee   : > { %v758_v12 = vpop.f32.mrf.mxu0  ;;  %v1014_v13 = vpop.f32.mrf.mxu1 }
  0xef   : > { %v1527_v14 = vsel %vm1271_vm0, %v3161_v8, %v1399_v10  ;;  %v1397_v15 = vmul.f32 0.2, %v758_v12  ;;  %vm1269_vm2 = vcmp.gt.f32.partialorder %v758_v12, 0.0  ;;  %v1591_v19 = vsel %vm1335_vm1, %v3225_v9, %v1463_v11 }
  0xf0   : > { %v3162_v16 = vpop.f32.mrf.mxu0  ;;  %v3226_v17 = vpop.f32.mrf.mxu1  ;;  %vm1333_vm5 = vcmp.gt.f32.partialorder %v1014_v13, 0.0  ;;  %v1461_v20 = vmul.f32 0.2, %v1014_v13 }
  0xf1   : > { %vm1272_vm3 = vcmp.gt.f32.partialorder %v3162_v16, 0.0  ;;  %v1400_v18 = vmul.f32 0.2, %v3162_v16  ;;  %vm1336_vm4 = vcmp.gt.f32.partialorder %v3226_v17, 0.0  ;;  %v1464_v21 = vmul.f32 0.2, %v3226_v17 }
  0xf2   : > { %v761_v22 = vpop.f32.mrf.mxu0  ;;  %v1017_v23 = vpop.f32.mrf.mxu1  ;;  %v1525_v26 = vsel %vm1269_vm2, %v758_v12, %v1397_v15  ;;  %v1589_v35 = vsel %vm1333_vm5, %v1014_v13, %v1461_v20 }
  0xf3   : > { %v1528_v24 = vsel %vm1272_vm3, %v3162_v16, %v1400_v18  ;;  %vm1270_vm6 = vcmp.gt.f32.partialorder %v761_v22, 0.0  ;;  %v1398_v25 = vmul.f32 0.2, %v761_v22  ;;  %vm1334_vm7 = vcmp.gt.f32.partialorder %v1017_v23, 0.0 }
  0xf4   : > { %v2696_v27 = vpack.c.bf16 %v1528_v24, %v1527_v14  ;;  %v1592_v28 = vsel %vm1336_vm4, %v3226_v17, %v1464_v21  ;;  %v1462_v29 = vmul.f32 0.2, %v1017_v23  ;;  %v3165_v30 = vpop.f32.mrf.mxu0  ;;  %v3229_v31 = vpop.f32.mrf.mxu1 }
  0xf5   : > { %v2856_v32 = vpack.c.bf16 %v1592_v28, %v1591_v19  ;;  %v1526_v33 = vsel %vm1270_vm6, %v761_v22, %v1398_v25  ;;  %vm1275_vm8 = vcmp.gt.f32.partialorder %v3165_v30, 0.0  ;;  %v1403_v34 = vmul.f32 0.2, %v3165_v30 }
  0xf6   : > { %3008 = vst [vmem:[%s3517_s6 + $0x8] sm:$0xff] %v2696_v27   ;;  %v2691_v36 = vpack.c.bf16 %v1526_v33, %v1525_v26  ;;  %v1590_v37 = vsel %vm1334_vm7, %v1017_v23, %v1462_v29  ;;  %v1467_v38 = vmul.f32 0.2, %v3229_v31  ;;  %v774_v39 = vpop.f32.mrf.mxu0  ;;  %v1030_v40 = vpop.f32.mrf.mxu1  ;;  %vm1339_vm9 = vcmp.gt.f32.partialorder %v3229_v31, 0.0 }
  0xf7   : > { %3040 = vst [vmem:[%s3517_s6 + $0x108] sm:$0xff] %v2856_v32   ;;  %v2851_v41 = vpack.c.bf16 %v1590_v37, %v1589_v35  ;;  %v1531_v42 = vsel %vm1275_vm8, %v3165_v30, %v1403_v34  ;;  %v1401_v43 = vmul.f32 0.2, %v774_v39  ;;  %vm1273_vm10 = vcmp.gt.f32.partialorder %v774_v39, 0.0 }
  0xf8   : > { %2692 = vst [vmem:[%s3517_s6] sm:$0xff] %v2691_v36   ;;  %v3166_v44 = vpop.f32.mrf.mxu0  ;;  %v3230_v45 = vpop.f32.mrf.mxu1  ;;  %v1595_v47 = vsel %vm1339_vm9, %v3229_v31, %v1467_v38  ;;  %vm1337_vm13 = vcmp.gt.f32.partialorder %v1030_v40, 0.0  ;;  %v1465_v48 = vmul.f32 0.2, %v1030_v40 }
  0xf9   : > { %3039 = vst [vmem:[%s3517_s6 + $0x100] sm:$0xff] %v2851_v41   ;;  %vm1276_vm11 = vcmp.gt.f32.partialorder %v3166_v44, 0.0  ;;  %v1404_v46 = vmul.f32 0.2, %v3166_v44  ;;  %vm1340_vm12 = vcmp.gt.f32.partialorder %v3230_v45, 0.0  ;;  %v1529_v54 = vsel %vm1273_vm10, %v774_v39, %v1401_v43 }
  0xfa   : > { %v1468_v49 = vmul.f32 0.2, %v3230_v45  ;;  %v777_v50 = vpop.f32.mrf.mxu0  ;;  %v1033_v51 = vpop.f32.mrf.mxu1  ;;  %v1593_v63 = vsel %vm1337_vm13, %v1030_v40, %v1465_v48 }
  0xfb   : > { %v1532_v52 = vsel %vm1276_vm11, %v3166_v44, %v1404_v46  ;;  %vm1274_vm14 = vcmp.gt.f32.partialorder %v777_v50, 0.0  ;;  %v1402_v53 = vmul.f32 0.2, %v777_v50  ;;  %vm1338_vm15 = vcmp.gt.f32.partialorder %v1033_v51, 0.0 }
  0xfc   : > { %v2706_v55 = vpack.c.bf16 %v1532_v52, %v1531_v42  ;;  %v1596_v56 = vsel %vm1340_vm12, %v3230_v45, %v1468_v49  ;;  %v1466_v57 = vmul.f32 0.2, %v1033_v51  ;;  %v3169_v58 = vpop.f32.mrf.mxu0  ;;  %v3233_v59 = vpop.f32.mrf.mxu1 }
  0xfd   : > { %v2866_v60 = vpack.c.bf16 %v1596_v56, %v1595_v47  ;;  %v1530_v61 = vsel %vm1274_vm14, %v777_v50, %v1402_v53  ;;  %vm1279_vm0 = vcmp.gt.f32.partialorder %v3169_v58, 0.0  ;;  %v1407_v62 = vmul.f32 0.2, %v3169_v58 }
  0xfe   : > { %3010 = vst [vmem:[%s3517_s6 + $0x18] sm:$0xff] %v2706_v55   ;;  %v2701_v0 = vpack.c.bf16 %v1530_v61, %v1529_v54  ;;  %v1594_v1 = vsel %vm1338_vm15, %v1033_v51, %v1466_v57  ;;  %v1471_v2 = vmul.f32 0.2, %v3233_v59  ;;  %v790_v3 = vpop.f32.mrf.mxu0  ;;  %v1046_v4 = vpop.f32.mrf.mxu1  ;;  %vm1343_vm1 = vcmp.gt.f32.partialorder %v3233_v59, 0.0 }
  0xff   : > { %3042 = vst [vmem:[%s3517_s6 + $0x118] sm:$0xff] %v2866_v60   ;;  %v2861_v5 = vpack.c.bf16 %v1594_v1, %v1593_v63  ;;  %v1535_v6 = vsel %vm1279_vm0, %v3169_v58, %v1407_v62  ;;  %v1405_v7 = vmul.f32 0.2, %v790_v3  ;;  %vm1277_vm2 = vcmp.gt.f32.partialorder %v790_v3, 0.0 }
 0x100   : > { %3009 = vst [vmem:[%s3517_s6 + $0x10] sm:$0xff] %v2701_v0   ;;  %v3170_v8 = vpop.f32.mrf.mxu0  ;;  %v3234_v9 = vpop.f32.mrf.mxu1  ;;  %v1599_v11 = vsel %vm1343_vm1, %v3233_v59, %v1471_v2  ;;  %vm1341_vm5 = vcmp.gt.f32.partialorder %v1046_v4, 0.0  ;;  %v1469_v12 = vmul.f32 0.2, %v1046_v4 }
 0x101   : > { %3041 = vst [vmem:[%s3517_s6 + $0x110] sm:$0xff] %v2861_v5   ;;  %vm1280_vm3 = vcmp.gt.f32.partialorder %v3170_v8, 0.0  ;;  %v1408_v10 = vmul.f32 0.2, %v3170_v8  ;;  %vm1344_vm4 = vcmp.gt.f32.partialorder %v3234_v9, 0.0  ;;  %v1533_v18 = vsel %vm1277_vm2, %v790_v3, %v1405_v7 }
 0x102   : > { %v1472_v13 = vmul.f32 0.2, %v3234_v9  ;;  %v793_v14 = vpop.f32.mrf.mxu0  ;;  %v1049_v15 = vpop.f32.mrf.mxu1  ;;  %v1597_v27 = vsel %vm1341_vm5, %v1046_v4, %v1469_v12 }
 0x103   : > { %v1536_v16 = vsel %vm1280_vm3, %v3170_v8, %v1408_v10  ;;  %vm1278_vm6 = vcmp.gt.f32.partialorder %v793_v14, 0.0  ;;  %v1406_v17 = vmul.f32 0.2, %v793_v14  ;;  %vm1342_vm7 = vcmp.gt.f32.partialorder %v1049_v15, 0.0 }
 0x104   : > { %v2716_v19 = vpack.c.bf16 %v1536_v16, %v1535_v6  ;;  %v1600_v20 = vsel %vm1344_vm4, %v3234_v9, %v1472_v13  ;;  %v1470_v21 = vmul.f32 0.2, %v1049_v15  ;;  %v3173_v22 = vpop.f32.mrf.mxu0  ;;  %v3237_v23 = vpop.f32.mrf.mxu1 }
 0x105   : > { %v2876_v24 = vpack.c.bf16 %v1600_v20, %v1599_v11  ;;  %v1534_v25 = vsel %vm1278_vm6, %v793_v14, %v1406_v17  ;;  %vm1283_vm8 = vcmp.gt.f32.partialorder %v3173_v22, 0.0  ;;  %v1411_v26 = vmul.f32 0.2, %v3173_v22 }
 0x106   : > { %3012 = vst [vmem:[%s3517_s6 + $0x28] sm:$0xff] %v2716_v19   ;;  %v2711_v28 = vpack.c.bf16 %v1534_v25, %v1533_v18  ;;  %v1598_v29 = vsel %vm1342_vm7, %v1049_v15, %v1470_v21  ;;  %v1475_v30 = vmul.f32 0.2, %v3237_v23  ;;  %v806_v31 = vpop.f32.mrf.mxu0  ;;  %v1062_v32 = vpop.f32.mrf.mxu1  ;;  %vm1347_vm9 = vcmp.gt.f32.partialorder %v3237_v23, 0.0 }
 0x107   : > { %3044 = vst [vmem:[%s3517_s6 + $0x128] sm:$0xff] %v2876_v24   ;;  %v2871_v33 = vpack.c.bf16 %v1598_v29, %v1597_v27  ;;  %v1539_v34 = vsel %vm1283_vm8, %v3173_v22, %v1411_v26  ;;  %v1409_v35 = vmul.f32 0.2, %v806_v31  ;;  %vm1281_vm10 = vcmp.gt.f32.partialorder %v806_v31, 0.0 }
 0x108   : > { %3011 = vst [vmem:[%s3517_s6 + $0x20] sm:$0xff] %v2711_v28   ;;  %v3174_v36 = vpop.f32.mrf.mxu0  ;;  %v3238_v37 = vpop.f32.mrf.mxu1  ;;  %v1603_v39 = vsel %vm1347_vm9, %v3237_v23, %v1475_v30  ;;  %vm1345_vm13 = vcmp.gt.f32.partialorder %v1062_v32, 0.0  ;;  %v1473_v40 = vmul.f32 0.2, %v1062_v32 }
 0x109   : > { %3043 = vst [vmem:[%s3517_s6 + $0x120] sm:$0xff] %v2871_v33   ;;  %vm1284_vm11 = vcmp.gt.f32.partialorder %v3174_v36, 0.0  ;;  %v1412_v38 = vmul.f32 0.2, %v3174_v36  ;;  %vm1348_vm12 = vcmp.gt.f32.partialorder %v3238_v37, 0.0  ;;  %v1537_v46 = vsel %vm1281_vm10, %v806_v31, %v1409_v35 }
 0x10a   : > { %v1476_v41 = vmul.f32 0.2, %v3238_v37  ;;  %v809_v42 = vpop.f32.mrf.mxu0  ;;  %v1065_v43 = vpop.f32.mrf.mxu1  ;;  %v1601_v55 = vsel %vm1345_vm13, %v1062_v32, %v1473_v40 }
 0x10b   : > { %v1540_v44 = vsel %vm1284_vm11, %v3174_v36, %v1412_v38  ;;  %vm1282_vm14 = vcmp.gt.f32.partialorder %v809_v42, 0.0  ;;  %v1410_v45 = vmul.f32 0.2, %v809_v42  ;;  %vm1346_vm15 = vcmp.gt.f32.partialorder %v1065_v43, 0.0 }
 0x10c   : > { %v2726_v47 = vpack.c.bf16 %v1540_v44, %v1539_v34  ;;  %v1604_v48 = vsel %vm1348_vm12, %v3238_v37, %v1476_v41  ;;  %v1474_v49 = vmul.f32 0.2, %v1065_v43  ;;  %v3177_v50 = vpop.f32.mrf.mxu0  ;;  %v3241_v51 = vpop.f32.mrf.mxu1 }
 0x10d   : > { %v2886_v52 = vpack.c.bf16 %v1604_v48, %v1603_v39  ;;  %v1538_v53 = vsel %vm1282_vm14, %v809_v42, %v1410_v45  ;;  %vm1287_vm0 = vcmp.gt.f32.partialorder %v3177_v50, 0.0  ;;  %v1415_v54 = vmul.f32 0.2, %v3177_v50 }
 0x10e   : > { %3014 = vst [vmem:[%s3517_s6 + $0x38] sm:$0xff] %v2726_v47   ;;  %v2721_v56 = vpack.c.bf16 %v1538_v53, %v1537_v46  ;;  %v1602_v57 = vsel %vm1346_vm15, %v1065_v43, %v1474_v49  ;;  %v1479_v58 = vmul.f32 0.2, %v3241_v51  ;;  %v822_v59 = vpop.f32.mrf.mxu0  ;;  %v1078_v60 = vpop.f32.mrf.mxu1  ;;  %vm1351_vm1 = vcmp.gt.f32.partialorder %v3241_v51, 0.0 }
 0x10f   : > { %3046 = vst [vmem:[%s3517_s6 + $0x138] sm:$0xff] %v2886_v52   ;;  %v2881_v61 = vpack.c.bf16 %v1602_v57, %v1601_v55  ;;  %v1543_v62 = vsel %vm1287_vm0, %v3177_v50, %v1415_v54  ;;  %v1413_v63 = vmul.f32 0.2, %v822_v59  ;;  %vm1285_vm2 = vcmp.gt.f32.partialorder %v822_v59, 0.0 }
 0x110   : > { %3013 = vst [vmem:[%s3517_s6 + $0x30] sm:$0xff] %v2721_v56   ;;  %v3178_v0 = vpop.f32.mrf.mxu0  ;;  %v3242_v1 = vpop.f32.mrf.mxu1  ;;  %v1607_v3 = vsel %vm1351_vm1, %v3241_v51, %v1479_v58  ;;  %vm1349_vm5 = vcmp.gt.f32.partialorder %v1078_v60, 0.0  ;;  %v1477_v4 = vmul.f32 0.2, %v1078_v60 }
 0x111   : > { %3045 = vst [vmem:[%s3517_s6 + $0x130] sm:$0xff] %v2881_v61   ;;  %vm1288_vm3 = vcmp.gt.f32.partialorder %v3178_v0, 0.0  ;;  %v1416_v2 = vmul.f32 0.2, %v3178_v0  ;;  %vm1352_vm4 = vcmp.gt.f32.partialorder %v3242_v1, 0.0  ;;  %v1541_v10 = vsel %vm1285_vm2, %v822_v59, %v1413_v63 }
 0x112   : > { %v1480_v5 = vmul.f32 0.2, %v3242_v1  ;;  %v825_v6 = vpop.f32.mrf.mxu0  ;;  %v1081_v7 = vpop.f32.mrf.mxu1  ;;  %v1605_v19 = vsel %vm1349_vm5, %v1078_v60, %v1477_v4 }
 0x113   : > { %v1544_v8 = vsel %vm1288_vm3, %v3178_v0, %v1416_v2  ;;  %vm1286_vm6 = vcmp.gt.f32.partialorder %v825_v6, 0.0  ;;  %v1414_v9 = vmul.f32 0.2, %v825_v6  ;;  %vm1350_vm7 = vcmp.gt.f32.partialorder %v1081_v7, 0.0 }
 0x114   : > { %v2736_v11 = vpack.c.bf16 %v1544_v8, %v1543_v62  ;;  %v1608_v12 = vsel %vm1352_vm4, %v3242_v1, %v1480_v5  ;;  %v1478_v13 = vmul.f32 0.2, %v1081_v7  ;;  %v3181_v14 = vpop.f32.mrf.mxu0  ;;  %v3245_v15 = vpop.f32.mrf.mxu1 }
 0x115   : > { %v2896_v16 = vpack.c.bf16 %v1608_v12, %v1607_v3  ;;  %v1542_v17 = vsel %vm1286_vm6, %v825_v6, %v1414_v9  ;;  %vm1291_vm8 = vcmp.gt.f32.partialorder %v3181_v14, 0.0  ;;  %v1419_v18 = vmul.f32 0.2, %v3181_v14 }
 0x116   : > { %3016 = vst [vmem:[%s3517_s6 + $0x48] sm:$0xff] %v2736_v11   ;;  %v2731_v20 = vpack.c.bf16 %v1542_v17, %v1541_v10  ;;  %v1606_v21 = vsel %vm1350_vm7, %v1081_v7, %v1478_v13  ;;  %v1483_v22 = vmul.f32 0.2, %v3245_v15  ;;  %v838_v23 = vpop.f32.mrf.mxu0  ;;  %v1094_v24 = vpop.f32.mrf.mxu1  ;;  %vm1355_vm9 = vcmp.gt.f32.partialorder %v3245_v15, 0.0 }
 0x117   : > { %3048 = vst [vmem:[%s3517_s6 + $0x148] sm:$0xff] %v2896_v16   ;;  %v2891_v25 = vpack.c.bf16 %v1606_v21, %v1605_v19  ;;  %v1547_v26 = vsel %vm1291_vm8, %v3181_v14, %v1419_v18  ;;  %v1417_v27 = vmul.f32 0.2, %v838_v23  ;;  %vm1289_vm10 = vcmp.gt.f32.partialorder %v838_v23, 0.0 }
 0x118   : > { %3015 = vst [vmem:[%s3517_s6 + $0x40] sm:$0xff] %v2731_v20   ;;  %v3182_v28 = vpop.f32.mrf.mxu0  ;;  %v3246_v29 = vpop.f32.mrf.mxu1  ;;  %v1611_v31 = vsel %vm1355_vm9, %v3245_v15, %v1483_v22  ;;  %vm1353_vm13 = vcmp.gt.f32.partialorder %v1094_v24, 0.0  ;;  %v1481_v32 = vmul.f32 0.2, %v1094_v24 }
 0x119   : > { %3047 = vst [vmem:[%s3517_s6 + $0x140] sm:$0xff] %v2891_v25   ;;  %vm1292_vm11 = vcmp.gt.f32.partialorder %v3182_v28, 0.0  ;;  %v1420_v30 = vmul.f32 0.2, %v3182_v28  ;;  %vm1356_vm12 = vcmp.gt.f32.partialorder %v3246_v29, 0.0  ;;  %v1545_v38 = vsel %vm1289_vm10, %v838_v23, %v1417_v27 }
 0x11a   : > { %v1484_v33 = vmul.f32 0.2, %v3246_v29  ;;  %v841_v34 = vpop.f32.mrf.mxu0  ;;  %v1097_v35 = vpop.f32.mrf.mxu1  ;;  %v1609_v47 = vsel %vm1353_vm13, %v1094_v24, %v1481_v32 }
 0x11b   : > { %v1548_v36 = vsel %vm1292_vm11, %v3182_v28, %v1420_v30  ;;  %vm1290_vm14 = vcmp.gt.f32.partialorder %v841_v34, 0.0  ;;  %v1418_v37 = vmul.f32 0.2, %v841_v34  ;;  %vm1354_vm15 = vcmp.gt.f32.partialorder %v1097_v35, 0.0 }
 0x11c   : > { %v2746_v39 = vpack.c.bf16 %v1548_v36, %v1547_v26  ;;  %v1612_v40 = vsel %vm1356_vm12, %v3246_v29, %v1484_v33  ;;  %v1482_v41 = vmul.f32 0.2, %v1097_v35  ;;  %v3185_v42 = vpop.f32.mrf.mxu0  ;;  %v3249_v43 = vpop.f32.mrf.mxu1 }
 0x11d   : > { %v2906_v44 = vpack.c.bf16 %v1612_v40, %v1611_v31  ;;  %v1546_v45 = vsel %vm1290_vm14, %v841_v34, %v1418_v37  ;;  %vm1295_vm0 = vcmp.gt.f32.partialorder %v3185_v42, 0.0  ;;  %v1423_v46 = vmul.f32 0.2, %v3185_v42 }
 0x11e   : > { %3018 = vst [vmem:[%s3517_s6 + $0x58] sm:$0xff] %v2746_v39   ;;  %v2741_v48 = vpack.c.bf16 %v1546_v45, %v1545_v38  ;;  %v1610_v49 = vsel %vm1354_vm15, %v1097_v35, %v1482_v41  ;;  %v1487_v50 = vmul.f32 0.2, %v3249_v43  ;;  %v854_v51 = vpop.f32.mrf.mxu0  ;;  %v1110_v52 = vpop.f32.mrf.mxu1  ;;  %vm1359_vm1 = vcmp.gt.f32.partialorder %v3249_v43, 0.0 }
 0x11f   : > { %3050 = vst [vmem:[%s3517_s6 + $0x158] sm:$0xff] %v2906_v44   ;;  %v2901_v53 = vpack.c.bf16 %v1610_v49, %v1609_v47  ;;  %v1551_v54 = vsel %vm1295_vm0, %v3185_v42, %v1423_v46  ;;  %v1421_v55 = vmul.f32 0.2, %v854_v51  ;;  %vm1293_vm2 = vcmp.gt.f32.partialorder %v854_v51, 0.0 }
 0x120   : > { %3017 = vst [vmem:[%s3517_s6 + $0x50] sm:$0xff] %v2741_v48   ;;  %v3186_v56 = vpop.f32.mrf.mxu0  ;;  %v3250_v57 = vpop.f32.mrf.mxu1  ;;  %v1615_v59 = vsel %vm1359_vm1, %v3249_v43, %v1487_v50  ;;  %vm1357_vm5 = vcmp.gt.f32.partialorder %v1110_v52, 0.0  ;;  %v1485_v60 = vmul.f32 0.2, %v1110_v52 }
 0x121   : > { %3049 = vst [vmem:[%s3517_s6 + $0x150] sm:$0xff] %v2901_v53   ;;  %vm1296_vm3 = vcmp.gt.f32.partialorder %v3186_v56, 0.0  ;;  %v1424_v58 = vmul.f32 0.2, %v3186_v56  ;;  %vm1360_vm4 = vcmp.gt.f32.partialorder %v3250_v57, 0.0  ;;  %v1549_v2 = vsel %vm1293_vm2, %v854_v51, %v1421_v55 }
 0x122   : > { %v1488_v61 = vmul.f32 0.2, %v3250_v57  ;;  %v857_v62 = vpop.f32.mrf.mxu0  ;;  %v1113_v63 = vpop.f32.mrf.mxu1  ;;  %v1613_v11 = vsel %vm1357_vm5, %v1110_v52, %v1485_v60 }
 0x123   : > { %v1552_v0 = vsel %vm1296_vm3, %v3186_v56, %v1424_v58  ;;  %vm1294_vm6 = vcmp.gt.f32.partialorder %v857_v62, 0.0  ;;  %v1422_v1 = vmul.f32 0.2, %v857_v62  ;;  %vm1358_vm7 = vcmp.gt.f32.partialorder %v1113_v63, 0.0 }
 0x124   : > { %v2756_v3 = vpack.c.bf16 %v1552_v0, %v1551_v54  ;;  %v1616_v4 = vsel %vm1360_vm4, %v3250_v57, %v1488_v61  ;;  %v1486_v5 = vmul.f32 0.2, %v1113_v63  ;;  %v3189_v6 = vpop.f32.mrf.mxu0  ;;  %v3253_v7 = vpop.f32.mrf.mxu1 }
 0x125   : > { %v2916_v8 = vpack.c.bf16 %v1616_v4, %v1615_v59  ;;  %v1550_v9 = vsel %vm1294_vm6, %v857_v62, %v1422_v1  ;;  %vm1299_vm8 = vcmp.gt.f32.partialorder %v3189_v6, 0.0  ;;  %v1427_v10 = vmul.f32 0.2, %v3189_v6 }
 0x126   : > { %3020 = vst [vmem:[%s3517_s6 + $0x68] sm:$0xff] %v2756_v3   ;;  %v2751_v12 = vpack.c.bf16 %v1550_v9, %v1549_v2  ;;  %v1614_v13 = vsel %vm1358_vm7, %v1113_v63, %v1486_v5  ;;  %v1491_v14 = vmul.f32 0.2, %v3253_v7  ;;  %v870_v15 = vpop.f32.mrf.mxu0  ;;  %v1126_v16 = vpop.f32.mrf.mxu1  ;;  %vm1363_vm9 = vcmp.gt.f32.partialorder %v3253_v7, 0.0 }
 0x127   : > { %3052 = vst [vmem:[%s3517_s6 + $0x168] sm:$0xff] %v2916_v8   ;;  %v2911_v17 = vpack.c.bf16 %v1614_v13, %v1613_v11  ;;  %v1555_v18 = vsel %vm1299_vm8, %v3189_v6, %v1427_v10  ;;  %v1425_v19 = vmul.f32 0.2, %v870_v15  ;;  %vm1297_vm10 = vcmp.gt.f32.partialorder %v870_v15, 0.0 }
 0x128   : > { %3019 = vst [vmem:[%s3517_s6 + $0x60] sm:$0xff] %v2751_v12   ;;  %v3190_v20 = vpop.f32.mrf.mxu0  ;;  %v3254_v21 = vpop.f32.mrf.mxu1  ;;  %v1619_v23 = vsel %vm1363_vm9, %v3253_v7, %v1491_v14  ;;  %vm1361_vm13 = vcmp.gt.f32.partialorder %v1126_v16, 0.0  ;;  %v1489_v24 = vmul.f32 0.2, %v1126_v16 }
 0x129   : > { %3051 = vst [vmem:[%s3517_s6 + $0x160] sm:$0xff] %v2911_v17   ;;  %vm1300_vm11 = vcmp.gt.f32.partialorder %v3190_v20, 0.0  ;;  %v1428_v22 = vmul.f32 0.2, %v3190_v20  ;;  %vm1364_vm12 = vcmp.gt.f32.partialorder %v3254_v21, 0.0  ;;  %v1553_v30 = vsel %vm1297_vm10, %v870_v15, %v1425_v19 }
 0x12a   : > { %v1492_v25 = vmul.f32 0.2, %v3254_v21  ;;  %v873_v26 = vpop.f32.mrf.mxu0  ;;  %v1129_v27 = vpop.f32.mrf.mxu1  ;;  %v1617_v39 = vsel %vm1361_vm13, %v1126_v16, %v1489_v24 }
 0x12b   : > { %v1556_v28 = vsel %vm1300_vm11, %v3190_v20, %v1428_v22  ;;  %vm1298_vm14 = vcmp.gt.f32.partialorder %v873_v26, 0.0  ;;  %v1426_v29 = vmul.f32 0.2, %v873_v26  ;;  %vm1362_vm15 = vcmp.gt.f32.partialorder %v1129_v27, 0.0 }
 0x12c   : > { %v2766_v31 = vpack.c.bf16 %v1556_v28, %v1555_v18  ;;  %v1620_v32 = vsel %vm1364_vm12, %v3254_v21, %v1492_v25  ;;  %v1490_v33 = vmul.f32 0.2, %v1129_v27  ;;  %v3193_v34 = vpop.f32.mrf.mxu0  ;;  %v3257_v35 = vpop.f32.mrf.mxu1 }
 0x12d   : > { %v2926_v36 = vpack.c.bf16 %v1620_v32, %v1619_v23  ;;  %v1554_v37 = vsel %vm1298_vm14, %v873_v26, %v1426_v29  ;;  %vm1303_vm0 = vcmp.gt.f32.partialorder %v3193_v34, 0.0  ;;  %v1431_v38 = vmul.f32 0.2, %v3193_v34 }
 0x12e   : > { %3022 = vst [vmem:[%s3517_s6 + $0x78] sm:$0xff] %v2766_v31   ;;  %v2761_v40 = vpack.c.bf16 %v1554_v37, %v1553_v30  ;;  %v1618_v41 = vsel %vm1362_vm15, %v1129_v27, %v1490_v33  ;;  %v1495_v42 = vmul.f32 0.2, %v3257_v35  ;;  %v886_v43 = vpop.f32.mrf.mxu0  ;;  %v1142_v44 = vpop.f32.mrf.mxu1  ;;  %vm1367_vm1 = vcmp.gt.f32.partialorder %v3257_v35, 0.0 }
 0x12f   : > { %3054 = vst [vmem:[%s3517_s6 + $0x178] sm:$0xff] %v2926_v36   ;;  %v2921_v45 = vpack.c.bf16 %v1618_v41, %v1617_v39  ;;  %v1559_v46 = vsel %vm1303_vm0, %v3193_v34, %v1431_v38  ;;  %v1429_v47 = vmul.f32 0.2, %v886_v43  ;;  %vm1301_vm2 = vcmp.gt.f32.partialorder %v886_v43, 0.0 }
 0x130   : > { %3021 = vst [vmem:[%s3517_s6 + $0x70] sm:$0xff] %v2761_v40   ;;  %v3194_v48 = vpop.f32.mrf.mxu0  ;;  %v3258_v49 = vpop.f32.mrf.mxu1  ;;  %v1623_v51 = vsel %vm1367_vm1, %v3257_v35, %v1495_v42  ;;  %vm1365_vm5 = vcmp.gt.f32.partialorder %v1142_v44, 0.0  ;;  %v1493_v52 = vmul.f32 0.2, %v1142_v44 }
 0x131   : > { %3053 = vst [vmem:[%s3517_s6 + $0x170] sm:$0xff] %v2921_v45   ;;  %vm1304_vm3 = vcmp.gt.f32.partialorder %v3194_v48, 0.0  ;;  %v1432_v50 = vmul.f32 0.2, %v3194_v48  ;;  %vm1368_vm4 = vcmp.gt.f32.partialorder %v3258_v49, 0.0  ;;  %v1557_v58 = vsel %vm1301_vm2, %v886_v43, %v1429_v47 }
 0x132   : > { %v1496_v53 = vmul.f32 0.2, %v3258_v49  ;;  %v889_v54 = vpop.f32.mrf.mxu0  ;;  %v1145_v55 = vpop.f32.mrf.mxu1  ;;  %v1621_v3 = vsel %vm1365_vm5, %v1142_v44, %v1493_v52 }
 0x133   : > { %v1560_v56 = vsel %vm1304_vm3, %v3194_v48, %v1432_v50  ;;  %vm1302_vm6 = vcmp.gt.f32.partialorder %v889_v54, 0.0  ;;  %v1430_v57 = vmul.f32 0.2, %v889_v54  ;;  %vm1366_vm7 = vcmp.gt.f32.partialorder %v1145_v55, 0.0 }
 0x134   : > { %v2776_v59 = vpack.c.bf16 %v1560_v56, %v1559_v46  ;;  %v1624_v60 = vsel %vm1368_vm4, %v3258_v49, %v1496_v53  ;;  %v1494_v61 = vmul.f32 0.2, %v1145_v55  ;;  %v3197_v62 = vpop.f32.mrf.mxu0  ;;  %v3261_v63 = vpop.f32.mrf.mxu1 }
 0x135   : > { %v2936_v0 = vpack.c.bf16 %v1624_v60, %v1623_v51  ;;  %v1558_v1 = vsel %vm1302_vm6, %v889_v54, %v1430_v57  ;;  %vm1307_vm8 = vcmp.gt.f32.partialorder %v3197_v62, 0.0  ;;  %v1435_v2 = vmul.f32 0.2, %v3197_v62 }
 0x136   : > { %3024 = vst [vmem:[%s3517_s6 + $0x88] sm:$0xff] %v2776_v59   ;;  %v2771_v4 = vpack.c.bf16 %v1558_v1, %v1557_v58  ;;  %v1622_v5 = vsel %vm1366_vm7, %v1145_v55, %v1494_v61  ;;  %v1499_v6 = vmul.f32 0.2, %v3261_v63  ;;  %v902_v7 = vpop.f32.mrf.mxu0  ;;  %v1158_v8 = vpop.f32.mrf.mxu1  ;;  %vm1371_vm9 = vcmp.gt.f32.partialorder %v3261_v63, 0.0 }
 0x137   : > { %3056 = vst [vmem:[%s3517_s6 + $0x188] sm:$0xff] %v2936_v0   ;;  %v2931_v9 = vpack.c.bf16 %v1622_v5, %v1621_v3  ;;  %v1563_v10 = vsel %vm1307_vm8, %v3197_v62, %v1435_v2  ;;  %v1433_v11 = vmul.f32 0.2, %v902_v7  ;;  %vm1305_vm10 = vcmp.gt.f32.partialorder %v902_v7, 0.0 }
 0x138   : > { %3023 = vst [vmem:[%s3517_s6 + $0x80] sm:$0xff] %v2771_v4   ;;  %v3198_v12 = vpop.f32.mrf.mxu0  ;;  %v3262_v13 = vpop.f32.mrf.mxu1  ;;  %v1627_v15 = vsel %vm1371_vm9, %v3261_v63, %v1499_v6  ;;  %vm1369_vm13 = vcmp.gt.f32.partialorder %v1158_v8, 0.0  ;;  %v1497_v16 = vmul.f32 0.2, %v1158_v8 }
 0x139   : > { %3055 = vst [vmem:[%s3517_s6 + $0x180] sm:$0xff] %v2931_v9   ;;  %vm1308_vm11 = vcmp.gt.f32.partialorder %v3198_v12, 0.0  ;;  %v1436_v14 = vmul.f32 0.2, %v3198_v12  ;;  %vm1372_vm12 = vcmp.gt.f32.partialorder %v3262_v13, 0.0  ;;  %v1561_v22 = vsel %vm1305_vm10, %v902_v7, %v1433_v11 }
 0x13a   : > { %v1500_v17 = vmul.f32 0.2, %v3262_v13  ;;  %v905_v18 = vpop.f32.mrf.mxu0  ;;  %v1161_v19 = vpop.f32.mrf.mxu1  ;;  %v1625_v31 = vsel %vm1369_vm13, %v1158_v8, %v1497_v16 }
 0x13b   : > { %v1564_v20 = vsel %vm1308_vm11, %v3198_v12, %v1436_v14  ;;  %vm1306_vm14 = vcmp.gt.f32.partialorder %v905_v18, 0.0  ;;  %v1434_v21 = vmul.f32 0.2, %v905_v18  ;;  %vm1370_vm15 = vcmp.gt.f32.partialorder %v1161_v19, 0.0 }
 0x13c   : > { %v2786_v23 = vpack.c.bf16 %v1564_v20, %v1563_v10  ;;  %v1628_v24 = vsel %vm1372_vm12, %v3262_v13, %v1500_v17  ;;  %v1498_v25 = vmul.f32 0.2, %v1161_v19  ;;  %v3201_v26 = vpop.f32.mrf.mxu0  ;;  %v3265_v27 = vpop.f32.mrf.mxu1 }
 0x13d   : > { %v2946_v28 = vpack.c.bf16 %v1628_v24, %v1627_v15  ;;  %v1562_v29 = vsel %vm1306_vm14, %v905_v18, %v1434_v21  ;;  %vm1311_vm0 = vcmp.gt.f32.partialorder %v3201_v26, 0.0  ;;  %v1439_v30 = vmul.f32 0.2, %v3201_v26 }
 0x13e   : > { %3026 = vst [vmem:[%s3517_s6 + $0x98] sm:$0xff] %v2786_v23   ;;  %v2781_v32 = vpack.c.bf16 %v1562_v29, %v1561_v22  ;;  %v1626_v33 = vsel %vm1370_vm15, %v1161_v19, %v1498_v25  ;;  %v1503_v34 = vmul.f32 0.2, %v3265_v27  ;;  %v918_v35 = vpop.f32.mrf.mxu0  ;;  %v1174_v36 = vpop.f32.mrf.mxu1  ;;  %vm1375_vm1 = vcmp.gt.f32.partialorder %v3265_v27, 0.0 }
 0x13f   : > { %3058 = vst [vmem:[%s3517_s6 + $0x198] sm:$0xff] %v2946_v28   ;;  %v2941_v37 = vpack.c.bf16 %v1626_v33, %v1625_v31  ;;  %v1567_v38 = vsel %vm1311_vm0, %v3201_v26, %v1439_v30  ;;  %v1437_v39 = vmul.f32 0.2, %v918_v35  ;;  %vm1309_vm2 = vcmp.gt.f32.partialorder %v918_v35, 0.0 }
 0x140   : > { %3025 = vst [vmem:[%s3517_s6 + $0x90] sm:$0xff] %v2781_v32   ;;  %v3202_v40 = vpop.f32.mrf.mxu0  ;;  %v3266_v41 = vpop.f32.mrf.mxu1  ;;  %v1631_v43 = vsel %vm1375_vm1, %v3265_v27, %v1503_v34  ;;  %vm1373_vm5 = vcmp.gt.f32.partialorder %v1174_v36, 0.0  ;;  %v1501_v44 = vmul.f32 0.2, %v1174_v36 }
 0x141   : > { %3057 = vst [vmem:[%s3517_s6 + $0x190] sm:$0xff] %v2941_v37   ;;  %vm1312_vm3 = vcmp.gt.f32.partialorder %v3202_v40, 0.0  ;;  %v1440_v42 = vmul.f32 0.2, %v3202_v40  ;;  %vm1376_vm4 = vcmp.gt.f32.partialorder %v3266_v41, 0.0  ;;  %v1565_v50 = vsel %vm1309_vm2, %v918_v35, %v1437_v39 }
 0x142   : > { %v1504_v45 = vmul.f32 0.2, %v3266_v41  ;;  %v921_v46 = vpop.f32.mrf.mxu0  ;;  %v1177_v47 = vpop.f32.mrf.mxu1  ;;  %v1629_v59 = vsel %vm1373_vm5, %v1174_v36, %v1501_v44 }
 0x143   : > { %v1568_v48 = vsel %vm1312_vm3, %v3202_v40, %v1440_v42  ;;  %vm1310_vm6 = vcmp.gt.f32.partialorder %v921_v46, 0.0  ;;  %v1438_v49 = vmul.f32 0.2, %v921_v46  ;;  %vm1374_vm7 = vcmp.gt.f32.partialorder %v1177_v47, 0.0 }
 0x144   : > { %v2796_v51 = vpack.c.bf16 %v1568_v48, %v1567_v38  ;;  %v1632_v52 = vsel %vm1376_vm4, %v3266_v41, %v1504_v45  ;;  %v1502_v53 = vmul.f32 0.2, %v1177_v47  ;;  %v3205_v54 = vpop.f32.mrf.mxu0  ;;  %v3269_v55 = vpop.f32.mrf.mxu1 }
 0x145   : > { %v2956_v56 = vpack.c.bf16 %v1632_v52, %v1631_v43  ;;  %v1566_v57 = vsel %vm1310_vm6, %v921_v46, %v1438_v49  ;;  %vm1315_vm8 = vcmp.gt.f32.partialorder %v3205_v54, 0.0  ;;  %v1443_v58 = vmul.f32 0.2, %v3205_v54 }
 0x146   : > { %3028 = vst [vmem:[%s3517_s6 + $0xa8] sm:$0xff] %v2796_v51   ;;  %v2791_v60 = vpack.c.bf16 %v1566_v57, %v1565_v50  ;;  %v1630_v61 = vsel %vm1374_vm7, %v1177_v47, %v1502_v53  ;;  %v1507_v62 = vmul.f32 0.2, %v3269_v55  ;;  %v934_v63 = vpop.f32.mrf.mxu0  ;;  %v1190_v0 = vpop.f32.mrf.mxu1  ;;  %vm1379_vm9 = vcmp.gt.f32.partialorder %v3269_v55, 0.0 }
 0x147   : > { %3060 = vst [vmem:[%s3517_s6 + $0x1a8] sm:$0xff] %v2956_v56   ;;  %v2951_v1 = vpack.c.bf16 %v1630_v61, %v1629_v59  ;;  %v1571_v2 = vsel %vm1315_vm8, %v3205_v54, %v1443_v58  ;;  %v1441_v3 = vmul.f32 0.2, %v934_v63  ;;  %vm1313_vm10 = vcmp.gt.f32.partialorder %v934_v63, 0.0 }
 0x148   : > { %3027 = vst [vmem:[%s3517_s6 + $0xa0] sm:$0xff] %v2791_v60   ;;  %v3206_v4 = vpop.f32.mrf.mxu0  ;;  %v3270_v5 = vpop.f32.mrf.mxu1  ;;  %v1635_v7 = vsel %vm1379_vm9, %v3269_v55, %v1507_v62  ;;  %vm1377_vm13 = vcmp.gt.f32.partialorder %v1190_v0, 0.0  ;;  %v1505_v8 = vmul.f32 0.2, %v1190_v0 }
 0x149   : > { %3059 = vst [vmem:[%s3517_s6 + $0x1a0] sm:$0xff] %v2951_v1   ;;  %vm1316_vm11 = vcmp.gt.f32.partialorder %v3206_v4, 0.0  ;;  %v1444_v6 = vmul.f32 0.2, %v3206_v4  ;;  %vm1380_vm12 = vcmp.gt.f32.partialorder %v3270_v5, 0.0  ;;  %v1569_v14 = vsel %vm1313_vm10, %v934_v63, %v1441_v3 }
 0x14a   : > { %v1508_v9 = vmul.f32 0.2, %v3270_v5  ;;  %v937_v10 = vpop.f32.mrf.mxu0  ;;  %v1193_v11 = vpop.f32.mrf.mxu1  ;;  %v1633_v23 = vsel %vm1377_vm13, %v1190_v0, %v1505_v8 }
 0x14b   : > { %v1572_v12 = vsel %vm1316_vm11, %v3206_v4, %v1444_v6  ;;  %vm1314_vm14 = vcmp.gt.f32.partialorder %v937_v10, 0.0  ;;  %v1442_v13 = vmul.f32 0.2, %v937_v10  ;;  %vm1378_vm15 = vcmp.gt.f32.partialorder %v1193_v11, 0.0 }
 0x14c   : > { %v2806_v15 = vpack.c.bf16 %v1572_v12, %v1571_v2  ;;  %v1636_v16 = vsel %vm1380_vm12, %v3270_v5, %v1508_v9  ;;  %v1506_v17 = vmul.f32 0.2, %v1193_v11  ;;  %v3209_v18 = vpop.f32.mrf.mxu0  ;;  %v3273_v19 = vpop.f32.mrf.mxu1 }
 0x14d   : > { %v2966_v20 = vpack.c.bf16 %v1636_v16, %v1635_v7  ;;  %v1570_v21 = vsel %vm1314_vm14, %v937_v10, %v1442_v13  ;;  %vm1319_vm0 = vcmp.gt.f32.partialorder %v3209_v18, 0.0  ;;  %v1447_v22 = vmul.f32 0.2, %v3209_v18 }
 0x14e   : > { %3030 = vst [vmem:[%s3517_s6 + $0xb8] sm:$0xff] %v2806_v15   ;;  %v2801_v24 = vpack.c.bf16 %v1570_v21, %v1569_v14  ;;  %v1634_v25 = vsel %vm1378_vm15, %v1193_v11, %v1506_v17  ;;  %v1511_v26 = vmul.f32 0.2, %v3273_v19  ;;  %v950_v27 = vpop.f32.mrf.mxu0  ;;  %v1206_v28 = vpop.f32.mrf.mxu1  ;;  %vm1383_vm1 = vcmp.gt.f32.partialorder %v3273_v19, 0.0 }
 0x14f   : > { %3062 = vst [vmem:[%s3517_s6 + $0x1b8] sm:$0xff] %v2966_v20   ;;  %v2961_v29 = vpack.c.bf16 %v1634_v25, %v1633_v23  ;;  %v1575_v30 = vsel %vm1319_vm0, %v3209_v18, %v1447_v22  ;;  %v1445_v31 = vmul.f32 0.2, %v950_v27  ;;  %vm1317_vm2 = vcmp.gt.f32.partialorder %v950_v27, 0.0 }
 0x150   : > { %3029 = vst [vmem:[%s3517_s6 + $0xb0] sm:$0xff] %v2801_v24   ;;  %v3210_v32 = vpop.f32.mrf.mxu0  ;;  %v3274_v33 = vpop.f32.mrf.mxu1  ;;  %v1639_v35 = vsel %vm1383_vm1, %v3273_v19, %v1511_v26  ;;  %vm1381_vm5 = vcmp.gt.f32.partialorder %v1206_v28, 0.0  ;;  %v1509_v36 = vmul.f32 0.2, %v1206_v28 }
 0x151   : > { %3061 = vst [vmem:[%s3517_s6 + $0x1b0] sm:$0xff] %v2961_v29   ;;  %vm1320_vm3 = vcmp.gt.f32.partialorder %v3210_v32, 0.0  ;;  %v1448_v34 = vmul.f32 0.2, %v3210_v32  ;;  %vm1384_vm4 = vcmp.gt.f32.partialorder %v3274_v33, 0.0  ;;  %v1573_v42 = vsel %vm1317_vm2, %v950_v27, %v1445_v31 }
 0x152   : > { %v1512_v37 = vmul.f32 0.2, %v3274_v33  ;;  %v953_v38 = vpop.f32.mrf.mxu0  ;;  %v1209_v39 = vpop.f32.mrf.mxu1  ;;  %v1637_v51 = vsel %vm1381_vm5, %v1206_v28, %v1509_v36 }
 0x153   : > { %v1576_v40 = vsel %vm1320_vm3, %v3210_v32, %v1448_v34  ;;  %vm1318_vm6 = vcmp.gt.f32.partialorder %v953_v38, 0.0  ;;  %v1446_v41 = vmul.f32 0.2, %v953_v38  ;;  %vm1382_vm7 = vcmp.gt.f32.partialorder %v1209_v39, 0.0 }
 0x154   : > { %v2816_v43 = vpack.c.bf16 %v1576_v40, %v1575_v30  ;;  %v1640_v44 = vsel %vm1384_vm4, %v3274_v33, %v1512_v37  ;;  %v1510_v45 = vmul.f32 0.2, %v1209_v39  ;;  %v3213_v46 = vpop.f32.mrf.mxu0  ;;  %v3277_v47 = vpop.f32.mrf.mxu1 }
 0x155   : > { %v2976_v48 = vpack.c.bf16 %v1640_v44, %v1639_v35  ;;  %v1574_v49 = vsel %vm1318_vm6, %v953_v38, %v1446_v41  ;;  %vm1323_vm8 = vcmp.gt.f32.partialorder %v3213_v46, 0.0  ;;  %v1451_v50 = vmul.f32 0.2, %v3213_v46 }
 0x156   : > { %3032 = vst [vmem:[%s3517_s6 + $0xc8] sm:$0xff] %v2816_v43   ;;  %v2811_v52 = vpack.c.bf16 %v1574_v49, %v1573_v42  ;;  %v1638_v53 = vsel %vm1382_vm7, %v1209_v39, %v1510_v45  ;;  %v1515_v54 = vmul.f32 0.2, %v3277_v47  ;;  %v966_v55 = vpop.f32.mrf.mxu0  ;;  %v1222_v56 = vpop.f32.mrf.mxu1  ;;  %vm1387_vm9 = vcmp.gt.f32.partialorder %v3277_v47, 0.0 }
 0x157   : > { %3064 = vst [vmem:[%s3517_s6 + $0x1c8] sm:$0xff] %v2976_v48   ;;  %v2971_v57 = vpack.c.bf16 %v1638_v53, %v1637_v51  ;;  %v1579_v58 = vsel %vm1323_vm8, %v3213_v46, %v1451_v50  ;;  %v1449_v59 = vmul.f32 0.2, %v966_v55  ;;  %vm1321_vm10 = vcmp.gt.f32.partialorder %v966_v55, 0.0 }
 0x158   : > { %3031 = vst [vmem:[%s3517_s6 + $0xc0] sm:$0xff] %v2811_v52   ;;  %v3214_v60 = vpop.f32.mrf.mxu0  ;;  %v3278_v61 = vpop.f32.mrf.mxu1  ;;  %v1643_v63 = vsel %vm1387_vm9, %v3277_v47, %v1515_v54  ;;  %vm1385_vm13 = vcmp.gt.f32.partialorder %v1222_v56, 0.0  ;;  %v1513_v0 = vmul.f32 0.2, %v1222_v56 }
 0x159   : > { %3063 = vst [vmem:[%s3517_s6 + $0x1c0] sm:$0xff] %v2971_v57   ;;  %vm1324_vm11 = vcmp.gt.f32.partialorder %v3214_v60, 0.0  ;;  %v1452_v62 = vmul.f32 0.2, %v3214_v60  ;;  %vm1388_vm12 = vcmp.gt.f32.partialorder %v3278_v61, 0.0  ;;  %v1577_v6 = vsel %vm1321_vm10, %v966_v55, %v1449_v59 }
 0x15a   : > { %v1516_v1 = vmul.f32 0.2, %v3278_v61  ;;  %v969_v2 = vpop.f32.mrf.mxu0  ;;  %v1225_v3 = vpop.f32.mrf.mxu1  ;;  %v1641_v15 = vsel %vm1385_vm13, %v1222_v56, %v1513_v0 }
 0x15b   : > { %v1580_v4 = vsel %vm1324_vm11, %v3214_v60, %v1452_v62  ;;  %vm1322_vm14 = vcmp.gt.f32.partialorder %v969_v2, 0.0  ;;  %v1450_v5 = vmul.f32 0.2, %v969_v2  ;;  %vm1386_vm15 = vcmp.gt.f32.partialorder %v1225_v3, 0.0 }
 0x15c   : > { %v2826_v7 = vpack.c.bf16 %v1580_v4, %v1579_v58  ;;  %v1644_v8 = vsel %vm1388_vm12, %v3278_v61, %v1516_v1  ;;  %v1514_v9 = vmul.f32 0.2, %v1225_v3  ;;  %v3217_v10 = vpop.f32.mrf.mxu0  ;;  %v3281_v11 = vpop.f32.mrf.mxu1 }
 0x15d   : > { %v2986_v12 = vpack.c.bf16 %v1644_v8, %v1643_v63  ;;  %v1578_v13 = vsel %vm1322_vm14, %v969_v2, %v1450_v5  ;;  %vm1327_vm0 = vcmp.gt.f32.partialorder %v3217_v10, 0.0  ;;  %v1455_v14 = vmul.f32 0.2, %v3217_v10 }
 0x15e   : > { %3034 = vst [vmem:[%s3517_s6 + $0xd8] sm:$0xff] %v2826_v7   ;;  %v2821_v16 = vpack.c.bf16 %v1578_v13, %v1577_v6  ;;  %v1642_v17 = vsel %vm1386_vm15, %v1225_v3, %v1514_v9  ;;  %v1519_v18 = vmul.f32 0.2, %v3281_v11  ;;  %v982_v19 = vpop.f32.mrf.mxu0  ;;  %v1238_v20 = vpop.f32.mrf.mxu1  ;;  %vm1391_vm1 = vcmp.gt.f32.partialorder %v3281_v11, 0.0 }
 0x15f   : > { %3066 = vst [vmem:[%s3517_s6 + $0x1d8] sm:$0xff] %v2986_v12   ;;  %v2981_v21 = vpack.c.bf16 %v1642_v17, %v1641_v15  ;;  %v1583_v22 = vsel %vm1327_vm0, %v3217_v10, %v1455_v14  ;;  %v1453_v23 = vmul.f32 0.2, %v982_v19  ;;  %vm1325_vm2 = vcmp.gt.f32.partialorder %v982_v19, 0.0 }
 0x160   : > { %3033 = vst [vmem:[%s3517_s6 + $0xd0] sm:$0xff] %v2821_v16   ;;  %v3218_v24 = vpop.f32.mrf.mxu0  ;;  %v3282_v25 = vpop.f32.mrf.mxu1  ;;  %v1647_v27 = vsel %vm1391_vm1, %v3281_v11, %v1519_v18  ;;  %vm1389_vm5 = vcmp.gt.f32.partialorder %v1238_v20, 0.0  ;;  %v1517_v28 = vmul.f32 0.2, %v1238_v20 }
 0x161   : > { %3065 = vst [vmem:[%s3517_s6 + $0x1d0] sm:$0xff] %v2981_v21   ;;  %vm1328_vm3 = vcmp.gt.f32.partialorder %v3218_v24, 0.0  ;;  %v1456_v26 = vmul.f32 0.2, %v3218_v24  ;;  %vm1392_vm4 = vcmp.gt.f32.partialorder %v3282_v25, 0.0  ;;  %v1581_v34 = vsel %vm1325_vm2, %v982_v19, %v1453_v23 }
 0x162   : > { %v1520_v29 = vmul.f32 0.2, %v3282_v25  ;;  %v985_v30 = vpop.f32.mrf.mxu0  ;;  %v1241_v31 = vpop.f32.mrf.mxu1  ;;  %v1645_v43 = vsel %vm1389_vm5, %v1238_v20, %v1517_v28 }
 0x163   : > { %v1584_v32 = vsel %vm1328_vm3, %v3218_v24, %v1456_v26  ;;  %vm1326_vm6 = vcmp.gt.f32.partialorder %v985_v30, 0.0  ;;  %v1454_v33 = vmul.f32 0.2, %v985_v30  ;;  %vm1390_vm7 = vcmp.gt.f32.partialorder %v1241_v31, 0.0 }
 0x164   : > { %v2836_v35 = vpack.c.bf16 %v1584_v32, %v1583_v22  ;;  %v1648_v36 = vsel %vm1392_vm4, %v3282_v25, %v1520_v29  ;;  %v1518_v37 = vmul.f32 0.2, %v1241_v31  ;;  %v3221_v38 = vpop.f32.mrf.mxu0  ;;  %v3285_v39 = vpop.f32.mrf.mxu1 }
 0x165   : > { %v2996_v40 = vpack.c.bf16 %v1648_v36, %v1647_v27  ;;  %v1582_v41 = vsel %vm1326_vm6, %v985_v30, %v1454_v33  ;;  %vm1331_vm8 = vcmp.gt.f32.partialorder %v3221_v38, 0.0  ;;  %v1459_v42 = vmul.f32 0.2, %v3221_v38 }
 0x166   : > { %3036 = vst [vmem:[%s3517_s6 + $0xe8] sm:$0xff] %v2836_v35   ;;  %v2831_v44 = vpack.c.bf16 %v1582_v41, %v1581_v34  ;;  %v1646_v45 = vsel %vm1390_vm7, %v1241_v31, %v1518_v37  ;;  %v998_v46 = vpop.f32.mrf.mxu0  ;;  %v1254_v47 = vpop.f32.mrf.mxu1  ;;  %vm1395_vm9 = vcmp.gt.f32.partialorder %v3285_v39, 0.0  ;;  %v1523_v50 = vmul.f32 0.2, %v3285_v39 }
 0x167   : > { %3068 = vst [vmem:[%s3517_s6 + $0x1e8] sm:$0xff] %v2996_v40   ;;  %v2991_v48 = vpack.c.bf16 %v1646_v45, %v1645_v43  ;;  %v1587_v49 = vsel %vm1331_vm8, %v3221_v38, %v1459_v42  ;;  %v1457_v53 = vmul.f32 0.2, %v998_v46  ;;  %vm1329_vm12 = vcmp.gt.f32.partialorder %v998_v46, 0.0 }
 0x168   : > { %3035 = vst [vmem:[%s3517_s6 + $0xe0] sm:$0xff] %v2831_v44   ;;  %v3222_v51 = vpop.f32.mrf.mxu0  ;;  %v3286_v52 = vpop.f32.mrf.mxu1  ;;  %vm1393_vm13 = vcmp.gt.f32.partialorder %v1254_v47, 0.0  ;;  %v1521_v55 = vmul.f32 0.2, %v1254_v47  ;;  %v1651_v61 = vsel %vm1395_vm9, %v3285_v39, %v1523_v50 }
 0x169   : > { %3067 = vst [vmem:[%s3517_s6 + $0x1e0] sm:$0xff] %v2991_v48   ;;  %vm1332_vm10 = vcmp.gt.f32.partialorder %v3222_v51, 0.0  ;;  %v1460_v54 = vmul.f32 0.2, %v3222_v51  ;;  %vm1396_vm11 = vcmp.gt.f32.partialorder %v3286_v52, 0.0  ;;  %v1585_v1 = vsel %vm1329_vm12, %v998_v46, %v1457_v53 }
 0x16a   : > { %v1524_v56 = vmul.f32 0.2, %v3286_v52  ;;  %v1001_v57 = vpop.f32.mrf.mxu0  ;;  %v1257_v58 = vpop.f32.mrf.mxu1  ;;  %v1649_v4 = vsel %vm1393_vm13, %v1254_v47, %v1521_v55 }
 0x16b   : > { %v1588_v59 = vsel %vm1332_vm10, %v3222_v51, %v1460_v54  ;;  %vm1330_vm14 = vcmp.gt.f32.partialorder %v1001_v57, 0.0  ;;  %v1458_v60 = vmul.f32 0.2, %v1001_v57  ;;  %vm1394_vm15 = vcmp.gt.f32.partialorder %v1257_v58, 0.0 }
 0x16c   : > { %v2846_v62 = vpack.c.bf16 %v1588_v59, %v1587_v49  ;;  %v1652_v63 = vsel %vm1396_vm11, %v3286_v52, %v1524_v56  ;;  %v1522_v0 = vmul.f32 0.2, %v1257_v58 }
 0x16d   : > { %v3006_v2 = vpack.c.bf16 %v1652_v63, %v1651_v61  ;;  %v1586_v3 = vsel %vm1330_vm14, %v1001_v57, %v1458_v60 }
 0x16e   : > { %3038 = vst [vmem:[%s3517_s6 + $0xf8] sm:$0xff] %v2846_v62   ;;  %v2841_v5 = vpack.c.bf16 %v1586_v3, %v1585_v1  ;;  %v1650_v6 = vsel %vm1394_vm15, %v1257_v58, %v1522_v0 }
 0x16f   : > { %3070 = vst [vmem:[%s3517_s6 + $0x1f8] sm:$0xff] %v3006_v2   ;;  %v3001_v7 = vpack.c.bf16 %v1650_v6, %v1649_v4 }
 0x170   : > { %3037 = vst [vmem:[%s3517_s6 + $0xf0] sm:$0xff] %v2841_v5  }
 0x171   : > { %3069 = vst [vmem:[%s3517_s6 + $0x1f0] sm:$0xff] %v3001_v7  }
 0x172 PF: > { %s12_s9 = sadd.s32 1, %s3389_s9  }
 0x173   : > { %p9_p4 = scmp.ge.s32.totalorder %s12_s9, 4  }
 0x175   :  { %11 = sbr.rel (!%p9_p4) target bundleno = 1 (0x1), region = 58 }

// kernel: discriminator_forward.5
= control target key start
LH: loop header
LB: loop body
LE: loop exit
PB: predicated region body
PF: predicated region fallthrough
CT: control target
= control target key end

     0   :  { %v2210_v0 = vmov 0   ;;  %s4061_s1 = inlined_call_operand.vmem [shape: bf16[256,128], index: 1, kind: input, shape index: {}]   ;;  %s4062_s0 = inlined_call_operand.vmem [shape: bf16[512,256], index: 0, kind: input, shape index: {}]   ;;  %s4063_s2 = inlined_call_operand.vmem [shape: bf16[512,128], index: 2, kind: output, shape index: {}]  }
   0x1   :  { %524 = vmatprep.subr.bf16.mxu0 %v2210_v0  ;;  %v2096_v1 = vld [vmem:[%s4061_s1 + $0x38] sm:$0xff]   ;;  %2063 = vmatprep.subr.bf16.mxu1 %v2210_v0  ;;  %v2097_v2 = vld [vmem:[%s4061_s1 + $0x30] sm:$0xff]   ;;  %v2098_v3 = vld [vmem:[%s4061_s1 + $0x28] sm:$0xff]  }
   0x2   :  { %525 = vmatpush1.bf16.msra.mxu0 %v2096_v1  ;;  %2079 = vmatpush1.bf16.msra.mxu1 %v2096_v1  ;;  %v2099_v4 = vld [vmem:[%s4061_s1 + $0x20] sm:$0xff]   ;;  %v2100_v5 = vld [vmem:[%s4061_s1 + $0x18] sm:$0xff]   ;;  %v2101_v7 = vld [vmem:[%s4061_s1 + $0x10] sm:$0xff]  }
   0x3   :  { %526 = vmatprep.subr.bf16.mxu0 %v2210_v0  ;;  %2064 = vmatprep.subr.bf16.mxu1 %v2210_v0  ;;  %v2114_v6 = vld [vmem:[%s4062_s0 + $0x4] ss:$8 sps:$4 sm:$0xff]   ;;  %v2104_v11 = vld [vmem:[%s4061_s1 + $0x78] sm:$0xff]   ;;  %v2105_v12 = vld [vmem:[%s4061_s1 + $0x70] sm:$0xff]  }
   0x4   :  { %556 = vmatprep.mubr.bf16.mxu0 %v2114_v6  ;;  %v2102_v8 = vld [vmem:[%s4061_s1 + $0x8] sm:$0xff]   ;;  %v2103_v9 = vld [vmem:[%s4061_s1] sm:$0xff]   ;;  %v2108_v15 = vld [vmem:[%s4061_s1 + $0x58] sm:$0xff]  }
   0x5   :  { %v2138_v10 = vld [vmem:[%s4062_s0 + $0x104] ss:$8 sps:$4 sm:$0xff]   ;;  %v2109_v16 = vld [vmem:[%s4061_s1 + $0x50] sm:$0xff]   ;;  %v2112_v19 = vld [vmem:[%s4062_s0] ss:$8 sps:$4 sm:$0xff]  }
   0x6   :  { %527 = vmatpush1.bf16.msra.mxu0 %v2097_v2  ;;  %2080 = vmatpush1.bf16.msra.mxu1 %v2097_v2  ;;  %v2106_v13 = vld [vmem:[%s4061_s1 + $0x68] sm:$0xff]   ;;  %v2107_v14 = vld [vmem:[%s4061_s1 + $0x60] sm:$0xff]   ;;  %v2115_v21 = vld [vmem:[%s4062_s0 + $0x14] ss:$8 sps:$4 sm:$0xff]  }
   0x7   :  { %528 = vmatprep.subr.bf16.mxu0 %v2210_v0  ;;  %2065 = vmatprep.subr.bf16.mxu1 %v2210_v0  ;;  %v2110_v17 = vld [vmem:[%s4061_s1 + $0x48] sm:$0xff]   ;;  %v2111_v18 = vld [vmem:[%s4061_s1 + $0x40] sm:$0xff]   ;;  %v2142_v22 = vld [vmem:[%s4062_s0 + $0x114] ss:$8 sps:$4 sm:$0xff]  }
   0x8   :  { %684 = vmatprep.mubr.bf16.mxu1 %v2138_v10  ;;  %v2136_v20 = vld [vmem:[%s4062_s0 + $0x100] ss:$8 sps:$4 sm:$0xff]   ;;  %v2117_v23 = vld [vmem:[%s4062_s0 + $0x10] ss:$8 sps:$4 sm:$0xff]   ;;  %v2118_v25 = vld [vmem:[%s4062_s0 + $0x24] ss:$8 sps:$4 sm:$0xff]  }
   0x9   :  { %v2144_v24 = vld [vmem:[%s4062_s0 + $0x110] ss:$8 sps:$4 sm:$0xff]   ;;  %v2148_v26 = vld [vmem:[%s4062_s0 + $0x124] ss:$8 sps:$4 sm:$0xff]   ;;  %v2120_v27 = vld [vmem:[%s4062_s0 + $0x20] ss:$8 sps:$4 sm:$0xff]  }
   0xa   :  { %529 = vmatpush1.bf16.msra.mxu0 %v2098_v3  ;;  %2081 = vmatpush1.bf16.msra.mxu1 %v2098_v3  ;;  %v2150_v28 = vld [vmem:[%s4062_s0 + $0x120] ss:$8 sps:$4 sm:$0xff]   ;;  %v2121_v29 = vld [vmem:[%s4062_s0 + $0x34] ss:$8 sps:$4 sm:$0xff]   ;;  %v2123_v31 = vld [vmem:[%s4062_s0 + $0x30] ss:$8 sps:$4 sm:$0xff]  }
   0xb   :  { %530 = vmatprep.subr.bf16.mxu0 %v2210_v0  ;;  %2066 = vmatprep.subr.bf16.mxu1 %v2210_v0  ;;  %v2154_v30 = vld [vmem:[%s4062_s0 + $0x134] ss:$8 sps:$4 sm:$0xff]   ;;  %v2156_v32 = vld [vmem:[%s4062_s0 + $0x130] ss:$8 sps:$4 sm:$0xff]   ;;  %v2124_v33 = vld [vmem:[%s4062_s0 + $0x44] ss:$8 sps:$4 sm:$0xff]  }
   0xc   :  { %v2160_v34 = vld [vmem:[%s4062_s0 + $0x144] ss:$8 sps:$4 sm:$0xff]   ;;  %v2126_v35 = vld [vmem:[%s4062_s0 + $0x40] ss:$8 sps:$4 sm:$0xff]   ;;  %v2127_v37 = vld [vmem:[%s4062_s0 + $0x54] ss:$8 sps:$4 sm:$0xff]  }
   0xd   :  { %v2162_v36 = vld [vmem:[%s4062_s0 + $0x140] ss:$8 sps:$4 sm:$0xff]   ;;  %v2166_v38 = vld [vmem:[%s4062_s0 + $0x154] ss:$8 sps:$4 sm:$0xff]   ;;  %v2129_v39 = vld [vmem:[%s4062_s0 + $0x50] ss:$8 sps:$4 sm:$0xff]  }
   0xe   :  { %531 = vmatpush1.bf16.msra.mxu0 %v2099_v4  ;;  %2082 = vmatpush1.bf16.msra.mxu1 %v2099_v4  ;;  %v2168_v40 = vld [vmem:[%s4062_s0 + $0x150] ss:$8 sps:$4 sm:$0xff]   ;;  %v2130_v41 = vld [vmem:[%s4062_s0 + $0x64] ss:$8 sps:$4 sm:$0xff]   ;;  %v2132_v43 = vld [vmem:[%s4062_s0 + $0x60] ss:$8 sps:$4 sm:$0xff]  }
   0xf   :  { %532 = vmatprep.subr.bf16.mxu0 %v2210_v0  ;;  %2067 = vmatprep.subr.bf16.mxu1 %v2210_v0  ;;  %v2172_v42 = vld [vmem:[%s4062_s0 + $0x164] ss:$8 sps:$4 sm:$0xff]   ;;  %v2174_v44 = vld [vmem:[%s4062_s0 + $0x160] ss:$8 sps:$4 sm:$0xff]   ;;  %v2133_v45 = vld [vmem:[%s4062_s0 + $0x74] ss:$8 sps:$4 sm:$0xff]  }
  0x10   :  { %v2178_v46 = vld [vmem:[%s4062_s0 + $0x174] ss:$8 sps:$4 sm:$0xff]   ;;  %v2135_v47 = vld [vmem:[%s4062_s0 + $0x70] ss:$8 sps:$4 sm:$0xff]   ;;  %v2139_v49 = vld [vmem:[%s4062_s0 + $0x84] ss:$8 sps:$4 sm:$0xff]  }
  0x11   :  { %v2180_v48 = vld [vmem:[%s4062_s0 + $0x170] ss:$8 sps:$4 sm:$0xff]   ;;  %v2184_v50 = vld [vmem:[%s4062_s0 + $0x184] ss:$8 sps:$4 sm:$0xff]   ;;  %v2141_v51 = vld [vmem:[%s4062_s0 + $0x80] ss:$8 sps:$4 sm:$0xff]  }
  0x12   :  { %533 = vmatpush1.bf16.msra.mxu0 %v2100_v5  ;;  %2083 = vmatpush1.bf16.msra.mxu1 %v2100_v5  ;;  %v2186_v52 = vld [vmem:[%s4062_s0 + $0x180] ss:$8 sps:$4 sm:$0xff]   ;;  %v2145_v53 = vld [vmem:[%s4062_s0 + $0x94] ss:$8 sps:$4 sm:$0xff]   ;;  %v2147_v55 = vld [vmem:[%s4062_s0 + $0x90] ss:$8 sps:$4 sm:$0xff]  }
  0x13   :  { %534 = vmatprep.subr.bf16.mxu0 %v2210_v0  ;;  %2068 = vmatprep.subr.bf16.mxu1 %v2210_v0  ;;  %v2187_v54 = vld [vmem:[%s4062_s0 + $0x194] ss:$8 sps:$4 sm:$0xff]   ;;  %v2189_v56 = vld [vmem:[%s4062_s0 + $0x190] ss:$8 sps:$4 sm:$0xff]   ;;  %v2151_v57 = vld [vmem:[%s4062_s0 + $0xa4] ss:$8 sps:$4 sm:$0xff]  }
  0x14   :  { %v2190_v58 = vld [vmem:[%s4062_s0 + $0x1a4] ss:$8 sps:$4 sm:$0xff]   ;;  %v2153_v59 = vld [vmem:[%s4062_s0 + $0xa0] ss:$8 sps:$4 sm:$0xff]   ;;  %v2157_v61 = vld [vmem:[%s4062_s0 + $0xb4] ss:$8 sps:$4 sm:$0xff]  }
  0x15   :  { %v2192_v60 = vld [vmem:[%s4062_s0 + $0x1a0] ss:$8 sps:$4 sm:$0xff]   ;;  %v2193_v62 = vld [vmem:[%s4062_s0 + $0x1b4] ss:$8 sps:$4 sm:$0xff]   ;;  %v2159_v63 = vld [vmem:[%s4062_s0 + $0xb0] ss:$8 sps:$4 sm:$0xff]  }
  0x16   :  { %535 = vmatpush1.bf16.msra.mxu0 %v2101_v7  ;;  %2084 = vmatpush1.bf16.msra.mxu1 %v2101_v7  ;;  %v2163_v1 = vld [vmem:[%s4062_s0 + $0xc4] ss:$8 sps:$4 sm:$0xff]   ;;  %v2165_v3 = vld [vmem:[%s4062_s0 + $0xc0] ss:$8 sps:$4 sm:$0xff]   ;;  %v2169_v5 = vld [vmem:[%s4062_s0 + $0xd4] ss:$8 sps:$4 sm:$0xff]  }
  0x17   :  { %536 = vmatprep.subr.bf16.mxu0 %v2210_v0  ;;  %2069 = vmatprep.subr.bf16.mxu1 %v2210_v0  ;;  %v2196_v2 = vld [vmem:[%s4062_s0 + $0x1c4] ss:$8 sps:$4 sm:$0xff]   ;;  %v2198_v4 = vld [vmem:[%s4062_s0 + $0x1c0] ss:$8 sps:$4 sm:$0xff]   ;;  %v2199_v6 = vld [vmem:[%s4062_s0 + $0x1d4] ss:$8 sps:$4 sm:$0xff]  }
  0x18   :  { %v2171_v7 = vld [vmem:[%s4062_s0 + $0xd0] ss:$8 sps:$4 sm:$0xff]   ;;  %v2202_v10 = vld [vmem:[%s4062_s0 + $0x1e4] ss:$8 sps:$4 sm:$0xff]  }
  0x1a   :  { %537 = vmatpush1.bf16.msra.mxu0 %v2102_v8  ;;  %2085 = vmatpush1.bf16.msra.mxu1 %v2102_v8  ;;  %v2201_v8 = vld [vmem:[%s4062_s0 + $0x1d0] ss:$8 sps:$4 sm:$0xff]  }
  0x1b   :  { %538 = vmatprep.subr.bf16.mxu0 %v2210_v0  ;;  %2070 = vmatprep.subr.bf16.mxu1 %v2210_v0 }
  0x1e   :  { %539 = vmatpush1.bf16.msra.mxu0 %v2103_v9  ;;  %2086 = vmatpush1.bf16.msra.mxu1 %v2103_v9  ;;  %v2175_v9 = vld [vmem:[%s4062_s0 + $0xe4] ss:$8 sps:$4 sm:$0xff]  }
  0x1f   :  { %540 = vmatprep.subr.bf16.mxu0 %v2210_v0  ;;  %2071 = vmatprep.subr.bf16.mxu1 %v2210_v0 }
  0x22   :  { %541 = vmatpush2.bf16.msra.mxu0 %v2104_v11  ;;  %2087 = vmatpush2.bf16.msra.mxu1 %v2104_v11  ;;  %v2177_v11 = vld [vmem:[%s4062_s0 + $0xe0] ss:$8 sps:$4 sm:$0xff]  }
  0x23   :  { %542 = vmatprep.subr.bf16.mxu0 %v2210_v0  ;;  %2072 = vmatprep.subr.bf16.mxu1 %v2210_v0 }
  0x26   :  { %543 = vmatpush2.bf16.msra.mxu0 %v2105_v12  ;;  %2088 = vmatpush2.bf16.msra.mxu1 %v2105_v12  ;;  %v2204_v12 = vld [vmem:[%s4062_s0 + $0x1e0] ss:$8 sps:$4 sm:$0xff]  }
  0x27   :  { %544 = vmatprep.subr.bf16.mxu0 %v2210_v0  ;;  %2073 = vmatprep.subr.bf16.mxu1 %v2210_v0 }
  0x2a   :  { %545 = vmatpush2.bf16.msra.mxu0 %v2106_v13  ;;  %2089 = vmatpush2.bf16.msra.mxu1 %v2106_v13  ;;  %v2181_v13 = vld [vmem:[%s4062_s0 + $0xf4] ss:$8 sps:$4 sm:$0xff]  }
  0x2b   :  { %546 = vmatprep.subr.bf16.mxu0 %v2210_v0  ;;  %2074 = vmatprep.subr.bf16.mxu1 %v2210_v0 }
  0x2e   :  { %547 = vmatpush2.bf16.msra.mxu0 %v2107_v14  ;;  %2090 = vmatpush2.bf16.msra.mxu1 %v2107_v14  ;;  %v2205_v14 = vld [vmem:[%s4062_s0 + $0x1f4] ss:$8 sps:$4 sm:$0xff]  }
  0x2f   :  { %548 = vmatprep.subr.bf16.mxu0 %v2210_v0  ;;  %2075 = vmatprep.subr.bf16.mxu1 %v2210_v0 }
  0x32   :  { %549 = vmatpush2.bf16.msra.mxu0 %v2108_v15  ;;  %2091 = vmatpush2.bf16.msra.mxu1 %v2108_v15  ;;  %v2183_v15 = vld [vmem:[%s4062_s0 + $0xf0] ss:$8 sps:$4 sm:$0xff]  }
  0x33   :  { %550 = vmatprep.subr.bf16.mxu0 %v2210_v0  ;;  %2076 = vmatprep.subr.bf16.mxu1 %v2210_v0 }
  0x36   :  { %551 = vmatpush2.bf16.msra.mxu0 %v2109_v16  ;;  %2092 = vmatpush2.bf16.msra.mxu1 %v2109_v16  ;;  %v2207_v16 = vld [vmem:[%s4062_s0 + $0x1f0] ss:$8 sps:$4 sm:$0xff]  }
  0x37   :  { %552 = vmatprep.subr.bf16.mxu0 %v2210_v0  ;;  %2077 = vmatprep.subr.bf16.mxu1 %v2210_v0 }
  0x3a   :  { %553 = vmatpush2.bf16.msra.mxu0 %v2110_v17  ;;  %2093 = vmatpush2.bf16.msra.mxu1 %v2110_v17 }
  0x3b   :  { %554 = vmatprep.subr.bf16.mxu0 %v2210_v0  ;;  %2078 = vmatprep.subr.bf16.mxu1 %v2210_v0  ;;  %v2195_v0 = vld [vmem:[%s4062_s0 + $0x1b0] ss:$8 sps:$4 sm:$0xff]  }
  0x3e   :  { %555 = vmatpush2.bf16.msra.mxu0 %v2111_v18  ;;  %2094 = vmatpush2.bf16.msra.mxu1 %v2111_v18 }
  0x41   :  { %557 = vmatmul.mubr.bf16.vlgmr.msra.gmra.mxu0 %v2112_v19  ;;  %685 = vmatmul.mubr.bf16.vlgmr.msra.gmra.mxu1 %v2136_v20 }
  0x42   :  { %564 = vmatprep.mubr.bf16.mxu0 %v2115_v21  ;;  %692 = vmatprep.mubr.bf16.mxu1 %v2142_v22 }
  0x49   :  { %565 = vmatmul.mubr.bf16.gmra.mxu0 %v2117_v23  ;;  %693 = vmatmul.mubr.bf16.gmra.mxu1 %v2144_v24 }
  0x4a   :  { %572 = vmatprep.mubr.bf16.mxu0 %v2118_v25  ;;  %700 = vmatprep.mubr.bf16.mxu1 %v2148_v26 }
  0x51   :  { %573 = vmatmul.mubr.bf16.gmra.mxu0 %v2120_v27  ;;  %701 = vmatmul.mubr.bf16.gmra.mxu1 %v2150_v28 }
  0x52   :  { %580 = vmatprep.mubr.bf16.mxu0 %v2121_v29  ;;  %708 = vmatprep.mubr.bf16.mxu1 %v2154_v30 }
  0x59   :  { %581 = vmatmul.mubr.bf16.gmra.mxu0 %v2123_v31  ;;  %709 = vmatmul.mubr.bf16.gmra.mxu1 %v2156_v32 }
  0x5a   :  { %588 = vmatprep.mubr.bf16.mxu0 %v2124_v33  ;;  %716 = vmatprep.mubr.bf16.mxu1 %v2160_v34 }
  0x61   :  { %589 = vmatmul.mubr.bf16.gmra.mxu0 %v2126_v35  ;;  %717 = vmatmul.mubr.bf16.gmra.mxu1 %v2162_v36 }
  0x62   :  { %596 = vmatprep.mubr.bf16.mxu0 %v2127_v37  ;;  %724 = vmatprep.mubr.bf16.mxu1 %v2166_v38 }
  0x69   :  { %597 = vmatmul.mubr.bf16.gmra.mxu0 %v2129_v39  ;;  %725 = vmatmul.mubr.bf16.gmra.mxu1 %v2168_v40 }
  0x6a   :  { %604 = vmatprep.mubr.bf16.mxu0 %v2130_v41  ;;  %732 = vmatprep.mubr.bf16.mxu1 %v2172_v42 }
  0x71   :  { %605 = vmatmul.mubr.bf16.gmra.mxu0 %v2132_v43  ;;  %733 = vmatmul.mubr.bf16.gmra.mxu1 %v2174_v44 }
  0x72   :  { %612 = vmatprep.mubr.bf16.mxu0 %v2133_v45  ;;  %740 = vmatprep.mubr.bf16.mxu1 %v2178_v46 }
  0x79   :  { %613 = vmatmul.mubr.bf16.gmra.mxu0 %v2135_v47  ;;  %741 = vmatmul.mubr.bf16.gmra.mxu1 %v2180_v48 }
  0x7a   :  { %620 = vmatprep.mubr.bf16.mxu0 %v2139_v49  ;;  %748 = vmatprep.mubr.bf16.mxu1 %v2184_v50 }
  0x81   :  { %621 = vmatmul.mubr.bf16.gmra.mxu0 %v2141_v51  ;;  %749 = vmatmul.mubr.bf16.gmra.mxu1 %v2186_v52 }
  0x82   :  { %628 = vmatprep.mubr.bf16.mxu0 %v2145_v53  ;;  %756 = vmatprep.mubr.bf16.mxu1 %v2187_v54 }
  0x89   :  { %629 = vmatmul.mubr.bf16.gmra.mxu0 %v2147_v55  ;;  %757 = vmatmul.mubr.bf16.gmra.mxu1 %v2189_v56 }
  0x8a   :  { %636 = vmatprep.mubr.bf16.mxu0 %v2151_v57  ;;  %764 = vmatprep.mubr.bf16.mxu1 %v2190_v58 }
  0x91   :  { %637 = vmatmul.mubr.bf16.gmra.mxu0 %v2153_v59  ;;  %765 = vmatmul.mubr.bf16.gmra.mxu1 %v2192_v60 }
  0x92   :  { %644 = vmatprep.mubr.bf16.mxu0 %v2157_v61  ;;  %772 = vmatprep.mubr.bf16.mxu1 %v2193_v62 }
  0x99   :  { %645 = vmatmul.mubr.bf16.gmra.mxu0 %v2159_v63  ;;  %773 = vmatmul.mubr.bf16.gmra.mxu1 %v2195_v0 }
  0x9a   :  { %652 = vmatprep.mubr.bf16.mxu0 %v2163_v1  ;;  %780 = vmatprep.mubr.bf16.mxu1 %v2196_v2 }
  0xa1   :  { %653 = vmatmul.mubr.bf16.gmra.mxu0 %v2165_v3  ;;  %781 = vmatmul.mubr.bf16.gmra.mxu1 %v2198_v4 }
  0xa2   :  { %660 = vmatprep.mubr.bf16.mxu0 %v2169_v5  ;;  %788 = vmatprep.mubr.bf16.mxu1 %v2199_v6 }
  0xa9   :  { %661 = vmatmul.mubr.bf16.gmra.mxu0 %v2171_v7  ;;  %789 = vmatmul.mubr.bf16.gmra.mxu1 %v2201_v8 }
  0xaa   :  { %668 = vmatprep.mubr.bf16.mxu0 %v2175_v9  ;;  %796 = vmatprep.mubr.bf16.mxu1 %v2202_v10 }
  0xb1   :  { %669 = vmatmul.mubr.bf16.gmra.mxu0 %v2177_v11  ;;  %797 = vmatmul.mubr.bf16.gmra.mxu1 %v2204_v12 }
  0xb2   :  { %676 = vmatprep.mubr.bf16.mxu0 %v2181_v13  ;;  %804 = vmatprep.mubr.bf16.mxu1 %v2205_v14 }
  0xb9   :  { %677 = vmatmul.mubr.bf16.gmra.mxu0 %v2183_v15  ;;  %805 = vmatmul.mubr.bf16.gmra.mxu1 %v2207_v16 }
 0x101   :  { %v2498_v17 = vpop.f32.mrf.mxu0  ;;  %v2500_v18 = vpop.f32.mrf.mxu1 }
 0x103   :  { %v560_v19 = vpop.f32.mrf.mxu0  ;;  %v688_v20 = vpop.f32.mrf.mxu1 }
 0x105   :  { %v2502_v21 = vpop.f32.mrf.mxu0  ;;  %v2504_v22 = vpop.f32.mrf.mxu1 }
 0x107   :  { %v563_v23 = vpop.f32.mrf.mxu0  ;;  %v691_v24 = vpop.f32.mrf.mxu1 }
 0x108   :  { %v813_v23 = vadd.f32 %v2502_v21, %v2498_v17 }
 0x109   :  { %v2506_v25 = vpop.f32.mrf.mxu0  ;;  %v2508_v26 = vpop.f32.mrf.mxu1 }
 0x10b   :  { %v568_v27 = vpop.f32.mrf.mxu0  ;;  %v696_v28 = vpop.f32.mrf.mxu1 }
 0x10c   :  { %v814_v28 = vadd.f32 %v813_v23, %v2506_v25 }
 0x10d   :  { %v2510_v29 = vpop.f32.mrf.mxu0  ;;  %v2512_v30 = vpop.f32.mrf.mxu1 }
 0x10f   :  { %v571_v31 = vpop.f32.mrf.mxu0  ;;  %v699_v32 = vpop.f32.mrf.mxu1 }
 0x111   :  { %v2514_v33 = vpop.f32.mrf.mxu0  ;;  %v2516_v34 = vpop.f32.mrf.mxu1 }
 0x113   :  { %v576_v35 = vpop.f32.mrf.mxu0  ;;  %v704_v36 = vpop.f32.mrf.mxu1 }
 0x114   :  { %v815_v35 = vadd.f32 %v814_v28, %v2510_v29 }
 0x115   :  { %v2518_v37 = vpop.f32.mrf.mxu0  ;;  %v2520_v38 = vpop.f32.mrf.mxu1 }
 0x117   :  { %v579_v39 = vpop.f32.mrf.mxu0  ;;  %v707_v40 = vpop.f32.mrf.mxu1 }
 0x118   :  { %v816_v40 = vadd.f32 %v815_v35, %v2514_v33 }
 0x119   :  { %v2522_v41 = vpop.f32.mrf.mxu0  ;;  %v2524_v42 = vpop.f32.mrf.mxu1 }
 0x11b   :  { %v584_v43 = vpop.f32.mrf.mxu0  ;;  %v712_v44 = vpop.f32.mrf.mxu1 }
 0x11d   :  { %v2526_v45 = vpop.f32.mrf.mxu0  ;;  %v2528_v46 = vpop.f32.mrf.mxu1 }
 0x11f   :  { %v587_v47 = vpop.f32.mrf.mxu0  ;;  %v715_v48 = vpop.f32.mrf.mxu1 }
 0x120   :  { %v817_v47 = vadd.f32 %v816_v40, %v2518_v37 }
 0x121   :  { %v2530_v49 = vpop.f32.mrf.mxu0  ;;  %v2532_v50 = vpop.f32.mrf.mxu1 }
 0x123   :  { %v592_v51 = vpop.f32.mrf.mxu0  ;;  %v720_v52 = vpop.f32.mrf.mxu1 }
 0x124   :  { %v818_v52 = vadd.f32 %v817_v47, %v2522_v41 }
 0x125   :  { %v2534_v53 = vpop.f32.mrf.mxu0  ;;  %v2536_v54 = vpop.f32.mrf.mxu1 }
 0x127   :  { %v595_v55 = vpop.f32.mrf.mxu0  ;;  %v723_v56 = vpop.f32.mrf.mxu1 }
 0x129   :  { %v2538_v57 = vpop.f32.mrf.mxu0  ;;  %v2540_v58 = vpop.f32.mrf.mxu1 }
 0x12b   :  { %v600_v59 = vpop.f32.mrf.mxu0  ;;  %v728_v60 = vpop.f32.mrf.mxu1 }
 0x12c   :  { %v819_v59 = vadd.f32 %v818_v52, %v2526_v45 }
 0x12d   :  { %v2542_v61 = vpop.f32.mrf.mxu0  ;;  %v2544_v62 = vpop.f32.mrf.mxu1 }
 0x12f   :  { %v603_v63 = vpop.f32.mrf.mxu0  ;;  %v731_v0 = vpop.f32.mrf.mxu1 }
 0x130   :  { %v820_v0 = vadd.f32 %v819_v59, %v2530_v49 }
 0x131   :  { %v2546_v1 = vpop.f32.mrf.mxu0  ;;  %v2548_v2 = vpop.f32.mrf.mxu1 }
 0x133   :  { %v608_v3 = vpop.f32.mrf.mxu0  ;;  %v736_v4 = vpop.f32.mrf.mxu1 }
 0x135   :  { %v2550_v5 = vpop.f32.mrf.mxu0  ;;  %v2552_v6 = vpop.f32.mrf.mxu1 }
 0x137   :  { %v611_v7 = vpop.f32.mrf.mxu0  ;;  %v739_v8 = vpop.f32.mrf.mxu1 }
 0x138   :  { %v821_v7 = vadd.f32 %v820_v0, %v2534_v53 }
 0x139   :  { %v2554_v9 = vpop.f32.mrf.mxu0  ;;  %v2556_v10 = vpop.f32.mrf.mxu1 }
 0x13b   :  { %v616_v11 = vpop.f32.mrf.mxu0  ;;  %v744_v12 = vpop.f32.mrf.mxu1 }
 0x13c   :  { %v822_v12 = vadd.f32 %v821_v7, %v2538_v57 }
 0x13d   :  { %v2558_v13 = vpop.f32.mrf.mxu0  ;;  %v2560_v14 = vpop.f32.mrf.mxu1 }
 0x13e   :  { %v823_v23 = vadd.f32 %v822_v12, %v2542_v61 }
 0x13f   :  { %v619_v15 = vpop.f32.mrf.mxu0  ;;  %v747_v16 = vpop.f32.mrf.mxu1 }
 0x140   :  { %v824_v28 = vadd.f32 %v823_v23, %v2546_v1 }
 0x141   :  { %v2562_v19 = vpop.f32.mrf.mxu0  ;;  %v2564_v20 = vpop.f32.mrf.mxu1 }
 0x143   :  { %v624_v24 = vpop.f32.mrf.mxu0  ;;  %v752_v27 = vpop.f32.mrf.mxu1 }
 0x145   :  { %v2569_v31 = vpop.f32.mrf.mxu0  ;;  %v2571_v32 = vpop.f32.mrf.mxu1 }
 0x147   :  { %v627_v36 = vpop.f32.mrf.mxu0  ;;  %v755_v39 = vpop.f32.mrf.mxu1 }
 0x148   :  { %v825_v39 = vadd.f32 %v824_v28, %v2550_v5 }
 0x149   :  { %v2575_v43 = vpop.f32.mrf.mxu0  ;;  %v2577_v44 = vpop.f32.mrf.mxu1 }
 0x14a   :  { %4128 = vst [vmem:[#allocation2_spill] sm:$0xff] %v2575_v43 }
 0x14b   :  { %v632_v48 = vpop.f32.mrf.mxu0  ;;  %v760_v51 = vpop.f32.mrf.mxu1 }
 0x14c   :  { %v826_v48 = vadd.f32 %v825_v39, %v2554_v9 }
 0x14d   :  { %v2581_v55 = vpop.f32.mrf.mxu0  ;;  %v2583_v56 = vpop.f32.mrf.mxu1 }
 0x14e   :  { %4129 = vst [vmem:[#allocation3_spill] sm:$0xff] %v2581_v55  ;;  %v827_v59 = vadd.f32 %v826_v48, %v2558_v13 }
 0x14f   :  { %v635_v60 = vpop.f32.mrf.mxu0  ;;  %v763_v63 = vpop.f32.mrf.mxu1 }
 0x150   :  { %v828_v0 = vadd.f32 %v827_v59, %v2562_v19 }
 0x151   :  { %v2587_v3 = vpop.f32.mrf.mxu0  ;;  %v2589_v4 = vpop.f32.mrf.mxu1 }
 0x152   :  { %4130 = vst [vmem:[#allocation4_spill] sm:$0xff] %v2587_v3 }
 0x153   :  { %v640_v8 = vpop.f32.mrf.mxu0  ;;  %v768_v11 = vpop.f32.mrf.mxu1 }
 0x154   :  { %v829_v11 = vadd.f32 %v828_v0, %v2569_v31 }
 0x155   :  { %v2593_v15 = vpop.f32.mrf.mxu0  ;;  %v2595_v16 = vpop.f32.mrf.mxu1 }
 0x156   :  { %4131 = vst [vmem:[#allocation5_spill] sm:$0xff] %v2593_v15 }
 0x157   :  { %v643_v24 = vpop.f32.mrf.mxu0  ;;  %v771_v27 = vpop.f32.mrf.mxu1 }
 0x158   :  { %v830_v24 = vadd.f32 %v829_v11, %v2575_v43 }
 0x159   :  { %v2599_v35 = vpop.f32.mrf.mxu0  ;;  %v2601_v36 = vpop.f32.mrf.mxu1 }
 0x15a   :  { %4132 = vst [vmem:[#allocation6_spill] sm:$0xff] %v2599_v35  ;;  %4133 = vst [vmem:[#allocation7_spill] sm:$0xff] %v2601_v36  ;;  %v831_v39 = vadd.f32 %v830_v24, %v2581_v55 }
 0x15b   :  { %v648_v40 = vpop.f32.mrf.mxu0  ;;  %v776_v47 = vpop.f32.mrf.mxu1 }
 0x15c   :  { %v832_v48 = vadd.f32 %v831_v39, %v2587_v3 }
 0x15d   :  { %v2605_v51 = vpop.f32.mrf.mxu0  ;;  %v2607_v52 = vpop.f32.mrf.mxu1 }
 0x15e   :  { %4134 = vst [vmem:[#allocation8_spill] sm:$0xff] %v2605_v51  ;;  %4135 = vst [vmem:[#allocation9_spill] sm:$0xff] %v2607_v52 }
 0x15f   :  { %v651_v60 = vpop.f32.mrf.mxu0  ;;  %v779_v63 = vpop.f32.mrf.mxu1 }
 0x160   :  { %v833_v63 = vadd.f32 %v832_v48, %v2593_v15 }
 0x161   :  { %v2611_v7 = vpop.f32.mrf.mxu0  ;;  %v2613_v8 = vpop.f32.mrf.mxu1 }
 0x162   :  { %4136 = vst [vmem:[#allocation10_spill] sm:$0xff] %v2611_v7  ;;  %4137 = vst [vmem:[#allocation11_spill] sm:$0xff] %v2613_v8  ;;  %v834_v11 = vadd.f32 %v833_v63, %v2599_v35 }
 0x163   :  { %v656_v12 = vpop.f32.mrf.mxu0  ;;  %v784_v23 = vpop.f32.mrf.mxu1 }
 0x164   :  { %v835_v24 = vadd.f32 %v834_v11, %v2605_v51 }
 0x165   :  { %v2617_v27 = vpop.f32.mrf.mxu0  ;;  %v2619_v28 = vpop.f32.mrf.mxu1 }
 0x166   :  { %4138 = vst [vmem:[#allocation12_spill] sm:$0xff] %v2617_v27  ;;  %v836_v39 = vadd.f32 %v835_v24, %v2611_v7 }
 0x167   :  { %v659_v40 = vpop.f32.mrf.mxu0  ;;  %v787_v47 = vpop.f32.mrf.mxu1 }
 0x168   :  { %v837_v48 = vadd.f32 %v836_v39, %v2617_v27 }
 0x169   :  { %v2623_v59 = vpop.f32.mrf.mxu0  ;;  %v2625_v60 = vpop.f32.mrf.mxu1 }
 0x16a   :  { %4139 = vst [vmem:[#allocation13_spill] sm:$0xff] %v2623_v59  ;;  %v838_v63 = vadd.f32 %v837_v48, %v2623_v59 }
 0x16b   :  { %v664_v0 = vpop.f32.mrf.mxu0  ;;  %v792_v12 = vpop.f32.mrf.mxu1 }
 0x16d   :  { %v2629_v23 = vpop.f32.mrf.mxu0  ;;  %v2631_v43 = vpop.f32.mrf.mxu1 }
 0x16e   :  { %4140 = vst [vmem:[#allocation14_spill] sm:$0xff] %v2629_v23  ;;  %v839_v11 = vadd.f32 %v838_v63, %v2629_v23 }
 0x16f   :  { %v667_v40 = vpop.f32.mrf.mxu0  ;;  %v795_v47 = vpop.f32.mrf.mxu1 }
 0x171   :  { %v2635_v3 = vpop.f32.mrf.mxu0  ;;  %v2637_v55 = vpop.f32.mrf.mxu1 }
 0x172   :  { %4141 = vst [vmem:[#allocation15_spill] sm:$0xff] %v2635_v3  ;;  %v840_v24 = vadd.f32 %v839_v11, %v2635_v3 }
 0x173   :  { %v672_v0 = vpop.f32.mrf.mxu0  ;;  %v800_v12 = vpop.f32.mrf.mxu1 }
 0x175   :  { %v2641_v35 = vpop.f32.mrf.mxu0  ;;  %v2643_v15 = vpop.f32.mrf.mxu1 }
 0x176   :  { %v841_v39 = vadd.f32 %v840_v24, %v2641_v35 }
 0x177   :  { %v675_v40 = vpop.f32.mrf.mxu0  ;;  %v803_v47 = vpop.f32.mrf.mxu1 }
 0x179   :  { %v2647_v7 = vpop.f32.mrf.mxu0  ;;  %v2649_v51 = vpop.f32.mrf.mxu1 }
 0x17a   :  { %4142 = vst [vmem:[#allocation16_spill] sm:$0xff] %v2647_v7  ;;  %v842_v48 = vadd.f32 %v841_v39, %v2647_v7 }
 0x17b   :  { %v680_v0 = vpop.f32.mrf.mxu0  ;;  %v808_v12 = vpop.f32.mrf.mxu1 }
 0x17d   :  { %v2653_v59 = vpop.f32.mrf.mxu0  ;;  %v2655_v27 = vpop.f32.mrf.mxu1 }
 0x17e   :  { %v843_v63 = vadd.f32 %v842_v48, %v2653_v59 }
 0x17f   :  { %v683_v40 = vpop.f32.mrf.mxu0  ;;  %v811_v47 = vpop.f32.mrf.mxu1 }
 0x180   :  { %v844_v11 = vadd.f32 %v843_v63, %v2500_v18 }
 0x182   :  { %v845_v3 = vadd.f32 %v844_v11, %v2504_v22 }
 0x184   :  { %v846_v23 = vadd.f32 %v845_v3, %v2508_v26 }
 0x186   :  { %v847_v24 = vadd.f32 %v846_v23, %v2512_v30 }
 0x188   :  { %v848_v0 = vadd.f32 %v847_v24, %v2516_v34 }
 0x18a   :  { %v849_v39 = vadd.f32 %v848_v0, %v2520_v38 }
 0x18c   :  { %v850_v12 = vadd.f32 %v849_v39, %v2524_v42 }
 0x18e   :  { %v851_v7 = vadd.f32 %v850_v12, %v2528_v46 }
 0x190   :  { %v852_v48 = vadd.f32 %v851_v7, %v2532_v50 }
 0x192   :  { %v853_v40 = vadd.f32 %v852_v48, %v2536_v54 }
 0x194   :  { %v854_v63 = vadd.f32 %v853_v40, %v2540_v58 }
 0x196   :  { %v855_v47 = vadd.f32 %v854_v63, %v2544_v62 }
 0x198   :  { %v856_v3 = vadd.f32 %v855_v47, %v2548_v2 }
 0x19a   :  { %v857_v23 = vadd.f32 %v856_v3, %v2552_v6 }
 0x19c   :  { %v858_v11 = vadd.f32 %v857_v23, %v2556_v10 }
 0x19e   :  { %v859_v24 = vadd.f32 %v858_v11, %v2560_v14 }
 0x1a0   :  { %v860_v0 = vadd.f32 %v859_v24, %v2564_v20 }
 0x1a2   :  { %v861_v39 = vadd.f32 %v860_v0, %v2571_v32 }
 0x1a4   :  { %v862_v7 = vadd.f32 %v861_v39, %v2577_v44 }
 0x1a6   :  { %v863_v12 = vadd.f32 %v862_v7, %v2583_v56 }
 0x1a8   :  { %v864_v48 = vadd.f32 %v863_v12, %v2589_v4 }
 0x1aa   :  { %v865_v40 = vadd.f32 %v864_v48, %v2595_v16 }
 0x1ac   :  { %v866_v63 = vadd.f32 %v865_v40, %v2601_v36 }
 0x1ae   :  { %v867_v47 = vadd.f32 %v866_v63, %v2607_v52 }
 0x1b0   :  { %v868_v3 = vadd.f32 %v867_v47, %v2613_v8 }
 0x1b2   :  { %v869_v23 = vadd.f32 %v868_v3, %v2619_v28 }
 0x1b4   :  { %v870_v11 = vadd.f32 %v869_v23, %v2625_v60 }
 0x1b6   :  { %v871_v24 = vadd.f32 %v870_v11, %v2631_v43 }
 0x1b8   :  { %v872_v0 = vadd.f32 %v871_v24, %v2637_v55 }
 0x1ba   :  { %v873_v39 = vadd.f32 %v872_v0, %v2643_v15 }
 0x1bc   :  { %v874_v7 = vadd.f32 %v873_v39, %v2649_v51 }
 0x1be   :  { %v875_v12 = vadd.f32 %v874_v7, %v2655_v27 }
 0x1c0   :  { %v876_v48 = vrot.slane %v875_v12, 4 }
 0x1c2   :  { %v877_v40 = vadd.f32 %v876_v48, %v875_v12 }
 0x1c4   :  { %v878_v36 = vrot.slane %v877_v40, 2 }
 0x1c6   :  { %v879_v63 = vadd.f32 %v878_v36, %v877_v40 }
 0x1c8   :  { %v880_v52 = vrot.slane %v879_v63, 1 }
 0x1ca   :  { %v881_v47 = vadd.f32 %v880_v52, %v879_v63 }
 0x1cc   :  { %v2690_v8 = vmul.f32 0.001953125, %v881_v47 }
 0x1ce   :  { %v2694_v3 = vsub.f32 %v2498_v17, %v2690_v8  ;;  %v2698_v23 = vsub.f32 %v2502_v21, %v2690_v8  ;;  %v2702_v11 = vsub.f32 %v2506_v25, %v2690_v8  ;;  %v2710_v52 = vsub.f32 %v2510_v29, %v2690_v8 }
 0x1cf   :  { %v2714_v17 = vsub.f32 %v2514_v33, %v2690_v8  ;;  %v2720_v25 = vsub.f32 %v2518_v37, %v2690_v8  ;;  %v2726_v29 = vsub.f32 %v2522_v41, %v2690_v8  ;;  %v2732_v48 = vsub.f32 %v2526_v45, %v2690_v8 }
 0x1d0   :  { %v948_v24 = vmul.f32 %v2694_v3, %v2694_v3  ;;  %v949_v36 = vmul.f32 %v2698_v23, %v2698_v23  ;;  %v950_v21 = vmul.f32 %v2702_v11, %v2702_v11  ;;  %v951_v39 = vmul.f32 %v2710_v52, %v2710_v52 }
 0x1d1   :  { %v952_v33 = vmul.f32 %v2714_v17, %v2714_v17  ;;  %v953_v37 = vmul.f32 %v2720_v25, %v2720_v25  ;;  %v2738_v63 = vsub.f32 %v2530_v49, %v2690_v8  ;;  %v954_v41 = vmul.f32 %v2726_v29, %v2726_v29 }
 0x1d2   :  { %v1012_v0 = vadd.f32 %v949_v36, %v948_v24  ;;  %v2744_v24 = vsub.f32 %v2534_v53, %v2690_v8  ;;  %v955_v45 = vmul.f32 %v2732_v48, %v2732_v48 }
 0x1d3   :  { %v956_v49 = vmul.f32 %v2738_v63, %v2738_v63 }
 0x1d4   :  { %v1013_v7 = vadd.f32 %v1012_v0, %v950_v21  ;;  %v2750_v21 = vsub.f32 %v2538_v57, %v2690_v8  ;;  %v957_v53 = vmul.f32 %v2744_v24, %v2744_v24 }
 0x1d6   :  { %v1014_v12 = vadd.f32 %v1013_v7, %v951_v39  ;;  %v2756_v39 = vsub.f32 %v2542_v61, %v2690_v8  ;;  %v958_v57 = vmul.f32 %v2750_v21, %v2750_v21 }
 0x1d8   :  { %v1015_v40 = vadd.f32 %v1014_v12, %v952_v33  ;;  %v2762_v33 = vsub.f32 %v2546_v1, %v2690_v8  ;;  %v959_v61 = vmul.f32 %v2756_v39, %v2756_v39 }
 0x1da   :  { %v1016_v47 = vadd.f32 %v1015_v40, %v953_v37  ;;  %v2768_v37 = vsub.f32 %v2550_v5, %v2690_v8  ;;  %v960_v1 = vmul.f32 %v2762_v33, %v2762_v33 }
 0x1dc   :  { %v1017_v36 = vadd.f32 %v1016_v47, %v954_v41  ;;  %v2774_v41 = vsub.f32 %v2554_v9, %v2690_v8  ;;  %v961_v5 = vmul.f32 %v2768_v37, %v2768_v37 }
 0x1de   :  { %v1018_v0 = vadd.f32 %v1017_v36, %v955_v45  ;;  %v2780_v45 = vsub.f32 %v2558_v13, %v2690_v8  ;;  %v962_v9 = vmul.f32 %v2774_v41, %v2774_v41 }
 0x1e0   :  { %v1019_v7 = vadd.f32 %v1018_v0, %v956_v49  ;;  %v2786_v49 = vsub.f32 %v2562_v19, %v2690_v8  ;;  %v963_v13 = vmul.f32 %v2780_v45, %v2780_v45 }
 0x1e2   :  { %v1020_v12 = vadd.f32 %v1019_v7, %v957_v53  ;;  %4143 = vst [vmem:[#allocation17_spill] sm:$0xff] %v2786_v49  ;;  %v2792_v53 = vsub.f32 %v2569_v31, %v2690_v8  ;;  %v964_v19 = vmul.f32 %v2786_v49, %v2786_v49 }
 0x1e4   :  { %v1021_v40 = vadd.f32 %v1020_v12, %v958_v57  ;;  %4144 = vst [vmem:[#allocation18_spill] sm:$0xff] %v2792_v53  ;;  %v4145_v57 = vld [vmem:[#allocation2_spill] sm:$0xff]  ;;  %v965_v31 = vmul.f32 %v2792_v53, %v2792_v53 }
 0x1e5   :  { %v2798_v12 = vsub.f32 %v4145_v57, %v2690_v8  ;;  %v4151_v57 = vld [vmem:[#allocation5_spill] sm:$0xff] }
 0x1e6   :  { %v1022_v47 = vadd.f32 %v1021_v40, %v959_v61  ;;  %v4147_v40 = vld [vmem:[#allocation3_spill] sm:$0xff]  ;;  %v2816_v49 = vsub.f32 %v4151_v57, %v2690_v8  ;;  %v4157_v57 = vld [vmem:[#allocation10_spill] sm:$0xff] }
 0x1e7   :  { %4146 = vst [vmem:[#allocation2_spill] sm:$0xff] %v2798_v12 }
 0x1e8   :  { %v1023_v36 = vadd.f32 %v1022_v47, %v960_v1  ;;  %v2804_v1 = vsub.f32 %v4147_v40, %v2690_v8  ;;  %4152 = vst [vmem:[#allocation5_spill] sm:$0xff] %v2816_v49  ;;  %v4153_v40 = vld [vmem:[#allocation6_spill] sm:$0xff] }
 0x1e9   :  { %v2822_v53 = vsub.f32 %v4153_v40, %v2690_v8  ;;  %v4158_v40 = vld [vmem:[#allocation12_spill] sm:$0xff] }
 0x1ea   :  { %v1024_v0 = vadd.f32 %v1023_v36, %v961_v5  ;;  %4148 = vst [vmem:[#allocation3_spill] sm:$0xff] %v2804_v1  ;;  %v4149_v5 = vld [vmem:[#allocation4_spill] sm:$0xff] }
 0x1eb   :  { %v2810_v36 = vsub.f32 %v4149_v5, %v2690_v8  ;;  %4154 = vst [vmem:[#allocation6_spill] sm:$0xff] %v2822_v53  ;;  %v4155_v5 = vld [vmem:[#allocation8_spill] sm:$0xff] }
 0x1ec   :  { %v1025_v7 = vadd.f32 %v1024_v0, %v962_v9  ;;  %v966_v9 = vmul.f32 %v2798_v12, %v2798_v12  ;;  %v2828_v12 = vsub.f32 %v4155_v5, %v2690_v8  ;;  %v4160_v5 = vld [vmem:[#allocation13_spill] sm:$0xff] }
 0x1ed   :  { %4150 = vst [vmem:[#allocation4_spill] sm:$0xff] %v2810_v36 }
 0x1ee   :  { %v1026_v61 = vadd.f32 %v1025_v7, %v963_v13  ;;  %v967_v13 = vmul.f32 %v2804_v1, %v2804_v1  ;;  %4156 = vst [vmem:[#allocation8_spill] sm:$0xff] %v2828_v12  ;;  %v2834_v1 = vsub.f32 %v4157_v57, %v2690_v8  ;;  %v4161_v57 = vld [vmem:[#allocation14_spill] sm:$0xff] }
 0x1f0   :  { %v1027_v47 = vadd.f32 %v1026_v61, %v964_v19  ;;  %v968_v19 = vmul.f32 %v2810_v36, %v2810_v36  ;;  %v2840_v36 = vsub.f32 %v4158_v40, %v2690_v8  ;;  %v4162_v40 = vld [vmem:[#allocation15_spill] sm:$0xff] }
 0x1f2   :  { %v1028_v0 = vadd.f32 %v1027_v47, %v965_v31  ;;  %v969_v31 = vmul.f32 %v2816_v49, %v2816_v49  ;;  %4159 = vst [vmem:[#allocation10_spill] sm:$0xff] %v2840_v36  ;;  %v2846_v49 = vsub.f32 %v4160_v5, %v2690_v8  ;;  %v2864_v5 = vsub.f32 %v2641_v35, %v2690_v8 }
 0x1f4   :  { %v1029_v7 = vadd.f32 %v1028_v0, %v966_v9  ;;  %v970_v9 = vmul.f32 %v2822_v53, %v2822_v53  ;;  %v2852_v53 = vsub.f32 %v4161_v57, %v2690_v8  ;;  %v4163_v57 = vld [vmem:[#allocation16_spill] sm:$0xff]  ;;  %v977_v35 = vmul.f32 %v2864_v5, %v2864_v5 }
 0x1f6   :  { %v1030_v61 = vadd.f32 %v1029_v7, %v967_v13  ;;  %v971_v13 = vmul.f32 %v2828_v12, %v2828_v12  ;;  %v2858_v12 = vsub.f32 %v4162_v40, %v2690_v8  ;;  %v2876_v40 = vsub.f32 %v2653_v59, %v2690_v8 }
 0x1f8   :  { %v1031_v47 = vadd.f32 %v1030_v61, %v968_v19  ;;  %v972_v19 = vmul.f32 %v2834_v1, %v2834_v1  ;;  %v979_v59 = vmul.f32 %v2876_v40, %v2876_v40 }
 0x1fa   :  { %v1032_v0 = vadd.f32 %v1031_v47, %v969_v31  ;;  %v973_v31 = vmul.f32 %v2840_v36, %v2840_v36  ;;  %v2870_v36 = vsub.f32 %v4163_v57, %v2690_v8  ;;  %v2888_v57 = vsub.f32 %v2504_v22, %v2690_v8 }
 0x1fc   :  { %v1033_v7 = vadd.f32 %v1032_v0, %v970_v9  ;;  %v974_v9 = vmul.f32 %v2846_v49, %v2846_v49  ;;  %v981_v22 = vmul.f32 %v2888_v57, %v2888_v57 }
 0x1fe   :  { %v1034_v61 = vadd.f32 %v1033_v7, %v971_v13  ;;  %v975_v13 = vmul.f32 %v2852_v53, %v2852_v53 }
 0x200   :  { %v1035_v47 = vadd.f32 %v1034_v61, %v972_v19  ;;  %v976_v19 = vmul.f32 %v2858_v12, %v2858_v12 }
 0x202   :  { %v1036_v0 = vadd.f32 %v1035_v47, %v973_v31  ;;  %v2882_v47 = vsub.f32 %v2500_v18, %v2690_v8 }
 0x204   :  { %v1037_v7 = vadd.f32 %v1036_v0, %v974_v9  ;;  %v978_v9 = vmul.f32 %v2870_v36, %v2870_v36  ;;  %v980_v18 = vmul.f32 %v2882_v47, %v2882_v47 }
 0x206   :  { %v1038_v61 = vadd.f32 %v1037_v7, %v975_v13  ;;  %v2894_v7 = vsub.f32 %v2508_v26, %v2690_v8 }
 0x208   :  { %v1039_v31 = vadd.f32 %v1038_v61, %v976_v19  ;;  %v2900_v61 = vsub.f32 %v2512_v30, %v2690_v8  ;;  %v982_v26 = vmul.f32 %v2894_v7, %v2894_v7 }
 0x20a   :  { %v1040_v0 = vadd.f32 %v1039_v31, %v977_v35  ;;  %v2906_v31 = vsub.f32 %v2516_v34, %v2690_v8  ;;  %v983_v30 = vmul.f32 %v2900_v61, %v2900_v61 }
 0x20c   :  { %v1041_v13 = vadd.f32 %v1040_v0, %v978_v9  ;;  %v2912_v0 = vsub.f32 %v2520_v38, %v2690_v8  ;;  %v984_v34 = vmul.f32 %v2906_v31, %v2906_v31 }
 0x20e   :  { %v1042_v19 = vadd.f32 %v1041_v13, %v979_v59  ;;  %v2918_v13 = vsub.f32 %v2524_v42, %v2690_v8  ;;  %v985_v38 = vmul.f32 %v2912_v0, %v2912_v0 }
 0x210   :  { %v1043_v35 = vadd.f32 %v1042_v19, %v980_v18  ;;  %v2924_v19 = vsub.f32 %v2528_v46, %v2690_v8  ;;  %v986_v42 = vmul.f32 %v2918_v13, %v2918_v13 }
 0x212   :  { %v1044_v9 = vadd.f32 %v1043_v35, %v981_v22  ;;  %v2930_v35 = vsub.f32 %v2532_v50, %v2690_v8  ;;  %v987_v46 = vmul.f32 %v2924_v19, %v2924_v19 }
 0x214   :  { %v1045_v59 = vadd.f32 %v1044_v9, %v982_v26  ;;  %v2936_v9 = vsub.f32 %v2536_v54, %v2690_v8  ;;  %v988_v50 = vmul.f32 %v2930_v35, %v2930_v35 }
 0x216   :  { %v1046_v18 = vadd.f32 %v1045_v59, %v983_v30  ;;  %v2942_v59 = vsub.f32 %v2540_v58, %v2690_v8  ;;  %v989_v54 = vmul.f32 %v2936_v9, %v2936_v9 }
 0x218   :  { %v1047_v22 = vadd.f32 %v1046_v18, %v984_v34  ;;  %v2948_v18 = vsub.f32 %v2544_v62, %v2690_v8  ;;  %v990_v58 = vmul.f32 %v2942_v59, %v2942_v59 }
 0x21a   :  { %v1048_v26 = vadd.f32 %v1047_v22, %v985_v38  ;;  %v2954_v22 = vsub.f32 %v2548_v2, %v2690_v8  ;;  %v991_v62 = vmul.f32 %v2948_v18, %v2948_v18 }
 0x21c   :  { %v1049_v30 = vadd.f32 %v1048_v26, %v986_v42  ;;  %v2960_v26 = vsub.f32 %v2552_v6, %v2690_v8  ;;  %v992_v2 = vmul.f32 %v2954_v22, %v2954_v22 }
 0x21e   :  { %v1050_v34 = vadd.f32 %v1049_v30, %v987_v46  ;;  %v2966_v30 = vsub.f32 %v2556_v10, %v2690_v8  ;;  %v993_v6 = vmul.f32 %v2960_v26, %v2960_v26 }
 0x220   :  { %v1051_v38 = vadd.f32 %v1050_v34, %v988_v50  ;;  %v2972_v34 = vsub.f32 %v2560_v14, %v2690_v8  ;;  %v994_v10 = vmul.f32 %v2966_v30, %v2966_v30 }
 0x222   :  { %v1052_v42 = vadd.f32 %v1051_v38, %v989_v54  ;;  %4164 = vst [vmem:[#allocation12_spill] sm:$0xff] %v2972_v34  ;;  %v2978_v38 = vsub.f32 %v2564_v20, %v2690_v8  ;;  %v995_v14 = vmul.f32 %v2972_v34, %v2972_v34 }
 0x224   :  { %v1053_v46 = vadd.f32 %v1052_v42, %v990_v58  ;;  %4165 = vst [vmem:[#allocation13_spill] sm:$0xff] %v2978_v38  ;;  %v2984_v42 = vsub.f32 %v2571_v32, %v2690_v8  ;;  %v996_v20 = vmul.f32 %v2978_v38, %v2978_v38 }
 0x226   :  { %v1054_v50 = vadd.f32 %v1053_v46, %v991_v62  ;;  %4166 = vst [vmem:[#allocation14_spill] sm:$0xff] %v2984_v42  ;;  %v2990_v46 = vsub.f32 %v2577_v44, %v2690_v8  ;;  %v3004_v44 = vsub.f32 %v2595_v16, %v2690_v8 }
 0x228   :  { %v1055_v54 = vadd.f32 %v1054_v50, %v992_v2  ;;  %v935_v50 = vsub.f32 %v2583_v56, %v2690_v8 }
 0x22a   :  { %v1056_v58 = vadd.f32 %v1055_v54, %v993_v6  ;;  %v997_v6 = vmul.f32 %v2984_v42, %v2984_v42  ;;  %v936_v54 = vsub.f32 %v2589_v4, %v2690_v8  ;;  %v999_v38 = vmul.f32 %v935_v50, %v935_v50 }
 0x22b   :  { %v1001_v4 = vmul.f32 %v3004_v44, %v3004_v44 }
 0x22c   :  { %v1057_v62 = vadd.f32 %v1056_v58, %v994_v10  ;;  %v998_v10 = vmul.f32 %v2990_v46, %v2990_v46  ;;  %v1000_v34 = vmul.f32 %v936_v54, %v936_v54 }
 0x22e   :  { %v1058_v2 = vadd.f32 %v1057_v62, %v995_v14  ;;  %v4167_v62 = vld [vmem:[#allocation7_spill] sm:$0xff] }
 0x22f   :  { %v3008_v56 = vsub.f32 %v4167_v62, %v2690_v8  ;;  %v3024_v62 = vsub.f32 %v2619_v28, %v2690_v8 }
 0x230   :  { %v1059_v32 = vadd.f32 %v1058_v2, %v996_v20  ;;  %v4168_v20 = vld [vmem:[#allocation9_spill] sm:$0xff] }
 0x231   :  { %v3012_v2 = vsub.f32 %v4168_v20, %v2690_v8  ;;  %4171 = vst [vmem:[#allocation16_spill] sm:$0xff] %v3024_v62  ;;  %v3030_v20 = vsub.f32 %v2625_v60, %v2690_v8  ;;  %v1005_v28 = vmul.f32 %v3024_v62, %v3024_v62 }
 0x232   :  { %v1060_v58 = vadd.f32 %v1059_v32, %v997_v6  ;;  %v4169_v32 = vld [vmem:[#allocation11_spill] sm:$0xff] }
 0x233   :  { %v3018_v16 = vsub.f32 %v4169_v32, %v2690_v8  ;;  %4172 = vst [vmem:[#allocation7_spill] sm:$0xff] %v3030_v20  ;;  %v3036_v32 = vsub.f32 %v2631_v43, %v2690_v8  ;;  %v1006_v60 = vmul.f32 %v3030_v20, %v3030_v20 }
 0x234   :  { %v1061_v14 = vadd.f32 %v1060_v58, %v998_v10  ;;  %v1002_v10 = vmul.f32 %v3008_v56, %v3008_v56 }
 0x235   :  { %4170 = vst [vmem:[#allocation15_spill] sm:$0xff] %v3018_v16  ;;  %4173 = vst [vmem:[#allocation9_spill] sm:$0xff] %v3036_v32  ;;  %v1007_v43 = vmul.f32 %v3036_v32, %v3036_v32 }
 0x236   :  { %v1062_v42 = vadd.f32 %v1061_v14, %v999_v38  ;;  %v1003_v38 = vmul.f32 %v3012_v2, %v3012_v2 }
 0x238   :  { %v1063_v6 = vadd.f32 %v1062_v42, %v1000_v34  ;;  %v1004_v34 = vmul.f32 %v3018_v16, %v3018_v16 }
 0x23a   :  { %v1064_v58 = vadd.f32 %v1063_v6, %v1001_v4  ;;  %v3042_v6 = vsub.f32 %v2637_v55, %v2690_v8 }
 0x23c   :  { %v1065_v14 = vadd.f32 %v1064_v58, %v1002_v10  ;;  %4174 = vst [vmem:[#allocation11_spill] sm:$0xff] %v3042_v6  ;;  %v3048_v58 = vsub.f32 %v2643_v15, %v2690_v8  ;;  %v1008_v55 = vmul.f32 %v3042_v6, %v3042_v6 }
 0x23e   :  { %v1066_v42 = vadd.f32 %v1065_v14, %v1003_v38  ;;  %4175 = vst [vmem:[#allocation19_spill] sm:$0xff] %v3048_v58  ;;  %v3054_v14 = vsub.f32 %v2649_v51, %v2690_v8  ;;  %v1009_v15 = vmul.f32 %v3048_v58, %v3048_v58 }
 0x240   :  { %v1067_v4 = vadd.f32 %v1066_v42, %v1004_v34  ;;  %v3060_v42 = vsub.f32 %v2655_v27, %v2690_v8 }
 0x242   :  { %v1068_v10 = vadd.f32 %v1067_v4, %v1005_v28  ;;  %v1010_v4 = vmul.f32 %v3054_v14, %v3054_v14  ;;  %v1011_v51 = vmul.f32 %v3060_v42, %v3060_v42 }
 0x244   :  { %v1069_v38 = vadd.f32 %v1068_v10, %v1006_v60 }
 0x246   :  { %v1070_v34 = vadd.f32 %v1069_v38, %v1007_v43 }
 0x248   :  { %v1071_v28 = vadd.f32 %v1070_v34, %v1008_v55 }
 0x24a   :  { %v1072_v60 = vadd.f32 %v1071_v28, %v1009_v15  ;;  %v4181_v28 = vld [vmem:[#allocation3_spill] sm:$0xff] }
 0x24c   :  { %v1073_v10 = vadd.f32 %v1072_v60, %v1010_v4  ;;  %v4182_v4 = vld [vmem:[#allocation4_spill] sm:$0xff]  ;;  %v4183_v60 = vld [vmem:[#allocation5_spill] sm:$0xff] }
 0x24e   :  { %v1074_v32 = vadd.f32 %v1073_v10, %v1011_v51  ;;  %v4184_v10 = vld [vmem:[#allocation6_spill] sm:$0xff] }
 0x250   :  { %v1075_v20 = vrot.slane %v1074_v32, 4 }
 0x252   :  { %v1076_v6 = vadd.f32 %v1075_v20, %v1074_v32  ;;  %v4179_v32 = vld [vmem:[#allocation18_spill] sm:$0xff] }
 0x254   :  { %v1077_v43 = vrot.slane %v1076_v6, 2 }
 0x256   :  { %v1078_v38 = vadd.f32 %v1077_v43, %v1076_v6  ;;  %v4180_v6 = vld [vmem:[#allocation2_spill] sm:$0xff] }
 0x258   :  { %v1079_v62 = vrot.slane %v1078_v38, 1 }
 0x25a   :  { %v1080_v8 = vadd.f32 %v1079_v62, %v1078_v38  ;;  %v4185_v38 = vld [vmem:[#allocation8_spill] sm:$0xff] }
 0x25c   :  { %v1081_v27 = vmul.f32 0.001953125, %v1080_v8 }
 0x25e   :  { %v1082_v16 = vadd.f32 1e-05, %v1081_v27 }
 0x260   :  { %2208 = vrsqrt.f32 %v1082_v16 }
 0x26d   :  { %v3068_v58 = vpop.eup %2208 }
 0x26e   :  { %v3071_v55 = vmul.f32 %v3068_v58, %v935_v50  ;;  %v3074_v34 = vmul.f32 %v3068_v58, %v936_v54  ;;  %v3078_v15 = vmul.f32 %v3068_v58, %v2694_v3  ;;  %v3082_v20 = vmul.f32 %v3068_v58, %v2698_v23  ;;  %v4178_v54 = vld [vmem:[#allocation17_spill] sm:$0xff] }
 0x26f   :  { %v3086_v62 = vmul.f32 %v3068_v58, %v2702_v11  ;;  %v3090_v16 = vmul.f32 %v3068_v58, %v2710_v52  ;;  %v3094_v50 = vmul.f32 %v3068_v58, %v2714_v17  ;;  %v3098_v3 = vmul.f32 %v3068_v58, %v2720_v25 }
 0x270   :  { %4176 = vst [vmem:[#allocation20_spill] sm:$0xff] %v3071_v55  ;;  %4177 = vst [vmem:[#allocation21_spill] sm:$0xff] %v3074_v34  ;;  %v3102_v23 = vmul.f32 %v3068_v58, %v2726_v29  ;;  %v3106_v11 = vmul.f32 %v3068_v58, %v2732_v48  ;;  %v3110_v52 = vmul.f32 %v3068_v58, %v2738_v63  ;;  %v4197_v34 = vld [vmem:[#allocation15_spill] sm:$0xff]  ;;  %v4199_v55 = vld [vmem:[#allocation16_spill] sm:$0xff]  ;;  %vm1148_vm0 = vcmp.gt.f32.partialorder %v3078_v15, 0.0 }
 0x271   :  { %v3114_v17 = vmul.f32 %v3068_v58, %v2744_v24  ;;  %v3118_v25 = vmul.f32 %v3068_v58, %v2750_v21  ;;  %v3122_v29 = vmul.f32 %v3068_v58, %v2756_v39  ;;  %v3126_v48 = vmul.f32 %v3068_v58, %v2762_v33 }
 0x272   :  { %v3130_v63 = vmul.f32 %v3068_v58, %v2768_v37  ;;  %v3134_v24 = vmul.f32 %v3068_v58, %v2774_v41  ;;  %v3138_v21 = vmul.f32 %v3068_v58, %v2780_v45  ;;  %v3142_v39 = vmul.f32 %v3068_v58, %v4178_v54  ;;  %v4186_v54 = vld [vmem:[#allocation10_spill] sm:$0xff] }
 0x273   :  { %v3146_v33 = vmul.f32 %v3068_v58, %v4179_v32  ;;  %v3150_v37 = vmul.f32 %v3068_v58, %v4180_v6  ;;  %v3154_v41 = vmul.f32 %v3068_v58, %v4181_v28  ;;  %v3158_v45 = vmul.f32 %v3068_v58, %v4182_v4 }
 0x274   :  { %v3162_v51 = vmul.f32 %v3068_v58, %v4183_v60  ;;  %v3166_v43 = vmul.f32 %v3068_v58, %v4184_v10  ;;  %v3170_v8 = vmul.f32 %v3068_v58, %v4185_v38  ;;  %v3174_v27 = vmul.f32 %v3068_v58, %v2834_v1  ;;  %v4188_v10 = vld [vmem:[#allocation12_spill] sm:$0xff]  ;;  %v4189_v38 = vld [vmem:[#allocation13_spill] sm:$0xff] }
 0x275   :  { %v3178_v32 = vmul.f32 %v3068_v58, %v4186_v54  ;;  %v3182_v6 = vmul.f32 %v3068_v58, %v2846_v49  ;;  %v3186_v28 = vmul.f32 %v3068_v58, %v2852_v53  ;;  %v3190_v4 = vmul.f32 %v3068_v58, %v2858_v12  ;;  %v4191_v54 = vld [vmem:[#allocation14_spill] sm:$0xff] }
 0x276   :  { %v3194_v1 = vmul.f32 %v3068_v58, %v2864_v5  ;;  %v3198_v60 = vmul.f32 %v3068_v58, %v2870_v36  ;;  %v3202_v49 = vmul.f32 %v3068_v58, %v2876_v40  ;;  %v3206_v53 = vmul.f32 %v3068_v58, %v2882_v47 }
 0x277   :  { %v3210_v12 = vmul.f32 %v3068_v58, %v2888_v57  ;;  %v3214_v5 = vmul.f32 %v3068_v58, %v2894_v7  ;;  %v3218_v36 = vmul.f32 %v3068_v58, %v2900_v61  ;;  %v3222_v40 = vmul.f32 %v3068_v58, %v2906_v31 }
 0x278   :  { %v3226_v47 = vmul.f32 %v3068_v58, %v2912_v0  ;;  %v3230_v57 = vmul.f32 %v3068_v58, %v2918_v13  ;;  %v3234_v7 = vmul.f32 %v3068_v58, %v2924_v19  ;;  %v3238_v61 = vmul.f32 %v3068_v58, %v2930_v35 }
 0x279   :  { %v3242_v31 = vmul.f32 %v3068_v58, %v2936_v9  ;;  %v3246_v0 = vmul.f32 %v3068_v58, %v2942_v59  ;;  %v3250_v13 = vmul.f32 %v3068_v58, %v2948_v18  ;;  %v3254_v19 = vmul.f32 %v3068_v58, %v2954_v22 }
 0x27a   :  { %v3258_v35 = vmul.f32 %v3068_v58, %v2960_v26  ;;  %v3262_v9 = vmul.f32 %v3068_v58, %v2966_v30  ;;  %v3266_v59 = vmul.f32 %v3068_v58, %v4188_v10  ;;  %v3270_v18 = vmul.f32 %v3068_v58, %v4189_v38 }
 0x27b   :  { %v3274_v22 = vmul.f32 %v3068_v58, %v4191_v54  ;;  %v3278_v26 = vmul.f32 %v3068_v58, %v2990_v46  ;;  %v3282_v30 = vmul.f32 %v3068_v58, %v3004_v44  ;;  %v3286_v10 = vmul.f32 %v3068_v58, %v3008_v56 }
 0x27c   :  { %4187 = vst [vmem:[#allocation17_spill] sm:$0xff] %v3258_v35  ;;  %4190 = vst [vmem:[#allocation18_spill] sm:$0xff] %v3270_v18  ;;  %v3290_v38 = vmul.f32 %v3068_v58, %v3012_v2  ;;  %v3294_v54 = vmul.f32 %v3068_v58, %v4197_v34  ;;  %v3298_v46 = vmul.f32 %v3068_v58, %v4199_v55  ;;  %vm1149_vm1 = vcmp.gt.f32.partialorder %v3082_v20, 0.0 }
 0x27d   :  { %4192 = vst [vmem:[#allocation2_spill] sm:$0xff] %v3274_v22  ;;  %4193 = vst [vmem:[#allocation3_spill] sm:$0xff] %v3278_v26  ;;  %v4201_v26 = vld [vmem:[#allocation7_spill] sm:$0xff]  ;;  %vm1150_vm2 = vcmp.gt.f32.partialorder %v3086_v62, 0.0  ;;  %vm1151_vm3 = vcmp.gt.f32.partialorder %v3090_v16, 0.0  ;;  %vm1152_vm4 = vcmp.gt.f32.partialorder %v3094_v50, 0.0  ;;  %v3327_v55 = vmul.f32 %v3068_v58, %v3054_v14 }
 0x27e   :  { %4194 = vst [vmem:[#allocation4_spill] sm:$0xff] %v3282_v30  ;;  %4195 = vst [vmem:[#allocation5_spill] sm:$0xff] %v3286_v10  ;;  %v3302_v44 = vmul.f32 %v3068_v58, %v4201_v26  ;;  %v4203_v30 = vld [vmem:[#allocation9_spill] sm:$0xff]  ;;  %v4205_v10 = vld [vmem:[#allocation11_spill] sm:$0xff]  ;;  %vm1153_vm5 = vcmp.gt.f32.partialorder %v3098_v3, 0.0  ;;  %vm1154_vm6 = vcmp.gt.f32.partialorder %v3102_v23, 0.0 }
 0x27f   :  { %4196 = vst [vmem:[#allocation6_spill] sm:$0xff] %v3290_v38  ;;  %4198 = vst [vmem:[#allocation8_spill] sm:$0xff] %v3294_v54  ;;  %v3306_v56 = vmul.f32 %v3068_v58, %v4203_v30  ;;  %v3310_v2 = vmul.f32 %v3068_v58, %v4205_v10  ;;  %v4207_v38 = vld [vmem:[#allocation19_spill] sm:$0xff]  ;;  %vm1155_vm7 = vcmp.gt.f32.partialorder %v3106_v11, 0.0  ;;  %vm1156_vm8 = vcmp.gt.f32.partialorder %v3110_v52, 0.0 }
 0x280   :  { %4200 = vst [vmem:[#allocation10_spill] sm:$0xff] %v3298_v46  ;;  %4202 = vst [vmem:[#allocation12_spill] sm:$0xff] %v3302_v44  ;;  %v3314_v34 = vmul.f32 %v3068_v58, %v4207_v38  ;;  %vm1157_vm9 = vcmp.gt.f32.partialorder %v3114_v17, 0.0  ;;  %v1212_v26 = vmul.f32 0.2, %v3078_v15  ;;  %v3335_v38 = vmul.f32 %v3068_v58, %v3060_v42 }
 0x281   :  { %4204 = vst [vmem:[#allocation13_spill] sm:$0xff] %v3306_v56  ;;  %4206 = vst [vmem:[#allocation14_spill] sm:$0xff] %v3310_v2  ;;  %v1213_v30 = vmul.f32 0.2, %v3082_v20  ;;  %v1214_v10 = vmul.f32 0.2, %v3086_v62 }
 0x282   :  { %4208 = vst [vmem:[#allocation15_spill] sm:$0xff] %v3314_v34  ;;  %4209 = vst [vmem:[#allocation16_spill] sm:$0xff] %v3327_v55  ;;  %vm1158_vm10 = vcmp.gt.f32.partialorder %v3118_v25, 0.0  ;;  %v1215_v34 = vmul.f32 0.2, %v3090_v16  ;;  %vm1159_vm11 = vcmp.gt.f32.partialorder %v3122_v29, 0.0  ;;  %v3348_v58 = vsel %vm1148_vm0, %v3078_v15, %v1212_v26 }
 0x283   :  { %4210 = vst [vmem:[#allocation7_spill] sm:$0xff] %v3335_v38  ;;  %v1216_v2 = vmul.f32 0.2, %v3094_v50  ;;  %v1217_v14 = vmul.f32 0.2, %v3098_v3  ;;  %4211 = vst [vmem:[#allocation9_spill] sm:$0xff] %v3348_v58  ;;  %v3359_v54 = vsel %vm1149_vm1, %v3082_v20, %v1213_v30  ;;  %v3374_v58 = vsel %vm1150_vm2, %v3086_v62, %v1214_v10 }
 0x284   :  { %v1218_v55 = vmul.f32 0.2, %v3102_v23  ;;  %v1219_v56 = vmul.f32 0.2, %v3106_v11  ;;  %v1220_v44 = vmul.f32 0.2, %v3110_v52 }
 0x285   :  { %vm1160_vm12 = vcmp.gt.f32.partialorder %v3126_v48, 0.0  ;;  %v1221_v42 = vmul.f32 0.2, %v3114_v17  ;;  %v1222_v38 = vmul.f32 0.2, %v3118_v25  ;;  %4212 = vst [vmem:[#allocation11_spill] sm:$0xff] %v3359_v54 }
 0x286   :  { %v3354_v46 = vmul.f32 0.2, %v3122_v29  ;;  %vm1161_vm13 = vcmp.gt.f32.partialorder %v3130_v63, 0.0  ;;  %v3363_v22 = vmul.f32 0.2, %v3126_v48  ;;  %4214 = vst [vmem:[#allocation22_spill] sm:$0xff] %v3374_v58 }
 0x287   :  { %v3366_v15 = vmul.f32 0.2, %v3130_v63  ;;  %v3369_v26 = vmul.f32 0.2, %v3134_v24  ;;  %vm1162_vm14 = vcmp.gt.f32.partialorder %v3134_v24, 0.0  ;;  %vm1163_vm15 = vcmp.gt.f32.partialorder %v3138_v21, 0.0 }
 0x288   :  { %v3378_v20 = vmul.f32 0.2, %v3138_v21  ;;  %v3381_v30 = vmul.f32 0.2, %v3142_v39  ;;  %v3384_v54 = vmul.f32 0.2, %v3146_v33 }
 0x289   :  { %4213 = vst [vmem:[#allocation19_spill] sm:$0xff] %v3369_v26  ;;  %v3389_v26 = vsel %vm1151_vm3, %v3090_v16, %v1215_v34  ;;  %v3393_v62 = vmul.f32 0.2, %v3150_v37  ;;  %v3396_v10 = vmul.f32 0.2, %v3154_v41  ;;  %vm1164_vm0 = vcmp.gt.f32.partialorder %v3142_v39, 0.0 }
 0x28a   :  { %4215 = vst [vmem:[#allocation23_spill] sm:$0xff] %v3384_v54  ;;  %4216 = vst [vmem:[#allocation24_spill] sm:$0xff] %v3389_v26  ;;  %v3399_v58 = vmul.f32 0.2, %v3158_v45  ;;  %v3404_v54 = vsel %vm1152_vm4, %v3094_v50, %v1216_v2  ;;  %v3408_v16 = vmul.f32 0.2, %v3162_v51 }
 0x28b   :  { %4218 = vst [vmem:[#allocation26_spill] sm:$0xff] %v3404_v54  ;;  %v3411_v34 = vmul.f32 0.2, %v3166_v43  ;;  %v3414_v26 = vmul.f32 0.2, %v3170_v8  ;;  %vm1165_vm1 = vcmp.gt.f32.partialorder %v3146_v33, 0.0 }
 0x28c   :  { %4217 = vst [vmem:[#allocation25_spill] sm:$0xff] %v3399_v58  ;;  %v3419_v58 = vsel %vm1153_vm5, %v3098_v3, %v1217_v14  ;;  %v3423_v50 = vmul.f32 0.2, %v3174_v27  ;;  %v3426_v2 = vmul.f32 0.2, %v3178_v32  ;;  %vm1166_vm2 = vcmp.gt.f32.partialorder %v3150_v37, 0.0 }
 0x28d   :  { %4219 = vst [vmem:[#allocation27_spill] sm:$0xff] %v3414_v26  ;;  %4220 = vst [vmem:[#allocation28_spill] sm:$0xff] %v3419_v58  ;;  %v3429_v54 = vmul.f32 0.2, %v3182_v6  ;;  %v3434_v26 = vsel %vm1154_vm6, %v3102_v23, %v1218_v55  ;;  %v3438_v3 = vmul.f32 0.2, %v3186_v28 }
 0x28e   :  { %4222 = vst [vmem:[#allocation30_spill] sm:$0xff] %v3434_v26  ;;  %v3441_v14 = vmul.f32 0.2, %v3190_v4  ;;  %v3444_v58 = vmul.f32 0.2, %v3194_v1  ;;  %vm1167_vm3 = vcmp.gt.f32.partialorder %v3154_v41, 0.0 }
 0x28f   :  { %4221 = vst [vmem:[#allocation29_spill] sm:$0xff] %v3429_v54  ;;  %v3449_v54 = vsel %vm1155_vm7, %v3106_v11, %v1219_v56  ;;  %v3455_v23 = vmul.f32 0.2, %v3198_v60  ;;  %v3458_v55 = vmul.f32 0.2, %v3202_v49  ;;  %v3466_v11 = vsel %vm1156_vm8, %v3110_v52, %v1220_v44 }
 0x290   :  { %4223 = vst [vmem:[#allocation31_spill] sm:$0xff] %v3449_v54  ;;  %v3461_v26 = vmul.f32 0.2, %v3206_v53  ;;  %4225 = vst [vmem:[#allocation33_spill] sm:$0xff] %v3466_v11  ;;  %vm1170_vm6 = vcmp.gt.f32.partialorder %v3166_v43, 0.0  ;;  %v3484_v52 = vsel %vm1157_vm9, %v3114_v17, %v1221_v42  ;;  %vm1174_vm8 = vcmp.gt.f32.partialorder %v3182_v6, 0.0 }
 0x291   :  { %v3473_v56 = vmul.f32 0.2, %v3210_v12  ;;  %v3476_v54 = vmul.f32 0.2, %v3214_v5  ;;  %4227 = vst [vmem:[#allocation35_spill] sm:$0xff] %v3484_v52  ;;  %v3502_v17 = vsel %vm1158_vm10, %v3118_v25, %v1222_v38  ;;  %vm1178_vm9 = vcmp.gt.f32.partialorder %v3198_v60, 0.0 }
 0x292   :  { %4224 = vst [vmem:[#allocation32_spill] sm:$0xff] %v3461_v26  ;;  %v3479_v26 = vmul.f32 0.2, %v3218_v36  ;;  %v3491_v44 = vmul.f32 0.2, %v3222_v40  ;;  %4229 = vst [vmem:[#allocation37_spill] sm:$0xff] %v3502_v17  ;;  %v3521_v25 = vsel %vm1159_vm11, %v3122_v29, %v3354_v46  ;;  %v3540_v29 = vsel %vm1160_vm12, %v3126_v48, %v3363_v22 }
 0x293   :  { %v3494_v11 = vmul.f32 0.2, %v3226_v47  ;;  %v3509_v42 = vmul.f32 0.2, %v3234_v7  ;;  %v3512_v52 = vmul.f32 0.2, %v3238_v61  ;;  %v3559_v48 = vsel %vm1161_vm13, %v3130_v63, %v3366_v15 }
 0x294   :  { %4226 = vst [vmem:[#allocation34_spill] sm:$0xff] %v3479_v26  ;;  %v3497_v26 = vmul.f32 0.2, %v3230_v57  ;;  %4231 = vst [vmem:[#allocation39_spill] sm:$0xff] %v3521_v25  ;;  %vm1182_vm10 = vcmp.gt.f32.partialorder %v3214_v5, 0.0  ;;  %vm1186_vm11 = vcmp.gt.f32.partialorder %v3230_v57, 0.0 }
 0x295   :  { %v3528_v38 = vmul.f32 0.2, %v3246_v0  ;;  %v3531_v17 = vmul.f32 0.2, %v3250_v13  ;;  %4234 = vst [vmem:[#allocation42_spill] sm:$0xff] %v3540_v29  ;;  %4238 = vst [vmem:[#allocation46_spill] sm:$0xff] %v3559_v48 }
 0x296   :  { %4228 = vst [vmem:[#allocation36_spill] sm:$0xff] %v3497_v26  ;;  %v3515_v26 = vmul.f32 0.2, %v3242_v31  ;;  %v3547_v46 = vmul.f32 0.2, %v3258_v35  ;;  %vm1190_vm12 = vcmp.gt.f32.partialorder %v3246_v0, 0.0 }
 0x297   :  { %4232 = vst [vmem:[#allocation40_spill] sm:$0xff] %v3531_v17  ;;  %v3550_v25 = vmul.f32 0.2, %v3262_v9  ;;  %v3566_v22 = vmul.f32 0.2, %v3270_v18  ;;  %v4240_v29 = vld [vmem:[#allocation2_spill] sm:$0xff] }
 0x298   :  { %4230 = vst [vmem:[#allocation38_spill] sm:$0xff] %v3515_v26  ;;  %v3534_v26 = vmul.f32 0.2, %v3254_v19  ;;  %4235 = vst [vmem:[#allocation43_spill] sm:$0xff] %v3547_v46  ;;  %v4244_v17 = vld [vmem:[#allocation19_spill] sm:$0xff]  ;;  %vm1194_vm13 = vcmp.gt.f32.partialorder %v3262_v9, 0.0 }
 0x299   :  { %4236 = vst [vmem:[#allocation44_spill] sm:$0xff] %v3550_v25  ;;  %4239 = vst [vmem:[#allocation47_spill] sm:$0xff] %v3566_v22  ;;  %v3569_v25 = vmul.f32 0.2, %v4240_v29  ;;  %v3578_v63 = vsel %vm1162_vm14, %v3134_v24, %v4244_v17  ;;  %v4246_v15 = vld [vmem:[#allocation20_spill] sm:$0xff]  ;;  %v3597_v24 = vsel %vm1163_vm15, %v3138_v21, %v3378_v20  ;;  %v4253_v17 = vld [vmem:[#allocation5_spill] sm:$0xff]  ;;  %v3610_v21 = vsel %vm1164_vm0, %v3142_v39, %v3381_v30 }
 0x29a   :  { %4233 = vst [vmem:[#allocation41_spill] sm:$0xff] %v3534_v26  ;;  %v3553_v26 = vmul.f32 0.2, %v3266_v59  ;;  %4245 = vst [vmem:[#allocation19_spill] sm:$0xff] %v3578_v63  ;;  %v3585_v48 = vmul.f32 0.2, %v4246_v15 }
 0x29b   :  { %4241 = vst [vmem:[#allocation48_spill] sm:$0xff] %v3569_v25  ;;  %v4248_v25 = vld [vmem:[#allocation21_spill] sm:$0xff]  ;;  %4252 = vst [vmem:[#allocation53_spill] sm:$0xff] %v3597_v24  ;;  %v1266_v63 = vmul.f32 0.2, %v4253_v17  ;;  %v4255_v29 = vld [vmem:[#allocation8_spill] sm:$0xff] }
 0x29c   :  { %4237 = vst [vmem:[#allocation45_spill] sm:$0xff] %v3553_v26  ;;  %v4242_v26 = vld [vmem:[#allocation3_spill] sm:$0xff]  ;;  %4247 = vst [vmem:[#allocation50_spill] sm:$0xff] %v3585_v48  ;;  %v3588_v22 = vmul.f32 0.2, %v4248_v25  ;;  %vm1202_vm15 = vcmp.gt.f32.partialorder %v4253_v17, 0.0 }
 0x29d   :  { %v3572_v46 = vmul.f32 0.2, %v4242_v26  ;;  %vm1198_vm14 = vcmp.gt.f32.partialorder %v4242_v26, 0.0  ;;  %4256 = vst [vmem:[#allocation54_spill] sm:$0xff] %v3610_v21  ;;  %v4257_v20 = vld [vmem:[#allocation10_spill] sm:$0xff]  ;;  %v4259_v15 = vld [vmem:[#allocation13_spill] sm:$0xff] }
 0x29e   :  { %4249 = vst [vmem:[#allocation51_spill] sm:$0xff] %v3588_v22  ;;  %v4254_v22 = vld [vmem:[#allocation6_spill] sm:$0xff]  ;;  %v1269_v24 = vmul.f32 0.2, %v4257_v20  ;;  %v1271_v26 = vmul.f32 0.2, %v4259_v15 }
 0x29f   :  { %4243 = vst [vmem:[#allocation49_spill] sm:$0xff] %v3572_v46  ;;  %v4250_v46 = vld [vmem:[#allocation4_spill] sm:$0xff]  ;;  %v1267_v48 = vmul.f32 0.2, %v4254_v22  ;;  %v4260_v18 = vld [vmem:[#allocation23_spill] sm:$0xff]  ;;  %v4262_v30 = vld [vmem:[#allocation14_spill] sm:$0xff] }
 0x2a0   :  { %v3591_v35 = vmul.f32 0.2, %v4250_v46  ;;  %v4258_v46 = vld [vmem:[#allocation12_spill] sm:$0xff]  ;;  %v3623_v39 = vsel %vm1165_vm1, %v3146_v33, %v4260_v18  ;;  %vm1208_vm4 = vcmp.gt.f32.partialorder %v4262_v30, 0.0  ;;  %v4263_v21 = vld [vmem:[#allocation15_spill] sm:$0xff]  ;;  %v3636_v33 = vsel %vm1166_vm2, %v3150_v37, %v3393_v62 }
 0x2a1   :  { %v1270_v25 = vmul.f32 0.2, %v4258_v46  ;;  %4261 = vst [vmem:[#allocation12_spill] sm:$0xff] %v3623_v39  ;;  %vm1206_vm0 = vcmp.gt.f32.partialorder %v4258_v46, 0.0  ;;  %v1272_v20 = vmul.f32 0.2, %v4262_v30  ;;  %v3645_v30 = vsel %vm1167_vm3, %v3154_v41, %v3396_v10 }
 0x2a2   :  { %4251 = vst [vmem:[#allocation52_spill] sm:$0xff] %v3591_v35  ;;  %v1268_v35 = vmul.f32 0.2, %v4255_v29  ;;  %v1273_v29 = vmul.f32 0.2, %v4263_v21  ;;  %v4264_v22 = vld [vmem:[#allocation16_spill] sm:$0xff]  ;;  %v3663_v62 = vsel %vm1170_vm6, %v3166_v43, %v3411_v34 }
 0x2a3   :  { %v1274_v17 = vmul.f32 0.2, %v4264_v22  ;;  %vm1210_vm1 = vcmp.gt.f32.partialorder %v4264_v22, 0.0  ;;  %v4265_v18 = vld [vmem:[#allocation7_spill] sm:$0xff]  ;;  %v4266_v21 = vld [vmem:[#allocation25_spill] sm:$0xff]  ;;  %vm4267_vm7 = vcmp.gt.f32.partialorder %v3158_v45, 0.0 }
 0x2a4   :  { %vm1211_vm5 = vcmp.gt.f32.partialorder %v4265_v18, 0.0  ;;  %v1275_v39 = vmul.f32 0.2, %v4265_v18  ;;  %v3651_v15 = vsel %vm4267_vm7, %v3158_v45, %v4266_v21  ;;  %vm4268_vm2 = vcmp.gt.f32.partialorder %v3162_v51, 0.0  ;;  %v4269_v41 = vld [vmem:[#allocation27_spill] sm:$0xff]  ;;  %v4273_v43 = vld [vmem:[#allocation29_spill] sm:$0xff] }
 0x2a5   :  { %v3657_v37 = vsel %vm4268_vm2, %v3162_v51, %v3408_v16  ;;  %vm4270_vm3 = vcmp.gt.f32.partialorder %v3170_v8, 0.0  ;;  %vm4271_vm7 = vcmp.gt.f32.partialorder %v3174_v27, 0.0  ;;  %vm4272_vm2 = vcmp.gt.f32.partialorder %v3178_v32, 0.0  ;;  %v4307_v21 = vld [vmem:[#allocation3_spill] sm:$0xff] }
 0x2a6   :  { %v3669_v10 = vsel %vm4270_vm3, %v3170_v8, %v4269_v41  ;;  %v3675_v45 = vsel %vm4271_vm7, %v3174_v27, %v3423_v50  ;;  %v3681_v51 = vsel %vm4272_vm2, %v3178_v32, %v3426_v2  ;;  %v3687_v16 = vsel %vm1174_vm8, %v3182_v6, %v4273_v43  ;;  %v4309_v43 = vld [vmem:[#allocation20_spill] sm:$0xff] }
 0x2a7   :  { %vm4274_vm6 = vcmp.gt.f32.partialorder %v3186_v28, 0.0  ;;  %vm4275_vm3 = vcmp.gt.f32.partialorder %v3190_v4, 0.0  ;;  %vm4276_vm7 = vcmp.gt.f32.partialorder %v3194_v1, 0.0  ;;  %v3711_v6 = vsel %vm1178_vm9, %v3198_v60, %v3455_v23 }
 0x2a8   :  { %v3693_v8 = vsel %vm4274_vm6, %v3186_v28, %v3438_v3  ;;  %v3699_v27 = vsel %vm4275_vm3, %v3190_v4, %v3441_v14  ;;  %v3705_v32 = vsel %vm4276_vm7, %v3194_v1, %v3444_v58  ;;  %vm4277_vm8 = vcmp.gt.f32.partialorder %v3202_v49, 0.0  ;;  %v4278_v4 = vld [vmem:[#allocation32_spill] sm:$0xff]  ;;  %v4295_v14 = vld [vmem:[#allocation17_spill] sm:$0xff] }
 0x2a9   :  { %v3717_v28 = vsel %vm4277_vm8, %v3202_v49, %v3458_v55  ;;  %vm4279_vm2 = vcmp.gt.f32.partialorder %v3206_v53, 0.0  ;;  %vm4280_vm6 = vcmp.gt.f32.partialorder %v3210_v12, 0.0  ;;  %v3735_v60 = vsel %vm1182_vm10, %v3214_v5, %v3476_v54  ;;  %v4281_v49 = vld [vmem:[#allocation34_spill] sm:$0xff]  ;;  %v4285_v5 = vld [vmem:[#allocation36_spill] sm:$0xff] }
 0x2aa   :  { %v3723_v34 = vsel %vm4279_vm2, %v3206_v53, %v4278_v4  ;;  %v3729_v1 = vsel %vm4280_vm6, %v3210_v12, %v3473_v56  ;;  %vm4282_vm9 = vcmp.gt.f32.partialorder %v3218_v36, 0.0  ;;  %vm4283_vm3 = vcmp.gt.f32.partialorder %v3222_v40, 0.0  ;;  %v4301_v56 = vld [vmem:[#allocation18_spill] sm:$0xff] }
 0x2ab   :  { %v3741_v58 = vsel %vm4282_vm9, %v3218_v36, %v4281_v49  ;;  %v3747_v53 = vsel %vm4283_vm3, %v3222_v40, %v3491_v44  ;;  %vm4284_vm7 = vcmp.gt.f32.partialorder %v3226_v47, 0.0  ;;  %v3759_v54 = vsel %vm1186_vm11, %v3230_v57, %v4285_v5  ;;  %v4303_v44 = vld [vmem:[#allocation48_spill] sm:$0xff]  ;;  %v4311_v49 = vld [vmem:[#allocation51_spill] sm:$0xff]  ;;  %v4312_v5 = vld [vmem:[#allocation21_spill] sm:$0xff] }
 0x2ac   :  { %v3753_v12 = vsel %vm4284_vm7, %v3226_v47, %v3494_v11  ;;  %vm4286_vm10 = vcmp.gt.f32.partialorder %v3234_v7, 0.0  ;;  %vm4287_vm8 = vcmp.gt.f32.partialorder %v3238_v61, 0.0  ;;  %v4288_v47 = vld [vmem:[#allocation38_spill] sm:$0xff]  ;;  %vm4289_vm2 = vcmp.gt.f32.partialorder %v3242_v31, 0.0 }
 0x2ad   :  { %v3765_v36 = vsel %vm4286_vm10, %v3234_v7, %v3509_v42  ;;  %v3771_v40 = vsel %vm4287_vm8, %v3238_v61, %v3512_v52  ;;  %v3777_v50 = vsel %vm4289_vm2, %v3242_v31, %v4288_v47  ;;  %v3783_v57 = vsel %vm1190_vm12, %v3246_v0, %v3528_v38  ;;  %v4290_v7 = vld [vmem:[#allocation40_spill] sm:$0xff]  ;;  %v4292_v61 = vld [vmem:[#allocation41_spill] sm:$0xff]  ;;  %v4294_v31 = vld [vmem:[#allocation43_spill] sm:$0xff] }
 0x2ae   :  { %vm4291_vm11 = vcmp.gt.f32.partialorder %v3250_v13, 0.0  ;;  %vm4293_vm6 = vcmp.gt.f32.partialorder %v3254_v19, 0.0  ;;  %vm4296_vm9 = vcmp.gt.f32.partialorder %v4295_v14, 0.0  ;;  %v4297_v0 = vld [vmem:[#allocation44_spill] sm:$0xff]  ;;  %vm4299_vm12 = vcmp.gt.f32.partialorder %v3266_v59, 0.0  ;;  %v4304_v42 = vld [vmem:[#allocation2_spill] sm:$0xff] }
 0x2af   :  { %v3789_v2 = vsel %vm4291_vm11, %v3250_v13, %v4290_v7  ;;  %v3795_v3 = vsel %vm4293_vm6, %v3254_v19, %v4292_v61  ;;  %v3801_v23 = vsel %vm4296_vm9, %v4295_v14, %v4294_v31  ;;  %v3807_v55 = vsel %vm1194_vm13, %v3262_v9, %v4297_v0  ;;  %v4298_v13 = vld [vmem:[#allocation45_spill] sm:$0xff]  ;;  %v4300_v19 = vld [vmem:[#allocation47_spill] sm:$0xff]  ;;  %v4314_v7 = vld [vmem:[#allocation52_spill] sm:$0xff] }
 0x2b0   :  { %v3813_v11 = vsel %vm4299_vm12, %v3266_v59, %v4298_v13  ;;  %vm4302_vm3 = vcmp.gt.f32.partialorder %v4301_v56, 0.0  ;;  %vm4305_vm7 = vcmp.gt.f32.partialorder %v4304_v42, 0.0  ;;  %v4306_v9 = vld [vmem:[#allocation49_spill] sm:$0xff]  ;;  %v4308_v59 = vld [vmem:[#allocation50_spill] sm:$0xff]  ;;  %vm4310_vm13 = vcmp.gt.f32.partialorder %v4309_v43, 0.0  ;;  %v4315_v61 = vld [vmem:[#allocation4_spill] sm:$0xff] }
 0x2b1   :  { %v3819_v52 = vsel %vm4302_vm3, %v4301_v56, %v4300_v19  ;;  %v3825_v38 = vsel %vm4305_vm7, %v4304_v42, %v4303_v44  ;;  %v3831_v41 = vsel %vm1198_vm14, %v4307_v21, %v4306_v9  ;;  %v3837_v4 = vsel %vm4310_vm13, %v4309_v43, %v4308_v59  ;;  %v4317_v14 = vld [vmem:[#allocation5_spill] sm:$0xff]  ;;  %v4318_v13 = vld [vmem:[#allocation6_spill] sm:$0xff]  ;;  %v4320_v56 = vld [vmem:[#allocation8_spill] sm:$0xff] }
 0x2b2   :  { %vm4313_vm10 = vcmp.gt.f32.partialorder %v4312_v5, 0.0  ;;  %vm4316_vm8 = vcmp.gt.f32.partialorder %v4315_v61, 0.0  ;;  %v3854_v0 = vsel %vm1202_vm15, %v4317_v14, %v1266_v63  ;;  %vm4319_vm14 = vcmp.gt.f32.partialorder %v4318_v13, 0.0  ;;  %v4322_v42 = vld [vmem:[#allocation10_spill] sm:$0xff]  ;;  %v4324_v21 = vld [vmem:[#allocation13_spill] sm:$0xff]  ;;  %v4327_v43 = vld [vmem:[#allocation15_spill] sm:$0xff] }
 0x2b3   :  { %v3843_v47 = vsel %vm4313_vm10, %v4312_v5, %v4311_v49  ;;  %v3849_v31 = vsel %vm4316_vm8, %v4315_v61, %v4314_v7  ;;  %v3859_v19 = vsel %vm4319_vm14, %v4318_v13, %v1267_v48  ;;  %vm4321_vm2 = vcmp.gt.f32.partialorder %v4320_v56, 0.0  ;;  %v4326_v59 = vld [vmem:[#allocation14_spill] sm:$0xff]  ;;  %v4332_v49 = vld [vmem:[#allocation11_spill] sm:$0xff]  ;;  %v4334_v7 = vld [vmem:[#allocation24_spill] sm:$0xff] }
 0x2b4   :  { %v3864_v44 = vsel %vm4321_vm2, %v4320_v56, %v1268_v35  ;;  %vm4323_vm11 = vcmp.gt.f32.partialorder %v4322_v42, 0.0  ;;  %v3874_v63 = vsel %vm1206_vm0, %v4258_v46, %v1270_v25  ;;  %vm4325_vm15 = vcmp.gt.f32.partialorder %v4324_v21, 0.0  ;;  %v4331_v46 = vld [vmem:[#allocation9_spill] sm:$0xff]  ;;  %v4335_v14 = vld [vmem:[#allocation26_spill] sm:$0xff]  ;;  %v4336_v13 = vld [vmem:[#allocation28_spill] sm:$0xff] }
 0x2b5   :  { %v3869_v9 = vsel %vm4323_vm11, %v4322_v42, %v1269_v24  ;;  %v3879_v48 = vsel %vm4325_vm15, %v4324_v21, %v1271_v26  ;;  %v3884_v35 = vsel %vm1208_vm4, %v4326_v59, %v1272_v20  ;;  %vm4328_vm6 = vcmp.gt.f32.partialorder %v4327_v43, 0.0  ;;  %v4333_v20 = vld [vmem:[#allocation22_spill] sm:$0xff]  ;;  %v4338_v42 = vld [vmem:[#allocation31_spill] sm:$0xff]  ;;  %v4339_v59 = vld [vmem:[#allocation33_spill] sm:$0xff] }
 0x2b6   :  { %v3889_v24 = vsel %vm4328_vm6, %v4327_v43, %v1273_v29  ;;  %v3894_v25 = vsel %vm1210_vm1, %v4264_v22, %v1274_v17  ;;  %v3899_v26 = vsel %vm1211_vm5, %v4265_v18, %v1275_v39  ;;  %v1875_v5 = vpack.c.bf16 %v4332_v49, %v4331_v46  ;;  %v4337_v56 = vld [vmem:[#allocation30_spill] sm:$0xff]  ;;  %v4340_v22 = vld [vmem:[#allocation35_spill] sm:$0xff]  ;;  %v4341_v43 = vld [vmem:[#allocation37_spill] sm:$0xff] }
 0x2b7   :  { %4329 = vst [vmem:[#allocation23_spill] sm:$0xff] %v3889_v24  ;;  %4330 = vst [vmem:[#allocation16_spill] sm:$0xff] %v3894_v25  ;;  %v1880_v61 = vpack.c.bf16 %v4334_v7, %v4333_v20  ;;  %v1885_v29 = vpack.c.bf16 %v4336_v13, %v4335_v14  ;;  %v1890_v21 = vpack.c.bf16 %v4338_v42, %v4337_v56  ;;  %v4342_v25 = vld [vmem:[#allocation39_spill] sm:$0xff]  ;;  %v4343_v39 = vld [vmem:[#allocation42_spill] sm:$0xff] }
 0x2b8   :  { %v1895_v17 = vpack.c.bf16 %v4340_v22, %v4339_v59  ;;  %v1900_v24 = vpack.c.bf16 %v4342_v25, %v4341_v43  ;;  %1876 = vst [vmem:[%s4063_s2] sm:$0xff] %v1875_v5   ;;  %v4344_v18 = vld [vmem:[#allocation46_spill] sm:$0xff]  ;;  %v4345_v49 = vld [vmem:[#allocation19_spill] sm:$0xff]  ;;  %v4346_v20 = vld [vmem:[#allocation53_spill] sm:$0xff]  ;;  %v1920_v25 = vpack.c.bf16 %v3645_v30, %v3636_v33  ;;  %v1925_v5 = vpack.c.bf16 %v3657_v37, %v3651_v15 }
 0x2b9   :  { %2032 = vst [vmem:[%s4063_s2 + $0x8] sm:$0xff] %v1880_v61   ;;  %v1905_v46 = vpack.c.bf16 %v4344_v18, %v4343_v39  ;;  %v1910_v7 = vpack.c.bf16 %v4346_v20, %v4345_v49  ;;  %v4347_v14 = vld [vmem:[#allocation54_spill] sm:$0xff]  ;;  %v4348_v13 = vld [vmem:[#allocation12_spill] sm:$0xff]  ;;  %2033 = vst [vmem:[%s4063_s2 + $0x10] sm:$0xff] %v1885_v29   ;;  %v1930_v30 = vpack.c.bf16 %v3669_v10, %v3663_v62 }
 0x2ba   :  { %v1915_v56 = vpack.c.bf16 %v4348_v13, %v4347_v14  ;;  %2034 = vst [vmem:[%s4063_s2 + $0x18] sm:$0xff] %v1890_v21   ;;  %2035 = vst [vmem:[%s4063_s2 + $0x20] sm:$0xff] %v1895_v17   ;;  %v1935_v33 = vpack.c.bf16 %v3681_v51, %v3675_v45  ;;  %v1940_v61 = vpack.c.bf16 %v3693_v8, %v3687_v16 }
 0x2bb   :  { %2036 = vst [vmem:[%s4063_s2 + $0x28] sm:$0xff] %v1900_v24   ;;  %2037 = vst [vmem:[%s4063_s2 + $0x30] sm:$0xff] %v1905_v46   ;;  %v1945_v15 = vpack.c.bf16 %v3705_v32, %v3699_v27  ;;  %v1950_v37 = vpack.c.bf16 %v3717_v28, %v3711_v6  ;;  %v1955_v62 = vpack.c.bf16 %v3729_v1, %v3723_v34 }
 0x2bc   :  { %2038 = vst [vmem:[%s4063_s2 + $0x38] sm:$0xff] %v1910_v7   ;;  %2039 = vst [vmem:[%s4063_s2 + $0x40] sm:$0xff] %v1915_v56   ;;  %v1960_v10 = vpack.c.bf16 %v3741_v58, %v3735_v60  ;;  %v1965_v45 = vpack.c.bf16 %v3753_v12, %v3747_v53  ;;  %v1970_v51 = vpack.c.bf16 %v3765_v36, %v3759_v54 }
 0x2bd   :  { %2040 = vst [vmem:[%s4063_s2 + $0x48] sm:$0xff] %v1920_v25   ;;  %2041 = vst [vmem:[%s4063_s2 + $0x50] sm:$0xff] %v1925_v5   ;;  %v1975_v16 = vpack.c.bf16 %v3777_v50, %v3771_v40  ;;  %v1980_v8 = vpack.c.bf16 %v3789_v2, %v3783_v57  ;;  %v1985_v27 = vpack.c.bf16 %v3801_v23, %v3795_v3 }
 0x2be   :  { %2042 = vst [vmem:[%s4063_s2 + $0x58] sm:$0xff] %v1930_v30   ;;  %2043 = vst [vmem:[%s4063_s2 + $0x60] sm:$0xff] %v1935_v33   ;;  %v1990_v32 = vpack.c.bf16 %v3813_v11, %v3807_v55  ;;  %v1995_v6 = vpack.c.bf16 %v3825_v38, %v3819_v52  ;;  %v2000_v28 = vpack.c.bf16 %v3837_v4, %v3831_v41  ;;  %v4349_v53 = vld [vmem:[#allocation23_spill] sm:$0xff]  ;;  %v4350_v54 = vld [vmem:[#allocation16_spill] sm:$0xff] }
 0x2bf   :  { %2044 = vst [vmem:[%s4063_s2 + $0x68] sm:$0xff] %v1940_v61   ;;  %2045 = vst [vmem:[%s4063_s2 + $0x70] sm:$0xff] %v1945_v15   ;;  %v2005_v34 = vpack.c.bf16 %v3849_v31, %v3843_v47  ;;  %v2010_v1 = vpack.c.bf16 %v3859_v19, %v3854_v0  ;;  %v2015_v60 = vpack.c.bf16 %v3869_v9, %v3864_v44 }
 0x2c0   :  { %2046 = vst [vmem:[%s4063_s2 + $0x78] sm:$0xff] %v1950_v37   ;;  %2047 = vst [vmem:[%s4063_s2 + $0x80] sm:$0xff] %v1955_v62   ;;  %v2020_v58 = vpack.c.bf16 %v3879_v48, %v3874_v63  ;;  %v2025_v12 = vpack.c.bf16 %v4349_v53, %v3884_v35  ;;  %v2030_v36 = vpack.c.bf16 %v3899_v26, %v4350_v54 }
 0x2c1   :  { %2048 = vst [vmem:[%s4063_s2 + $0x88] sm:$0xff] %v1960_v10   ;;  %2049 = vst [vmem:[%s4063_s2 + $0x90] sm:$0xff] %v1965_v45  }
 0x2c2   :  { %2050 = vst [vmem:[%s4063_s2 + $0x98] sm:$0xff] %v1970_v51   ;;  %2051 = vst [vmem:[%s4063_s2 + $0xa0] sm:$0xff] %v1975_v16  }
 0x2c3   :  { %2052 = vst [vmem:[%s4063_s2 + $0xa8] sm:$0xff] %v1980_v8   ;;  %2053 = vst [vmem:[%s4063_s2 + $0xb0] sm:$0xff] %v1985_v27  }
 0x2c4   :  { %2054 = vst [vmem:[%s4063_s2 + $0xb8] sm:$0xff] %v1990_v32   ;;  %2055 = vst [vmem:[%s4063_s2 + $0xc0] sm:$0xff] %v1995_v6  }
 0x2c5   :  { %2056 = vst [vmem:[%s4063_s2 + $0xc8] sm:$0xff] %v2000_v28   ;;  %2057 = vst [vmem:[%s4063_s2 + $0xd0] sm:$0xff] %v2005_v34  }
 0x2c6   :  { %2058 = vst [vmem:[%s4063_s2 + $0xd8] sm:$0xff] %v2010_v1   ;;  %2059 = vst [vmem:[%s4063_s2 + $0xe0] sm:$0xff] %v2015_v60  }
 0x2c7   :  { %2060 = vst [vmem:[%s4063_s2 + $0xe8] sm:$0xff] %v2020_v58   ;;  %2061 = vst [vmem:[%s4063_s2 + $0xf0] sm:$0xff] %v2025_v12  }
 0x2c8   :  { %2062 = vst [vmem:[%s4063_s2 + $0xf8] sm:$0xff] %v2030_v36  }

// kernel: discriminator_forward.6
= control target key start
LH: loop header
LB: loop body
LE: loop exit
PB: predicated region body
PF: predicated region fallthrough
CT: control target
= control target key end

     0   :  { %s1521_s1 = inlined_call_operand.vmem [shape: bf16[512,128], index: 1, kind: input, shape index: {}]   ;;  %s1522_s0 = inlined_call_operand.vmem [shape: bf16[128,512], index: 0, kind: input, shape index: {}]   ;;  %s1523_s2 = inlined_call_operand.vmem [shape: bf16[128,128], index: 2, kind: output, shape index: {}]  }
   0x1   :  { %v1152_v0 = vld [vmem:[%s1521_s1 + $0x78] sm:$0xff]   ;;  %v1156_v4 = vld [vmem:[%s1521_s1 + $0x70] sm:$0xff]   ;;  %v1160_v8 = vld [vmem:[%s1521_s1 + $0x68] sm:$0xff]  }
   0x2   :  { %v1153_v1 = vld [vmem:[%s1521_s1 + $0xf8] sm:$0xff]   ;;  %1024 = vmatprep.subr.bf16.mxu0 %v1152_v0  ;;  %v1157_v5 = vld [vmem:[%s1521_s1 + $0xf0] sm:$0xff]   ;;  %v1161_v9 = vld [vmem:[%s1521_s1 + $0xe8] sm:$0xff]  }
   0x3   :  { %v1154_v2 = vld [vmem:[%s1521_s1 + $0x38] sm:$0xff]   ;;  %1088 = vmatprep.subr.bf16.mxu1 %v1153_v1  ;;  %v1158_v6 = vld [vmem:[%s1521_s1 + $0x30] sm:$0xff]   ;;  %v1162_v10 = vld [vmem:[%s1521_s1 + $0x28] sm:$0xff]  }
   0x4   :  { %v1155_v3 = vld [vmem:[%s1521_s1 + $0xb8] sm:$0xff]   ;;  %1025 = vmatpush3.bf16.msra.mxu0 %v1154_v2  ;;  %v1159_v7 = vld [vmem:[%s1521_s1 + $0xb0] sm:$0xff]   ;;  %v1163_v11 = vld [vmem:[%s1521_s1 + $0xa8] sm:$0xff]  }
   0x5   :  { %1089 = vmatpush3.bf16.msra.mxu1 %v1155_v3  ;;  %1026 = vmatprep.subr.bf16.mxu0 %v1156_v4  ;;  %v1164_v12 = vld [vmem:[%s1521_s1 + $0x60] sm:$0xff]   ;;  %v1168_v16 = vld [vmem:[%s1521_s1 + $0x58] sm:$0xff]   ;;  %v1172_v20 = vld [vmem:[%s1521_s1 + $0x50] sm:$0xff]  }
   0x6   :  { %1090 = vmatprep.subr.bf16.mxu1 %v1157_v5  ;;  %v1165_v13 = vld [vmem:[%s1521_s1 + $0xe0] sm:$0xff]   ;;  %v1169_v17 = vld [vmem:[%s1521_s1 + $0xd8] sm:$0xff]   ;;  %v1173_v21 = vld [vmem:[%s1521_s1 + $0xd0] sm:$0xff]  }
   0x7   :  { %v1166_v14 = vld [vmem:[%s1521_s1 + $0x20] sm:$0xff]   ;;  %v1170_v18 = vld [vmem:[%s1521_s1 + $0x18] sm:$0xff]   ;;  %v1174_v22 = vld [vmem:[%s1521_s1 + $0x10] sm:$0xff]  }
   0x8   :  { %1027 = vmatpush3.bf16.msra.mxu0 %v1158_v6  ;;  %v1167_v15 = vld [vmem:[%s1521_s1 + $0xa0] sm:$0xff]   ;;  %v1171_v19 = vld [vmem:[%s1521_s1 + $0x98] sm:$0xff]   ;;  %v1175_v23 = vld [vmem:[%s1521_s1 + $0x90] sm:$0xff]  }
   0x9   :  { %1091 = vmatpush3.bf16.msra.mxu1 %v1159_v7  ;;  %1028 = vmatprep.subr.bf16.mxu0 %v1160_v8  ;;  %v1176_v24 = vld [vmem:[%s1521_s1 + $0x48] sm:$0xff]   ;;  %v1180_v28 = vld [vmem:[%s1521_s1 + $0x40] sm:$0xff]  }
   0xa   :  { %1092 = vmatprep.subr.bf16.mxu1 %v1161_v9  ;;  %v1177_v25 = vld [vmem:[%s1521_s1 + $0xc8] sm:$0xff]   ;;  %v1181_v29 = vld [vmem:[%s1521_s1 + $0xc0] sm:$0xff]  }
   0xb   :  { %v1178_v26 = vld [vmem:[%s1521_s1 + $0x8] sm:$0xff]   ;;  %v1182_v30 = vld [vmem:[%s1521_s1] sm:$0xff]  }
   0xc   :  { %1029 = vmatpush3.bf16.msra.mxu0 %v1162_v10  ;;  %v1179_v27 = vld [vmem:[%s1521_s1 + $0x88] sm:$0xff]   ;;  %v1183_v31 = vld [vmem:[%s1521_s1 + $0x80] sm:$0xff]  }
   0xd   :  { %1093 = vmatpush3.bf16.msra.mxu1 %v1163_v11  ;;  %1030 = vmatprep.subr.bf16.mxu0 %v1164_v12  ;;  %v1184_v32 = vld [vmem:[%s1522_s0] ss:$16 sps:$4 sm:$0xff]   ;;  %v1186_v33 = vld [vmem:[%s1522_s0 + $0x4] ss:$16 sps:$4 sm:$0xff]   ;;  %v1187_v34 = vld [vmem:[%s1522_s0 + $0x8] ss:$16 sps:$4 sm:$0xff]  }
   0xe   :  { %1094 = vmatprep.subr.bf16.mxu1 %v1165_v13  ;;  %v1189_v35 = vld [vmem:[%s1522_s0 + $0xc] ss:$16 sps:$4 sm:$0xff]   ;;  %492 = vmatprep.mubr.bf16.mxu0 %v1186_v33  ;;  %v1190_v36 = vld [vmem:[%s1522_s0 + $0x24] ss:$16 sps:$4 sm:$0xff]   ;;  %v1194_v38 = vld [vmem:[%s1522_s0 + $0x20] ss:$16 sps:$4 sm:$0xff]  }
   0xf   :  { %589 = vmatprep.mubr.bf16.mxu1 %v1189_v35  ;;  %v1192_v37 = vld [vmem:[%s1522_s0 + $0x2c] ss:$16 sps:$4 sm:$0xff]   ;;  %v1195_v39 = vld [vmem:[%s1522_s0 + $0x28] ss:$16 sps:$4 sm:$0xff]   ;;  %v1196_v40 = vld [vmem:[%s1522_s0 + $0x44] ss:$16 sps:$4 sm:$0xff]  }
  0x10   :  { %1031 = vmatpush3.bf16.msra.mxu0 %v1166_v14  ;;  %v1198_v41 = vld [vmem:[%s1522_s0 + $0x4c] ss:$16 sps:$4 sm:$0xff]   ;;  %v1200_v42 = vld [vmem:[%s1522_s0 + $0x40] ss:$16 sps:$4 sm:$0xff]   ;;  %v1201_v43 = vld [vmem:[%s1522_s0 + $0x48] ss:$16 sps:$4 sm:$0xff]  }
  0x11   :  { %1095 = vmatpush3.bf16.msra.mxu1 %v1167_v15  ;;  %1032 = vmatprep.subr.bf16.mxu0 %v1168_v16  ;;  %v1202_v44 = vld [vmem:[%s1522_s0 + $0x64] ss:$16 sps:$4 sm:$0xff]   ;;  %v1204_v45 = vld [vmem:[%s1522_s0 + $0x6c] ss:$16 sps:$4 sm:$0xff]   ;;  %v1206_v46 = vld [vmem:[%s1522_s0 + $0x60] ss:$16 sps:$4 sm:$0xff]  }
  0x12   :  { %1096 = vmatprep.subr.bf16.mxu1 %v1169_v17  ;;  %v1207_v47 = vld [vmem:[%s1522_s0 + $0x68] ss:$16 sps:$4 sm:$0xff]   ;;  %v1208_v48 = vld [vmem:[%s1522_s0 + $0x84] ss:$16 sps:$4 sm:$0xff]   ;;  %v1210_v49 = vld [vmem:[%s1522_s0 + $0x8c] ss:$16 sps:$4 sm:$0xff]  }
  0x13   :  { %v1212_v50 = vld [vmem:[%s1522_s0 + $0x80] ss:$16 sps:$4 sm:$0xff]   ;;  %v1213_v51 = vld [vmem:[%s1522_s0 + $0x88] ss:$16 sps:$4 sm:$0xff]   ;;  %v1214_v52 = vld [vmem:[%s1522_s0 + $0xa4] ss:$16 sps:$4 sm:$0xff]  }
  0x14   :  { %1033 = vmatpush3.bf16.msra.mxu0 %v1170_v18  ;;  %v1216_v53 = vld [vmem:[%s1522_s0 + $0xac] ss:$16 sps:$4 sm:$0xff]   ;;  %v1218_v54 = vld [vmem:[%s1522_s0 + $0xa0] ss:$16 sps:$4 sm:$0xff]   ;;  %v1219_v55 = vld [vmem:[%s1522_s0 + $0xa8] ss:$16 sps:$4 sm:$0xff]  }
  0x15   :  { %1097 = vmatpush3.bf16.msra.mxu1 %v1171_v19  ;;  %1034 = vmatprep.subr.bf16.mxu0 %v1172_v20  ;;  %v1220_v56 = vld [vmem:[%s1522_s0 + $0xc4] ss:$16 sps:$4 sm:$0xff]   ;;  %v1222_v57 = vld [vmem:[%s1522_s0 + $0xcc] ss:$16 sps:$4 sm:$0xff]   ;;  %v1224_v58 = vld [vmem:[%s1522_s0 + $0xc0] ss:$16 sps:$4 sm:$0xff]  }
  0x16   :  { %1098 = vmatprep.subr.bf16.mxu1 %v1173_v21  ;;  %v1225_v59 = vld [vmem:[%s1522_s0 + $0xc8] ss:$16 sps:$4 sm:$0xff]   ;;  %v1226_v60 = vld [vmem:[%s1522_s0 + $0xe4] ss:$16 sps:$4 sm:$0xff]   ;;  %v1228_v61 = vld [vmem:[%s1522_s0 + $0xec] ss:$16 sps:$4 sm:$0xff]  }
  0x17   :  { %v1230_v62 = vld [vmem:[%s1522_s0 + $0xe0] ss:$16 sps:$4 sm:$0xff]   ;;  %v1231_v63 = vld [vmem:[%s1522_s0 + $0xe8] ss:$16 sps:$4 sm:$0xff]  }
  0x18   :  { %1035 = vmatpush3.bf16.msra.mxu0 %v1174_v22 }
  0x19   :  { %1099 = vmatpush3.bf16.msra.mxu1 %v1175_v23  ;;  %1036 = vmatprep.subr.bf16.mxu0 %v1176_v24 }
  0x1a   :  { %1100 = vmatprep.subr.bf16.mxu1 %v1177_v25 }
  0x1c   :  { %1037 = vmatpush3.bf16.msra.mxu0 %v1178_v26 }
  0x1d   :  { %1101 = vmatpush3.bf16.msra.mxu1 %v1179_v27  ;;  %1038 = vmatprep.subr.bf16.mxu0 %v1180_v28 }
  0x1e   :  { %1102 = vmatprep.subr.bf16.mxu1 %v1181_v29 }
  0x20   :  { %1039 = vmatpush3.bf16.msra.mxu0 %v1182_v30 }
  0x21   :  { %1103 = vmatpush3.bf16.msra.mxu1 %v1183_v31 }
  0x23   :  { %493 = vmatmul.mubr.bf16.vlgmr.msra.gmra.mxu0 %v1184_v32 }
  0x24   :  { %590 = vmatmul.mubr.bf16.vlgmr.msra.gmra.mxu1 %v1187_v34  ;;  %500 = vmatprep.mubr.bf16.mxu0 %v1190_v36 }
  0x25   :  { %597 = vmatprep.mubr.bf16.mxu1 %v1192_v37 }
  0x2b   :  { %501 = vmatmul.mubr.bf16.gmra.mxu0 %v1194_v38 }
  0x2c   :  { %598 = vmatmul.mubr.bf16.gmra.mxu1 %v1195_v39  ;;  %508 = vmatprep.mubr.bf16.mxu0 %v1196_v40 }
  0x2d   :  { %605 = vmatprep.mubr.bf16.mxu1 %v1198_v41 }
  0x33   :  { %509 = vmatmul.mubr.bf16.gmra.mxu0 %v1200_v42 }
  0x34   :  { %606 = vmatmul.mubr.bf16.gmra.mxu1 %v1201_v43  ;;  %516 = vmatprep.mubr.bf16.mxu0 %v1202_v44 }
  0x35   :  { %613 = vmatprep.mubr.bf16.mxu1 %v1204_v45 }
  0x3b   :  { %517 = vmatmul.mubr.bf16.gmra.mxu0 %v1206_v46 }
  0x3c   :  { %614 = vmatmul.mubr.bf16.gmra.mxu1 %v1207_v47  ;;  %524 = vmatprep.mubr.bf16.mxu0 %v1208_v48 }
  0x3d   :  { %621 = vmatprep.mubr.bf16.mxu1 %v1210_v49 }
  0x43   :  { %525 = vmatmul.mubr.bf16.gmra.mxu0 %v1212_v50 }
  0x44   :  { %622 = vmatmul.mubr.bf16.gmra.mxu1 %v1213_v51  ;;  %532 = vmatprep.mubr.bf16.mxu0 %v1214_v52 }
  0x45   :  { %629 = vmatprep.mubr.bf16.mxu1 %v1216_v53 }
  0x4b   :  { %533 = vmatmul.mubr.bf16.gmra.mxu0 %v1218_v54 }
  0x4c   :  { %630 = vmatmul.mubr.bf16.gmra.mxu1 %v1219_v55  ;;  %540 = vmatprep.mubr.bf16.mxu0 %v1220_v56 }
  0x4d   :  { %637 = vmatprep.mubr.bf16.mxu1 %v1222_v57 }
  0x53   :  { %541 = vmatmul.mubr.bf16.gmra.mxu0 %v1224_v58 }
  0x54   :  { %638 = vmatmul.mubr.bf16.gmra.mxu1 %v1225_v59  ;;  %548 = vmatprep.mubr.bf16.mxu0 %v1226_v60 }
  0x55   :  { %645 = vmatprep.mubr.bf16.mxu1 %v1228_v61 }
  0x5b   :  { %549 = vmatmul.mubr.bf16.gmra.mxu0 %v1230_v62 }
  0x5c   :  { %646 = vmatmul.mubr.bf16.gmra.mxu1 %v1231_v63 }
  0xe3   :  { %v1040_v0 = vpop.f32.mrf.mxu0 }
  0xe4   :  { %v1104_v1 = vpop.f32.mrf.mxu1 }
  0xe5   :  { %v1041_v2 = vpop.f32.mrf.mxu0 }
  0xe6   :  { %v1105_v3 = vpop.f32.mrf.mxu1  ;;  %v1042_v36 = vadd.f32 %v1041_v2, %v1040_v0 }
  0xe7   :  { %v1043_v4 = vpop.f32.mrf.mxu0  ;;  %v1106_v37 = vadd.f32 %v1105_v3, %v1104_v1 }
  0xe8   :  { %v1107_v5 = vpop.f32.mrf.mxu1 }
  0xe9   :  { %v1044_v6 = vpop.f32.mrf.mxu0  ;;  %v1443_v47 = vadd.f32 %v1106_v37, %v1042_v36 }
  0xea   :  { %v1108_v7 = vpop.f32.mrf.mxu1  ;;  %v1045_v32 = vadd.f32 %v1044_v6, %v1043_v4 }
  0xeb   :  { %v1046_v8 = vpop.f32.mrf.mxu0  ;;  %v1109_v33 = vadd.f32 %v1108_v7, %v1107_v5 }
  0xec   :  { %v1110_v9 = vpop.f32.mrf.mxu1 }
  0xed   :  { %v1047_v10 = vpop.f32.mrf.mxu0  ;;  %v1441_v42 = vadd.f32 %v1109_v33, %v1045_v32 }
  0xee   :  { %v1111_v11 = vpop.f32.mrf.mxu1  ;;  %v1048_v38 = vadd.f32 %v1047_v10, %v1046_v8 }
  0xef   :  { %v1049_v12 = vpop.f32.mrf.mxu0  ;;  %v1112_v39 = vadd.f32 %v1111_v11, %v1110_v9  ;;  %v654_v53 = vadd.f32 %v1441_v42, %v1443_v47 }
  0xf0   :  { %v1113_v13 = vpop.f32.mrf.mxu1 }
  0xf1   :  { %v1050_v14 = vpop.f32.mrf.mxu0  ;;  %v1445_v48 = vadd.f32 %v1112_v39, %v1048_v38 }
  0xf2   :  { %v1114_v15 = vpop.f32.mrf.mxu1  ;;  %v1051_v43 = vadd.f32 %v1050_v14, %v1049_v12 }
  0xf3   :  { %v1052_v16 = vpop.f32.mrf.mxu0  ;;  %v1115_v44 = vadd.f32 %v1114_v15, %v1113_v13  ;;  %v655_v59 = vadd.f32 %v654_v53, %v1445_v48 }
  0xf4   :  { %v1116_v17 = vpop.f32.mrf.mxu1 }
  0xf5   :  { %v1053_v18 = vpop.f32.mrf.mxu0  ;;  %v1449_v54 = vadd.f32 %v1115_v44, %v1051_v43 }
  0xf6   :  { %v1117_v19 = vpop.f32.mrf.mxu1  ;;  %v1054_v49 = vadd.f32 %v1053_v18, %v1052_v16 }
  0xf7   :  { %v1055_v20 = vpop.f32.mrf.mxu0  ;;  %v1118_v50 = vadd.f32 %v1117_v19, %v1116_v17  ;;  %v656_v1 = vadd.f32 %v655_v59, %v1449_v54 }
  0xf8   :  { %v1119_v21 = vpop.f32.mrf.mxu1 }
  0xf9   :  { %v1056_v22 = vpop.f32.mrf.mxu0  ;;  %v1452_v60 = vadd.f32 %v1118_v50, %v1054_v49 }
  0xfa   :  { %v1120_v23 = vpop.f32.mrf.mxu1  ;;  %v1057_v55 = vadd.f32 %v1056_v22, %v1055_v20 }
  0xfb   :  { %v1058_v24 = vpop.f32.mrf.mxu0  ;;  %v1121_v56 = vadd.f32 %v1120_v23, %v1119_v21  ;;  %v657_v7 = vadd.f32 %v656_v1, %v1452_v60 }
  0xfc   :  { %v1122_v25 = vpop.f32.mrf.mxu1 }
  0xfd   :  { %v1059_v26 = vpop.f32.mrf.mxu0  ;;  %v1455_v2 = vadd.f32 %v1121_v56, %v1057_v55 }
  0xfe   :  { %v1123_v27 = vpop.f32.mrf.mxu1  ;;  %v1060_v61 = vadd.f32 %v1059_v26, %v1058_v24 }
  0xff   :  { %v1061_v28 = vpop.f32.mrf.mxu0  ;;  %v1124_v62 = vadd.f32 %v1123_v27, %v1122_v25  ;;  %v658_v13 = vadd.f32 %v657_v7, %v1455_v2 }
 0x100   :  { %v1125_v29 = vpop.f32.mrf.mxu1 }
 0x101   :  { %v1062_v30 = vpop.f32.mrf.mxu0  ;;  %v1458_v8 = vadd.f32 %v1124_v62, %v1060_v61 }
 0x102   :  { %v1126_v31 = vpop.f32.mrf.mxu1  ;;  %v1063_v3 = vadd.f32 %v1062_v30, %v1061_v28 }
 0x103   :  { %v1064_v34 = vpop.f32.mrf.mxu0  ;;  %v1127_v4 = vadd.f32 %v1126_v31, %v1125_v29  ;;  %v659_v19 = vadd.f32 %v658_v13, %v1458_v8 }
 0x104   :  { %v1128_v35 = vpop.f32.mrf.mxu1 }
 0x105   :  { %v1065_v40 = vpop.f32.mrf.mxu0  ;;  %v1461_v14 = vadd.f32 %v1127_v4, %v1063_v3 }
 0x106   :  { %v1129_v41 = vpop.f32.mrf.mxu1  ;;  %v1066_v9 = vadd.f32 %v1065_v40, %v1064_v34 }
 0x107   :  { %v1067_v45 = vpop.f32.mrf.mxu0  ;;  %v1130_v10 = vadd.f32 %v1129_v41, %v1128_v35  ;;  %v660_v25 = vadd.f32 %v659_v19, %v1461_v14 }
 0x108   :  { %v1131_v46 = vpop.f32.mrf.mxu1 }
 0x109   :  { %v1068_v51 = vpop.f32.mrf.mxu0  ;;  %v1464_v20 = vadd.f32 %v1130_v10, %v1066_v9 }
 0x10a   :  { %v1132_v52 = vpop.f32.mrf.mxu1  ;;  %v1069_v15 = vadd.f32 %v1068_v51, %v1067_v45 }
 0x10b   :  { %v1070_v57 = vpop.f32.mrf.mxu0  ;;  %v1133_v16 = vadd.f32 %v1132_v52, %v1131_v46  ;;  %v661_v31 = vadd.f32 %v660_v25, %v1464_v20 }
 0x10c   :  { %v1134_v58 = vpop.f32.mrf.mxu1 }
 0x10d   :  { %v1071_v63 = vpop.f32.mrf.mxu0  ;;  %v1467_v26 = vadd.f32 %v1133_v16, %v1069_v15 }
 0x10e   :  { %v1135_v0 = vpop.f32.mrf.mxu1  ;;  %v1072_v21 = vadd.f32 %v1071_v63, %v1070_v57 }
 0x10f   :  { %v1073_v5 = vpop.f32.mrf.mxu0  ;;  %v1136_v22 = vadd.f32 %v1135_v0, %v1134_v58  ;;  %v662_v37 = vadd.f32 %v661_v31, %v1467_v26 }
 0x110   :  { %v1137_v6 = vpop.f32.mrf.mxu1 }
 0x111   :  { %v1074_v11 = vpop.f32.mrf.mxu0  ;;  %v632_v32 = vadd.f32 %v1136_v22, %v1072_v21 }
 0x112   :  { %v1138_v12 = vpop.f32.mrf.mxu1  ;;  %v1075_v27 = vadd.f32 %v1074_v11, %v1073_v5 }
 0x113   :  { %v1076_v17 = vpop.f32.mrf.mxu0  ;;  %v1139_v28 = vadd.f32 %v1138_v12, %v1137_v6  ;;  %v663_v44 = vadd.f32 %v662_v37, %v632_v32 }
 0x114   :  { %v1140_v18 = vpop.f32.mrf.mxu1 }
 0x115   :  { %v1077_v23 = vpop.f32.mrf.mxu0  ;;  %v635_v38 = vadd.f32 %v1139_v28, %v1075_v27 }
 0x116   :  { %v1141_v24 = vpop.f32.mrf.mxu1  ;;  %v1078_v33 = vadd.f32 %v1077_v23, %v1076_v17 }
 0x117   :  { %v1079_v29 = vpop.f32.mrf.mxu0  ;;  %v1142_v34 = vadd.f32 %v1141_v24, %v1140_v18  ;;  %v664_v51 = vadd.f32 %v663_v44, %v635_v38 }
 0x118   :  { %v1143_v30 = vpop.f32.mrf.mxu1 }
 0x119   :  { %v1080_v35 = vpop.f32.mrf.mxu0  ;;  %v640_v45 = vadd.f32 %v1142_v34, %v1078_v33 }
 0x11a   :  { %v1144_v36 = vpop.f32.mrf.mxu1  ;;  %v1081_v39 = vadd.f32 %v1080_v35, %v1079_v29 }
 0x11b   :  { %v1145_v40 = vadd.f32 %v1144_v36, %v1143_v30  ;;  %v1082_v41 = vpop.f32.mrf.mxu0  ;;  %v665_v57 = vadd.f32 %v664_v51, %v640_v45 }
 0x11c   :  { %v1146_v43 = vpop.f32.mrf.mxu1 }
 0x11d   :  { %v1083_v46 = vpop.f32.mrf.mxu0  ;;  %v643_v52 = vadd.f32 %v1145_v40, %v1081_v39 }
 0x11e   :  { %v1084_v49 = vadd.f32 %v1083_v46, %v1082_v41  ;;  %v1147_v50 = vpop.f32.mrf.mxu1 }
 0x11f   :  { %v1148_v53 = vadd.f32 %v1147_v50, %v1146_v43  ;;  %v1085_v55 = vpop.f32.mrf.mxu0  ;;  %v666_v63 = vadd.f32 %v665_v57, %v643_v52 }
 0x120   :  { %v1149_v56 = vpop.f32.mrf.mxu1 }
 0x121   :  { %v648_v58 = vadd.f32 %v1148_v53, %v1084_v49  ;;  %v1086_v59 = vpop.f32.mrf.mxu0 }
 0x122   :  { %v1087_v61 = vadd.f32 %v1086_v59, %v1085_v55  ;;  %v1150_v62 = vpop.f32.mrf.mxu1 }
 0x123   :  { %v1151_v0 = vadd.f32 %v1150_v62, %v1149_v56  ;;  %v667_v1 = vadd.f32 %v666_v63, %v648_v58 }
 0x125   :  { %v651_v3 = vadd.f32 %v1151_v0, %v1087_v61 }
 0x127   :  { %v668_v4 = vadd.f32 %v667_v1, %v651_v3 }
 0x129   :  { %v669_v5 = vrot.slane %v668_v4, 4 }
 0x12b   :  { %v670_v6 = vadd.f32 %v669_v5, %v668_v4 }
 0x12d   :  { %v671_v7 = vrot.slane %v670_v6, 2 }
 0x12f   :  { %v672_v9 = vadd.f32 %v671_v7, %v670_v6 }
 0x131   :  { %v673_v10 = vrot.slane %v672_v9, 1 }
 0x133   :  { %v674_v11 = vadd.f32 %v673_v10, %v672_v9 }
 0x135   :  { %v676_v12 = vmul.f32 0.0078125, %v674_v11 }
 0x137   :  { %v677_v13 = vsub.f32 %v1443_v47, %v676_v12  ;;  %v678_v15 = vsub.f32 %v1441_v42, %v676_v12  ;;  %v679_v16 = vsub.f32 %v1445_v48, %v676_v12  ;;  %v680_v19 = vsub.f32 %v1449_v54, %v676_v12 }
 0x138   :  { %v681_v21 = vsub.f32 %v1452_v60, %v676_v12  ;;  %v682_v24 = vsub.f32 %v1455_v2, %v676_v12  ;;  %v683_v28 = vsub.f32 %v1458_v8, %v676_v12  ;;  %v684_v42 = vsub.f32 %v1461_v14, %v676_v12 }
 0x139   :  { %v693_v17 = vmul.f32 %v677_v13, %v677_v13  ;;  %v694_v18 = vmul.f32 %v678_v15, %v678_v15  ;;  %v695_v22 = vmul.f32 %v679_v16, %v679_v16  ;;  %v696_v25 = vmul.f32 %v680_v19, %v680_v19 }
 0x13a   :  { %v697_v29 = vmul.f32 %v681_v21, %v681_v21  ;;  %v698_v30 = vmul.f32 %v682_v24, %v682_v24  ;;  %v685_v31 = vsub.f32 %v1464_v20, %v676_v12  ;;  %v699_v33 = vmul.f32 %v683_v28, %v683_v28 }
 0x13b   :  { %v709_v23 = vadd.f32 %v694_v18, %v693_v17  ;;  %v686_v60 = vsub.f32 %v1467_v26, %v676_v12  ;;  %v700_v34 = vmul.f32 %v684_v42, %v684_v42  ;;  %v687_v36 = vsub.f32 %v632_v32, %v676_v12 }
 0x13c   :  { %v701_v2 = vmul.f32 %v685_v31, %v685_v31  ;;  %v688_v39 = vsub.f32 %v635_v38, %v676_v12  ;;  %v689_v41 = vsub.f32 %v640_v45, %v676_v12  ;;  %v690_v14 = vsub.f32 %v643_v52, %v676_v12 }
 0x13d   :  { %v710_v27 = vadd.f32 %v709_v23, %v695_v22  ;;  %v702_v40 = vmul.f32 %v686_v60, %v686_v60  ;;  %v703_v43 = vmul.f32 %v687_v36, %v687_v36  ;;  %v691_v50 = vsub.f32 %v648_v58, %v676_v12 }
 0x13e   :  { %v704_v46 = vmul.f32 %v688_v39, %v688_v39  ;;  %v705_v20 = vmul.f32 %v689_v41, %v689_v41  ;;  %v692_v53 = vsub.f32 %v651_v3, %v676_v12  ;;  %v706_v55 = vmul.f32 %v690_v14, %v690_v14 }
 0x13f   :  { %v711_v47 = vadd.f32 %v710_v27, %v696_v25  ;;  %v707_v56 = vmul.f32 %v691_v50, %v691_v50 }
 0x140   :  { %v708_v32 = vmul.f32 %v692_v53, %v692_v53 }
 0x141   :  { %v712_v48 = vadd.f32 %v711_v47, %v697_v29 }
 0x143   :  { %v713_v54 = vadd.f32 %v712_v48, %v698_v30 }
 0x145   :  { %v714_v35 = vadd.f32 %v713_v54, %v699_v33 }
 0x147   :  { %v715_v37 = vadd.f32 %v714_v35, %v700_v34 }
 0x149   :  { %v716_v8 = vadd.f32 %v715_v37, %v701_v2 }
 0x14b   :  { %v717_v44 = vadd.f32 %v716_v8, %v702_v40 }
 0x14d   :  { %v718_v49 = vadd.f32 %v717_v44, %v703_v43 }
 0x14f   :  { %v719_v51 = vadd.f32 %v718_v49, %v704_v46 }
 0x151   :  { %v720_v26 = vadd.f32 %v719_v51, %v705_v20 }
 0x153   :  { %v721_v57 = vadd.f32 %v720_v26, %v706_v55 }
 0x155   :  { %v722_v59 = vadd.f32 %v721_v57, %v707_v56 }
 0x157   :  { %v723_v61 = vadd.f32 %v722_v59, %v708_v32 }
 0x159   :  { %v724_v38 = vrot.slane %v723_v61, 4 }
 0x15b   :  { %v725_v62 = vadd.f32 %v724_v38, %v723_v61 }
 0x15d   :  { %v726_v63 = vrot.slane %v725_v62, 2 }
 0x15f   :  { %v727_v45 = vadd.f32 %v726_v63, %v725_v62 }
 0x161   :  { %v728_v0 = vrot.slane %v727_v45, 1 }
 0x163   :  { %v729_v1 = vadd.f32 %v728_v0, %v727_v45 }
 0x165   :  { %v730_v52 = vmul.f32 0.0078125, %v729_v1 }
 0x167   :  { %v731_v4 = vadd.f32 1e-05, %v730_v52 }
 0x169   :  { %1232 = vrsqrt.f32 %v731_v4 }
 0x176   :  { %v1233_v58 = vpop.eup %1232 }
 0x177   :  { %v733_v5 = vmul.f32 %v1233_v58, %v677_v13  ;;  %v734_v6 = vmul.f32 %v1233_v58, %v678_v15  ;;  %v735_v3 = vmul.f32 %v1233_v58, %v679_v16  ;;  %v736_v7 = vmul.f32 %v1233_v58, %v680_v19 }
 0x178   :  { %v737_v9 = vmul.f32 %v1233_v58, %v681_v21  ;;  %v738_v10 = vmul.f32 %v1233_v58, %v682_v24  ;;  %v739_v11 = vmul.f32 %v1233_v58, %v683_v28  ;;  %v740_v12 = vmul.f32 %v1233_v58, %v684_v42 }
 0x179   :  { %v741_v17 = vmul.f32 %v1233_v58, %v685_v31  ;;  %v742_v18 = vmul.f32 %v1233_v58, %v686_v60  ;;  %v743_v22 = vmul.f32 %v1233_v58, %v687_v36  ;;  %v744_v23 = vmul.f32 %v1233_v58, %v688_v39 }
 0x17a   :  { %v745_v25 = vmul.f32 %v1233_v58, %v689_v41  ;;  %v746_v27 = vmul.f32 %v1233_v58, %v690_v14  ;;  %v747_v29 = vmul.f32 %v1233_v58, %v691_v50  ;;  %v748_v47 = vmul.f32 %v1233_v58, %v692_v53 }
 0x17b   :  { %vm749_vm0 = vcmp.gt.f32.partialorder %v733_v5, 0.0  ;;  %vm750_vm1 = vcmp.gt.f32.partialorder %v734_v6, 0.0  ;;  %vm751_vm2 = vcmp.gt.f32.partialorder %v735_v3, 0.0  ;;  %vm752_vm3 = vcmp.gt.f32.partialorder %v736_v7, 0.0 }
 0x17c   :  { %vm753_vm4 = vcmp.gt.f32.partialorder %v737_v9, 0.0  ;;  %vm754_vm5 = vcmp.gt.f32.partialorder %v738_v10, 0.0  ;;  %vm755_vm6 = vcmp.gt.f32.partialorder %v739_v11, 0.0  ;;  %vm756_vm7 = vcmp.gt.f32.partialorder %v740_v12, 0.0 }
 0x17d   :  { %vm757_vm8 = vcmp.gt.f32.partialorder %v741_v17, 0.0  ;;  %vm758_vm9 = vcmp.gt.f32.partialorder %v742_v18, 0.0  ;;  %vm759_vm10 = vcmp.gt.f32.partialorder %v743_v22, 0.0  ;;  %vm760_vm11 = vcmp.gt.f32.partialorder %v744_v23, 0.0 }
 0x17e   :  { %vm761_vm12 = vcmp.gt.f32.partialorder %v745_v25, 0.0  ;;  %vm762_vm13 = vcmp.gt.f32.partialorder %v746_v27, 0.0  ;;  %vm763_vm14 = vcmp.gt.f32.partialorder %v747_v29, 0.0  ;;  %vm764_vm15 = vcmp.gt.f32.partialorder %v748_v47, 0.0 }
 0x17f   :  { %v765_v13 = vmul.f32 0.2, %v733_v5  ;;  %v766_v15 = vmul.f32 0.2, %v734_v6  ;;  %v767_v16 = vmul.f32 0.2, %v735_v3 }
 0x180   :  { %v768_v19 = vmul.f32 0.2, %v736_v7  ;;  %v769_v21 = vmul.f32 0.2, %v737_v9  ;;  %v770_v24 = vmul.f32 0.2, %v738_v10 }
 0x181   :  { %v771_v28 = vmul.f32 0.2, %v739_v11  ;;  %v772_v42 = vmul.f32 0.2, %v740_v12  ;;  %v773_v30 = vmul.f32 0.2, %v741_v17  ;;  %v781_v48 = vsel %vm749_vm0, %v733_v5, %v765_v13 }
 0x182   :  { %v774_v31 = vmul.f32 0.2, %v742_v18  ;;  %v775_v33 = vmul.f32 0.2, %v743_v22  ;;  %v776_v54 = vmul.f32 0.2, %v744_v23  ;;  %v782_v60 = vsel %vm750_vm1, %v734_v6, %v766_v15 }
 0x183   :  { %v777_v34 = vmul.f32 0.2, %v745_v25  ;;  %v778_v35 = vmul.f32 0.2, %v746_v27  ;;  %v779_v36 = vmul.f32 0.2, %v747_v29  ;;  %v783_v2 = vsel %vm751_vm2, %v735_v3, %v767_v16 }
 0x184   :  { %v780_v37 = vmul.f32 0.2, %v748_v47  ;;  %v784_v39 = vsel %vm752_vm3, %v736_v7, %v768_v19  ;;  %v785_v40 = vsel %vm753_vm4, %v737_v9, %v769_v21  ;;  %v786_v8 = vsel %vm754_vm5, %v738_v10, %v770_v24 }
 0x185   :  { %v787_v41 = vsel %vm755_vm6, %v739_v11, %v771_v28  ;;  %v788_v43 = vsel %vm756_vm7, %v740_v12, %v772_v42  ;;  %v789_v44 = vsel %vm757_vm8, %v741_v17, %v773_v30  ;;  %v790_v14 = vsel %vm758_vm9, %v742_v18, %v774_v31 }
 0x186   :  { %v791_v46 = vsel %vm759_vm10, %v743_v22, %v775_v33  ;;  %v792_v49 = vsel %vm760_vm11, %v744_v23, %v776_v54  ;;  %v793_v50 = vsel %vm761_vm12, %v745_v25, %v777_v34  ;;  %v794_v20 = vsel %vm762_vm13, %v746_v27, %v778_v35 }
 0x187   :  { %v795_v51 = vsel %vm763_vm14, %v747_v29, %v779_v36  ;;  %v796_v53 = vsel %vm764_vm15, %v748_v47, %v780_v37  ;;  %v980_v55 = vpack.c.bf16 %v782_v60, %v781_v48  ;;  %v985_v26 = vpack.c.bf16 %v784_v39, %v783_v2 }
 0x188   :  { %v990_v56 = vpack.c.bf16 %v786_v8, %v785_v40  ;;  %v995_v57 = vpack.c.bf16 %v788_v43, %v787_v41  ;;  %v1000_v32 = vpack.c.bf16 %v790_v14, %v789_v44  ;;  %v1005_v59 = vpack.c.bf16 %v792_v49, %v791_v46 }
 0x189   :  { %981 = vst [vmem:[%s1523_s2] sm:$0xff] %v980_v55   ;;  %1017 = vst [vmem:[%s1523_s2 + $0x8] sm:$0xff] %v985_v26   ;;  %v1010_v61 = vpack.c.bf16 %v794_v20, %v793_v50  ;;  %v1015_v38 = vpack.c.bf16 %v796_v53, %v795_v51 }
 0x18a   :  { %1018 = vst [vmem:[%s1523_s2 + $0x10] sm:$0xff] %v990_v56   ;;  %1019 = vst [vmem:[%s1523_s2 + $0x18] sm:$0xff] %v995_v57  }
 0x18b   :  { %1020 = vst [vmem:[%s1523_s2 + $0x20] sm:$0xff] %v1000_v32   ;;  %1021 = vst [vmem:[%s1523_s2 + $0x28] sm:$0xff] %v1005_v59  }
 0x18c   :  { %1022 = vst [vmem:[%s1523_s2 + $0x30] sm:$0xff] %v1010_v61   ;;  %1023 = vst [vmem:[%s1523_s2 + $0x38] sm:$0xff] %v1015_v38  }

// kernel: discriminator_forward.7
= control target key start
LH: loop header
LB: loop body
LE: loop exit
PB: predicated region body
PF: predicated region fallthrough
CT: control target
= control target key end

     0   :  { %s1425_s1 = inlined_call_operand.vmem [shape: bf16[1024,128], index: 1, kind: input, shape index: {}]   ;;  %s1426_s0 = inlined_call_operand.vmem [shape: bf16[32,1024], index: 0, kind: input, shape index: {}]   ;;  %s1427_s2 = inlined_call_operand.vmem [shape: bf16[32,128], index: 2, kind: output, shape index: {}]  }
   0x1   :  { %v1098_v0 = vld [vmem:[%s1425_s1 + $0x78] sm:$0xff]   ;;  %v1102_v4 = vld [vmem:[%s1425_s1 + $0x70] sm:$0xff]   ;;  %v1106_v8 = vld [vmem:[%s1425_s1 + $0x68] sm:$0xff]  }
   0x2   :  { %v1099_v1 = vld [vmem:[%s1425_s1 + $0xf8] sm:$0xff]   ;;  %986 = vmatprep.subr.bf16.mxu0 %v1098_v0  ;;  %v1103_v5 = vld [vmem:[%s1425_s1 + $0xf0] sm:$0xff]   ;;  %v1107_v9 = vld [vmem:[%s1425_s1 + $0xe8] sm:$0xff]  }
   0x3   :  { %v1100_v2 = vld [vmem:[%s1425_s1 + $0x38] sm:$0xff]   ;;  %1014 = vmatprep.subr.bf16.mxu1 %v1099_v1  ;;  %v1104_v6 = vld [vmem:[%s1425_s1 + $0x30] sm:$0xff]   ;;  %v1108_v10 = vld [vmem:[%s1425_s1 + $0x28] sm:$0xff]  }
   0x4   :  { %v1101_v3 = vld [vmem:[%s1425_s1 + $0xb8] sm:$0xff]   ;;  %987 = vmatpush3.bf16.msra.mxu0 %v1100_v2  ;;  %v1105_v7 = vld [vmem:[%s1425_s1 + $0xb0] sm:$0xff]   ;;  %v1109_v11 = vld [vmem:[%s1425_s1 + $0xa8] sm:$0xff]  }
   0x5   :  { %1015 = vmatpush3.bf16.msra.mxu1 %v1101_v3  ;;  %988 = vmatprep.subr.bf16.mxu0 %v1102_v4  ;;  %v1110_v12 = vld [vmem:[%s1425_s1 + $0x60] sm:$0xff]   ;;  %v1114_v16 = vld [vmem:[%s1425_s1 + $0x58] sm:$0xff]   ;;  %v1118_v20 = vld [vmem:[%s1425_s1 + $0x50] sm:$0xff]  }
   0x6   :  { %1016 = vmatprep.subr.bf16.mxu1 %v1103_v5  ;;  %v1111_v13 = vld [vmem:[%s1425_s1 + $0xe0] sm:$0xff]   ;;  %v1115_v17 = vld [vmem:[%s1425_s1 + $0xd8] sm:$0xff]   ;;  %v1119_v21 = vld [vmem:[%s1425_s1 + $0xd0] sm:$0xff]  }
   0x7   :  { %v1112_v14 = vld [vmem:[%s1425_s1 + $0x20] sm:$0xff]   ;;  %v1116_v18 = vld [vmem:[%s1425_s1 + $0x18] sm:$0xff]   ;;  %v1120_v22 = vld [vmem:[%s1425_s1 + $0x10] sm:$0xff]  }
   0x8   :  { %989 = vmatpush3.bf16.msra.mxu0 %v1104_v6  ;;  %v1113_v15 = vld [vmem:[%s1425_s1 + $0xa0] sm:$0xff]   ;;  %v1117_v19 = vld [vmem:[%s1425_s1 + $0x98] sm:$0xff]   ;;  %v1121_v23 = vld [vmem:[%s1425_s1 + $0x90] sm:$0xff]  }
   0x9   :  { %1017 = vmatpush3.bf16.msra.mxu1 %v1105_v7  ;;  %990 = vmatprep.subr.bf16.mxu0 %v1106_v8  ;;  %v1122_v24 = vld [vmem:[%s1425_s1 + $0x48] sm:$0xff]   ;;  %v1126_v28 = vld [vmem:[%s1425_s1 + $0x40] sm:$0xff]   ;;  %v1130_v40 = vld [vmem:[%s1425_s1 + $0x178] sm:$0xff]  }
   0xa   :  { %1018 = vmatprep.subr.bf16.mxu1 %v1107_v9  ;;  %v1123_v25 = vld [vmem:[%s1425_s1 + $0xc8] sm:$0xff]   ;;  %v1127_v29 = vld [vmem:[%s1425_s1 + $0xc0] sm:$0xff]   ;;  %v1131_v41 = vld [vmem:[%s1425_s1 + $0x1f8] sm:$0xff]  }
   0xb   :  { %v1124_v26 = vld [vmem:[%s1425_s1 + $0x8] sm:$0xff]   ;;  %v1128_v30 = vld [vmem:[%s1425_s1] sm:$0xff]   ;;  %v1132_v42 = vld [vmem:[%s1425_s1 + $0x138] sm:$0xff]  }
   0xc   :  { %991 = vmatpush3.bf16.msra.mxu0 %v1108_v10  ;;  %v1125_v27 = vld [vmem:[%s1425_s1 + $0x88] sm:$0xff]   ;;  %v1129_v31 = vld [vmem:[%s1425_s1 + $0x80] sm:$0xff]   ;;  %v1133_v43 = vld [vmem:[%s1425_s1 + $0x1b8] sm:$0xff]  }
   0xd   :  { %1019 = vmatpush3.bf16.msra.mxu1 %v1109_v11  ;;  %992 = vmatprep.subr.bf16.mxu0 %v1110_v12  ;;  %v12_v32 = vld [vmem:[%s1426_s0] sm:$0xff]  ;;  %v13_v34 = vld [vmem:[%s1426_s0 + $0x8] sm:$0xff]  ;;  %v1134_v44 = vld [vmem:[%s1425_s1 + $0x170] sm:$0xff]  }
   0xe   :  { %1020 = vmatprep.subr.bf16.mxu1 %v1111_v13  ;;  %v16_v33 = vld [vmem:[%s1426_s0 + $0x20] sm:$0xff]  ;;  %v17_v37 = vld [vmem:[%s1426_s0 + $0x28] sm:$0xff]  ;;  %v1135_v45 = vld [vmem:[%s1425_s1 + $0x1f0] sm:$0xff]  }
   0xf   :  { %v887_v35 = vcombine.low %v12_v32, %v16_v33  ;;  %v888_v36 = vcombine.high %v12_v32, %v16_v33  ;;  %v889_v38 = vcombine.low %v13_v34, %v17_v37  ;;  %v890_v39 = vcombine.high %v13_v34, %v17_v37  ;;  %v1136_v46 = vld [vmem:[%s1425_s1 + $0x130] sm:$0xff]   ;;  %v1138_v48 = vld [vmem:[%s1425_s1 + $0x168] sm:$0xff]   ;;  %v1142_v52 = vld [vmem:[%s1425_s1 + $0x160] sm:$0xff]  }
  0x10   :  { %993 = vmatpush3.bf16.msra.mxu0 %v1112_v14  ;;  %v1137_v47 = vld [vmem:[%s1425_s1 + $0x1b0] sm:$0xff]   ;;  %v1139_v49 = vld [vmem:[%s1425_s1 + $0x1e8] sm:$0xff]   ;;  %v1143_v53 = vld [vmem:[%s1425_s1 + $0x1e0] sm:$0xff]  }
  0x11   :  { %1021 = vmatpush3.bf16.msra.mxu1 %v1113_v15  ;;  %994 = vmatprep.subr.bf16.mxu0 %v1114_v16  ;;  %v1140_v50 = vld [vmem:[%s1425_s1 + $0x128] sm:$0xff]   ;;  %v1144_v54 = vld [vmem:[%s1425_s1 + $0x120] sm:$0xff]   ;;  %v1146_v56 = vld [vmem:[%s1425_s1 + $0x158] sm:$0xff]  }
  0x12   :  { %1022 = vmatprep.subr.bf16.mxu1 %v1115_v17  ;;  %652 = vmatprep.mubr.bf16.mxu0 %v888_v36  ;;  %v1141_v51 = vld [vmem:[%s1425_s1 + $0x1a8] sm:$0xff]   ;;  %v1145_v55 = vld [vmem:[%s1425_s1 + $0x1a0] sm:$0xff]   ;;  %v1147_v57 = vld [vmem:[%s1425_s1 + $0x1d8] sm:$0xff]  }
  0x13   :  { %701 = vmatprep.mubr.bf16.mxu1 %v890_v39  ;;  %v20_v58 = vld [vmem:[%s1426_s0 + $0x40] sm:$0xff]  ;;  %v21_v61 = vld [vmem:[%s1426_s0 + $0x48] sm:$0xff]  ;;  %v1148_v1 = vld [vmem:[%s1425_s1 + $0x118] sm:$0xff]  }
  0x14   :  { %995 = vmatpush3.bf16.msra.mxu0 %v1116_v18  ;;  %v24_v59 = vld [vmem:[%s1426_s0 + $0x60] sm:$0xff]  ;;  %v25_v62 = vld [vmem:[%s1426_s0 + $0x68] sm:$0xff]  ;;  %v1149_v3 = vld [vmem:[%s1425_s1 + $0x198] sm:$0xff]  }
  0x15   :  { %1023 = vmatpush3.bf16.msra.mxu1 %v1117_v19  ;;  %996 = vmatprep.subr.bf16.mxu0 %v1118_v20  ;;  %v896_v60 = vcombine.high %v20_v58, %v24_v59  ;;  %v895_v63 = vcombine.low %v20_v58, %v24_v59  ;;  %v898_v0 = vcombine.high %v21_v61, %v25_v62  ;;  %v1150_v4 = vld [vmem:[%s1425_s1 + $0x150] sm:$0xff]   ;;  %v1154_v8 = vld [vmem:[%s1425_s1 + $0x148] sm:$0xff]   ;;  %v1158_v12 = vld [vmem:[%s1425_s1 + $0x140] sm:$0xff]  }
  0x16   :  { %1024 = vmatprep.subr.bf16.mxu1 %v1119_v21  ;;  %v897_v2 = vcombine.low %v21_v61, %v25_v62  ;;  %v1151_v5 = vld [vmem:[%s1425_s1 + $0x1d0] sm:$0xff]   ;;  %v1155_v9 = vld [vmem:[%s1425_s1 + $0x1c8] sm:$0xff]   ;;  %v1159_v13 = vld [vmem:[%s1425_s1 + $0x1c0] sm:$0xff]  }
  0x17   :  { %v1152_v6 = vld [vmem:[%s1425_s1 + $0x110] sm:$0xff]   ;;  %v1156_v10 = vld [vmem:[%s1425_s1 + $0x108] sm:$0xff]   ;;  %v1160_v14 = vld [vmem:[%s1425_s1 + $0x100] sm:$0xff]  }
  0x18   :  { %997 = vmatpush3.bf16.msra.mxu0 %v1120_v22  ;;  %v1153_v7 = vld [vmem:[%s1425_s1 + $0x190] sm:$0xff]   ;;  %v1157_v11 = vld [vmem:[%s1425_s1 + $0x188] sm:$0xff]   ;;  %v1161_v15 = vld [vmem:[%s1425_s1 + $0x180] sm:$0xff]  }
  0x19   :  { %1025 = vmatpush3.bf16.msra.mxu1 %v1121_v23  ;;  %998 = vmatprep.subr.bf16.mxu0 %v1122_v24  ;;  %v14_v16 = vld [vmem:[%s1426_s0 + $0x10] sm:$0xff]  ;;  %v15_v18 = vld [vmem:[%s1426_s0 + $0x18] sm:$0xff] }
  0x1a   :  { %1026 = vmatprep.subr.bf16.mxu1 %v1123_v25  ;;  %v18_v17 = vld [vmem:[%s1426_s0 + $0x30] sm:$0xff]  ;;  %v19_v19 = vld [vmem:[%s1426_s0 + $0x38] sm:$0xff] }
  0x1b   :  { %v891_v20 = vcombine.low %v14_v16, %v18_v17  ;;  %v892_v21 = vcombine.high %v14_v16, %v18_v17  ;;  %v893_v22 = vcombine.low %v15_v18, %v19_v19  ;;  %v894_v23 = vcombine.high %v15_v18, %v19_v19  ;;  %v22_v24 = vld [vmem:[%s1426_s0 + $0x50] sm:$0xff] }
  0x1c   :  { %999 = vmatpush3.bf16.msra.mxu0 %v1124_v26  ;;  %v26_v25 = vld [vmem:[%s1426_s0 + $0x70] sm:$0xff]  ;;  %v23_v26 = vld [vmem:[%s1426_s0 + $0x58] sm:$0xff] }
  0x1d   :  { %1027 = vmatpush3.bf16.msra.mxu1 %v1125_v27  ;;  %1000 = vmatprep.subr.bf16.mxu0 %v1126_v28  ;;  %v900_v27 = vcombine.high %v22_v24, %v26_v25  ;;  %v27_v28 = vld [vmem:[%s1426_s0 + $0x78] sm:$0xff] }
  0x1e   :  { %1028 = vmatprep.subr.bf16.mxu1 %v1127_v29  ;;  %v902_v29 = vcombine.high %v23_v26, %v27_v28 }
  0x20   :  { %1001 = vmatpush3.bf16.msra.mxu0 %v1128_v30  ;;  %v899_v30 = vcombine.low %v22_v24, %v26_v25 }
  0x21   :  { %1029 = vmatpush3.bf16.msra.mxu1 %v1129_v31  ;;  %1042 = vmatprep.subr.bf16.mxu0 %v1130_v40  ;;  %v901_v31 = vcombine.low %v23_v26, %v27_v28 }
  0x22   :  { %1070 = vmatprep.subr.bf16.mxu1 %v1131_v41 }
  0x23   :  { %653 = vmatmul.mubr.bf16.vlgmr.msra.gmra.mxu0 %v887_v35 }
  0x24   :  { %702 = vmatmul.mubr.bf16.vlgmr.msra.gmra.mxu1 %v889_v38  ;;  %1043 = vmatpush3.bf16.msra.mxu0 %v1132_v42 }
  0x25   :  { %1071 = vmatpush3.bf16.msra.mxu1 %v1133_v43  ;;  %1044 = vmatprep.subr.bf16.mxu0 %v1134_v44 }
  0x26   :  { %1072 = vmatprep.subr.bf16.mxu1 %v1135_v45  ;;  %660 = vmatprep.mubr.bf16.mxu0 %v896_v60 }
  0x27   :  { %709 = vmatprep.mubr.bf16.mxu1 %v898_v0 }
  0x28   :  { %1045 = vmatpush3.bf16.msra.mxu0 %v1136_v46 }
  0x29   :  { %1073 = vmatpush3.bf16.msra.mxu1 %v1137_v47  ;;  %1046 = vmatprep.subr.bf16.mxu0 %v1138_v48 }
  0x2a   :  { %1074 = vmatprep.subr.bf16.mxu1 %v1139_v49 }
  0x2b   :  { %661 = vmatmul.mubr.bf16.gmra.mxu0 %v895_v63 }
  0x2c   :  { %1047 = vmatpush3.bf16.msra.mxu0 %v1140_v50  ;;  %710 = vmatmul.mubr.bf16.gmra.mxu1 %v897_v2 }
  0x2d   :  { %1075 = vmatpush3.bf16.msra.mxu1 %v1141_v51  ;;  %1048 = vmatprep.subr.bf16.mxu0 %v1142_v52 }
  0x2e   :  { %1076 = vmatprep.subr.bf16.mxu1 %v1143_v53  ;;  %750 = vmatprep.mubr.bf16.mxu0 %v892_v21 }
  0x2f   :  { %799 = vmatprep.mubr.bf16.mxu1 %v894_v23 }
  0x30   :  { %1049 = vmatpush3.bf16.msra.mxu0 %v1144_v54 }
  0x31   :  { %1077 = vmatpush3.bf16.msra.mxu1 %v1145_v55  ;;  %1050 = vmatprep.subr.bf16.mxu0 %v1146_v56 }
  0x32   :  { %1078 = vmatprep.subr.bf16.mxu1 %v1147_v57 }
  0x34   :  { %1051 = vmatpush3.bf16.msra.mxu0 %v1148_v1 }
  0x35   :  { %1079 = vmatpush3.bf16.msra.mxu1 %v1149_v3  ;;  %1052 = vmatprep.subr.bf16.mxu0 %v1150_v4 }
  0x36   :  { %1080 = vmatprep.subr.bf16.mxu1 %v1151_v5 }
  0x38   :  { %1053 = vmatpush3.bf16.msra.mxu0 %v1152_v6 }
  0x39   :  { %1081 = vmatpush3.bf16.msra.mxu1 %v1153_v7  ;;  %1054 = vmatprep.subr.bf16.mxu0 %v1154_v8 }
  0x3a   :  { %1082 = vmatprep.subr.bf16.mxu1 %v1155_v9 }
  0x3c   :  { %1055 = vmatpush3.bf16.msra.mxu0 %v1156_v10 }
  0x3d   :  { %1083 = vmatpush3.bf16.msra.mxu1 %v1157_v11  ;;  %1056 = vmatprep.subr.bf16.mxu0 %v1158_v12 }
  0x3e   :  { %1084 = vmatprep.subr.bf16.mxu1 %v1159_v13 }
  0x40   :  { %1057 = vmatpush3.bf16.msra.mxu0 %v1160_v14 }
  0x41   :  { %1085 = vmatpush3.bf16.msra.mxu1 %v1161_v15 }
  0x43   :  { %751 = vmatmul.mubr.bf16.vlgmr.msra.gmra.mxu0 %v891_v20 }
  0x44   :  { %800 = vmatmul.mubr.bf16.vlgmr.msra.gmra.mxu1 %v893_v22  ;;  %758 = vmatprep.mubr.bf16.mxu0 %v900_v27 }
  0x45   :  { %807 = vmatprep.mubr.bf16.mxu1 %v902_v29 }
  0x4b   :  { %759 = vmatmul.mubr.bf16.gmra.mxu0 %v899_v30 }
  0x4c   :  { %808 = vmatmul.mubr.bf16.gmra.mxu1 %v901_v31 }
  0xe3   :  { %v1002_v32 = vpop.f32.mrf.mxu0 }
  0xe4   :  { %v1030_v33 = vpop.f32.mrf.mxu1 }
  0xe5   :  { %v1003_v34 = vpop.f32.mrf.mxu0 }
  0xe6   :  { %v1031_v35 = vpop.f32.mrf.mxu1  ;;  %v1004_v56 = vadd.f32 %v1003_v34, %v1002_v32 }
  0xe7   :  { %v1005_v36 = vpop.f32.mrf.mxu0  ;;  %v1032_v57 = vadd.f32 %v1031_v35, %v1030_v33 }
  0xe8   :  { %v1033_v37 = vpop.f32.mrf.mxu1 }
  0xe9   :  { %v1006_v38 = vpop.f32.mrf.mxu0  ;;  %v704_v3 = vadd.f32 %v1032_v57, %v1004_v56 }
  0xea   :  { %v1034_v39 = vpop.f32.mrf.mxu1  ;;  %v1007_v52 = vadd.f32 %v1006_v38, %v1005_v36 }
  0xeb   :  { %v1008_v40 = vpop.f32.mrf.mxu0  ;;  %v1035_v53 = vadd.f32 %v1034_v39, %v1033_v37 }
  0xec   :  { %v1036_v41 = vpop.f32.mrf.mxu1 }
  0xed   :  { %v1009_v42 = vpop.f32.mrf.mxu0  ;;  %v707_v62 = vadd.f32 %v1035_v53, %v1007_v52 }
  0xee   :  { %v1037_v43 = vpop.f32.mrf.mxu1  ;;  %v1010_v58 = vadd.f32 %v1009_v42, %v1008_v40 }
  0xef   :  { %v1011_v44 = vpop.f32.mrf.mxu0  ;;  %v1038_v59 = vadd.f32 %v1037_v43, %v1036_v41 }
  0xf0   :  { %v1039_v45 = vpop.f32.mrf.mxu1 }
  0xf1   :  { %v1012_v46 = vpop.f32.mrf.mxu0  ;;  %v712_v5 = vadd.f32 %v1038_v59, %v1010_v58 }
  0xf2   :  { %v1040_v47 = vpop.f32.mrf.mxu1  ;;  %v1013_v6 = vadd.f32 %v1012_v46, %v1011_v44 }
  0xf3   :  { %v1041_v9 = vadd.f32 %v1040_v47, %v1039_v45 }
  0xf5   :  { %v715_v21 = vadd.f32 %v1041_v9, %v1013_v6 }
 0x103   :  { %v1058_v48 = vpop.f32.mrf.mxu0 }
 0x104   :  { %v1086_v49 = vpop.f32.mrf.mxu1 }
 0x105   :  { %v1059_v50 = vpop.f32.mrf.mxu0 }
 0x106   :  { %v1087_v51 = vpop.f32.mrf.mxu1  ;;  %v1060_v63 = vadd.f32 %v1059_v50, %v1058_v48 }
 0x107   :  { %v1061_v54 = vpop.f32.mrf.mxu0  ;;  %v1088_v15 = vadd.f32 %v1087_v51, %v1086_v49 }
 0x108   :  { %v1089_v55 = vpop.f32.mrf.mxu1  ;;  %v753_v10 = vadd.f32 %v1060_v63, %v704_v3 }
 0x109   :  { %v1062_v60 = vpop.f32.mrf.mxu0 }
 0x10a   :  { %v1090_v61 = vpop.f32.mrf.mxu1  ;;  %v1063_v0 = vadd.f32 %v1062_v60, %v1061_v54  ;;  %v802_v22 = vadd.f32 %v1088_v15, %v753_v10 }
 0x10b   :  { %v1064_v1 = vpop.f32.mrf.mxu0  ;;  %v1091_v11 = vadd.f32 %v1090_v61, %v1089_v55 }
 0x10c   :  { %v1092_v2 = vpop.f32.mrf.mxu1  ;;  %v756_v4 = vadd.f32 %v1063_v0, %v707_v62 }
 0x10d   :  { %v1065_v7 = vpop.f32.mrf.mxu0 }
 0x10e   :  { %v1093_v8 = vpop.f32.mrf.mxu1  ;;  %v1066_v12 = vadd.f32 %v1065_v7, %v1064_v1  ;;  %v805_v16 = vadd.f32 %v1091_v11, %v756_v4 }
 0x10f   :  { %v1067_v13 = vpop.f32.mrf.mxu0  ;;  %v1094_v18 = vadd.f32 %v1093_v8, %v1092_v2 }
 0x110   :  { %v1095_v14 = vpop.f32.mrf.mxu1  ;;  %v761_v17 = vadd.f32 %v1066_v12, %v712_v5  ;;  %v816_v25 = vadd.f32 %v805_v16, %v802_v22 }
 0x111   :  { %v1068_v19 = vpop.f32.mrf.mxu0 }
 0x112   :  { %v1096_v20 = vpop.f32.mrf.mxu1  ;;  %v810_v23 = vadd.f32 %v1094_v18, %v761_v17  ;;  %v1069_v24 = vadd.f32 %v1068_v19, %v1067_v13 }
 0x113   :  { %v1097_v27 = vadd.f32 %v1096_v20, %v1095_v14 }
 0x114   :  { %v764_v26 = vadd.f32 %v1069_v24, %v715_v21  ;;  %v817_v28 = vadd.f32 %v816_v25, %v810_v23 }
 0x116   :  { %v813_v29 = vadd.f32 %v1097_v27, %v764_v26 }
 0x118   :  { %v818_v30 = vadd.f32 %v817_v28, %v813_v29 }
 0x11a   :  { %v819_v31 = vrot.slane %v818_v30, 4 }
 0x11c   :  { %v820_v32 = vadd.f32 %v819_v31, %v818_v30 }
 0x11e   :  { %v821_v33 = vrot.slane %v820_v32, 2 }
 0x120   :  { %v822_v34 = vadd.f32 %v821_v33, %v820_v32 }
 0x122   :  { %v823_v35 = vrot.slane %v822_v34, 1 }
 0x124   :  { %v824_v36 = vadd.f32 %v823_v35, %v822_v34 }
 0x126   :  { %v826_v37 = vmul.f32 0.03125, %v824_v36 }
 0x128   :  { %v827_v38 = vsub.f32 %v802_v22, %v826_v37  ;;  %v828_v39 = vsub.f32 %v805_v16, %v826_v37  ;;  %v829_v40 = vsub.f32 %v810_v23, %v826_v37  ;;  %v830_v41 = vsub.f32 %v813_v29, %v826_v37 }
 0x12a   :  { %v831_v42 = vmul.f32 %v827_v38, %v827_v38  ;;  %v832_v43 = vmul.f32 %v828_v39, %v828_v39  ;;  %v833_v44 = vmul.f32 %v829_v40, %v829_v40  ;;  %v834_v46 = vmul.f32 %v830_v41, %v830_v41 }
 0x12c   :  { %v835_v45 = vadd.f32 %v832_v43, %v831_v42 }
 0x12e   :  { %v836_v47 = vadd.f32 %v835_v45, %v833_v44 }
 0x130   :  { %v837_v48 = vadd.f32 %v836_v47, %v834_v46 }
 0x132   :  { %v838_v49 = vrot.slane %v837_v48, 4 }
 0x134   :  { %v839_v50 = vadd.f32 %v838_v49, %v837_v48 }
 0x136   :  { %v840_v51 = vrot.slane %v839_v50, 2 }
 0x138   :  { %v841_v52 = vadd.f32 %v840_v51, %v839_v50 }
 0x13a   :  { %v842_v53 = vrot.slane %v841_v52, 1 }
 0x13c   :  { %v843_v54 = vadd.f32 %v842_v53, %v841_v52 }
 0x13e   :  { %v844_v55 = vmul.f32 0.03125, %v843_v54 }
 0x140   :  { %v845_v56 = vadd.f32 1e-05, %v844_v55 }
 0x142   :  { %1162 = vrsqrt.f32 %v845_v56 }
 0x14f   :  { %v1163_v57 = vpop.eup %1162 }
 0x150   :  { %v847_v58 = vmul.f32 %v1163_v57, %v827_v38  ;;  %v848_v59 = vmul.f32 %v1163_v57, %v828_v39  ;;  %v849_v60 = vmul.f32 %v1163_v57, %v829_v40  ;;  %v850_v61 = vmul.f32 %v1163_v57, %v830_v41 }
 0x152   :  { %vm851_vm0 = vcmp.gt.f32.partialorder %v847_v58, 0.0  ;;  %vm852_vm1 = vcmp.gt.f32.partialorder %v848_v59, 0.0  ;;  %vm853_vm2 = vcmp.gt.f32.partialorder %v849_v60, 0.0  ;;  %vm854_vm3 = vcmp.gt.f32.partialorder %v850_v61, 0.0 }
 0x153   :  { %v855_v62 = vmul.f32 0.2, %v847_v58  ;;  %v856_v63 = vmul.f32 0.2, %v848_v59  ;;  %v857_v0 = vmul.f32 0.2, %v849_v60 }
 0x154   :  { %v858_v1 = vmul.f32 0.2, %v850_v61 }
 0x155   :  { %v859_v2 = vsel %vm851_vm0, %v847_v58, %v855_v62  ;;  %v860_v3 = vsel %vm852_vm1, %v848_v59, %v856_v63  ;;  %v861_v4 = vsel %vm853_vm2, %v849_v60, %v857_v0 }
 0x156   :  { %v862_v5 = vsel %vm854_vm3, %v850_v61, %v858_v1  ;;  %v978_v6 = vpack.c.bf16 %v860_v3, %v859_v2 }
 0x157   :  { %v983_v7 = vpack.c.bf16 %v862_v5, %v861_v4 }
 0x158   :  { %979 = vst [vmem:[%s1427_s2] sm:$0xff] %v978_v6  }
 0x159   :  { %985 = vst [vmem:[%s1427_s2 + $0x8] sm:$0xff] %v983_v7  }

</bundles_post_ra>
